<compile_context>
chip_gen: v5e
topology: v5e:2x2
jax: 0.10.0
libtpu: 0.0.40
codegen_flags: <defaults>
</compile_context>

<pallas_src>
import functools
import math

import jax
import jax.numpy as jnp
from jax.experimental import pallas as pl
from jax.experimental.pallas import tpu as pltpu

_EPS_LN = 1e-5
_NEG_INF = -1e30                 # finite additive key-padding bias (avoids NaNs)
_COMPUTE_DTYPE = jnp.bfloat16    # weights / streamed activations / MXU inputs


def _vmem_capacity_bytes():
    try:
        return int(pltpu.get_tpu_info().vmem_capacity_bytes)
    except Exception:            # no TPU info available -> conservative (v7x per-TC)
        return 64 * 1024 * 1024


_VMEM_PHYS = _vmem_capacity_bytes()
_VMEM_LIMIT = min(int(_VMEM_PHYS * 0.85), 110 * 1024 * 1024)
_ROW_TILE = 512 if _VMEM_PHYS >= (96 << 20) else 256       # v5e/v6e vs v7x
_ATTN_TILE = 256 if _VMEM_PHYS >= (96 << 20) else 128


def _cparams(sem):
    return pltpu.CompilerParams(dimension_semantics=sem,
                                vmem_limit_bytes=_VMEM_LIMIT)


def _layernorm(x, g, b):
    mu = jnp.mean(x, axis=-1, keepdims=True)
    xc = x - mu
    var = jnp.mean(xc * xc, axis=-1, keepdims=True)
    return xc * jax.lax.rsqrt(var + _EPS_LN) * g + b


def _cast(x):
    return x.astype(_COMPUTE_DTYPE)


# --------------------------------------------------------------------------
# Fused feed-forward module: LN -> W1 -> SiLU -> W2, half-step residual,
# optional trailing LayerNorm (fuses final_layer_norm into FFN2).
# --------------------------------------------------------------------------

def _ffn_kernel(x_ref, g_ref, b_ref, w1_ref, b1_ref, w2_ref, b2_ref,
                gf_ref, bf_ref, o_ref, *, res_scale, final_ln):
    x = x_ref[...].astype(jnp.float32)
    h = _layernorm(x, g_ref[...], b_ref[...])
    h = jnp.dot(_cast(h), w1_ref[...],
                preferred_element_type=jnp.float32) + b1_ref[...]
    h = h * jax.nn.sigmoid(h)                                    # SiLU
    h = jnp.dot(_cast(h), w2_ref[...],
                preferred_element_type=jnp.float32) + b2_ref[...]
    y = x + res_scale * h
    if final_ln:
        y = _layernorm(y, gf_ref[...], bf_ref[...])
    o_ref[...] = y.astype(o_ref.dtype)


def fused_ffn(x2d, g, b, w1, b1, w2, b2, *, res_scale=0.5,
              final_ln_g=None, final_ln_b=None, out_dtype=None):
    M, D = x2d.shape
    F = w1.shape[1]
    final_ln = final_ln_g is not None
    if final_ln_g is None:                    # dummies (unused when final_ln=False)
        final_ln_g = jnp.ones((D,), jnp.float32)
        final_ln_b = jnp.zeros((D,), jnp.float32)
    out_dtype = _COMPUTE_DTYPE if out_dtype is None else out_dtype
    tm = min(M, _ROW_TILE)
    row = lambda i: (i, 0)
    rep = lambda i: (0, 0)
    # TODO(synk): on v7x, add a K/F reduction grid axis + pl.Buffered(1) weight
    # single-buffering when D*F weights exceed ~8 MiB.
    return pl.pallas_call(
        functools.partial(_ffn_kernel, res_scale=res_scale, final_ln=final_ln),
        out_shape=jax.ShapeDtypeStruct((M, D), out_dtype),
        grid=(pl.cdiv(M, tm),),
        in_specs=[
            pl.BlockSpec((tm, D), row),
            pl.BlockSpec((1, D), rep), pl.BlockSpec((1, D), rep),
            pl.BlockSpec((D, F), rep), pl.BlockSpec((1, F), rep),
            pl.BlockSpec((F, D), rep), pl.BlockSpec((1, D), rep),
            pl.BlockSpec((1, D), rep), pl.BlockSpec((1, D), rep),
        ],
        out_specs=pl.BlockSpec((tm, D), row),
        compiler_params=_cparams(("parallel",)),
    )(x2d, g.reshape(1, D), b.reshape(1, D), w1, b1.reshape(1, F),
      w2, b2.reshape(1, D), final_ln_g.reshape(1, D), final_ln_b.reshape(1, D))


# --------------------------------------------------------------------------
# Fused (optional LayerNorm +) packed K|V projection with head-major output:
#   k_out, v_out : (B, H, S, dh)  in bf16 (halves the kv re-stream cost and
#   keeps the attention hot loop free of lane slicing).
# --------------------------------------------------------------------------

def _kv_proj_kernel(x_ref, g_ref, b_ref, w_ref, bias_ref, k_ref, v_ref,
                    *, use_ln, num_heads, head_dim):
    x = x_ref[0].astype(jnp.float32)
    h = _layernorm(x, g_ref[...], b_ref[...]) if use_ln else x
    y = jnp.dot(_cast(h), w_ref[...],
                preferred_element_type=jnp.float32) + bias_ref[...]   # (ts, 2D)
    D = num_heads * head_dim
    for hd in range(num_heads):                                       # head split,
        k_ref[0, hd] = y[:, hd * head_dim:(hd + 1) * head_dim].astype(k_ref.dtype)
        v_ref[0, hd] = y[:, D + hd * head_dim:
                            D + (hd + 1) * head_dim].astype(v_ref.dtype)


def fused_kv_projection(x, w, bias, *, num_heads, ln_g=None, ln_b=None):
    B, S, Din = x.shape
    Dout2 = w.shape[1]
    D = Dout2 // 2
    dh = D // num_heads
    use_ln = ln_g is not None
    if ln_g is None:
        ln_g = jnp.ones((Din,), jnp.float32)
        ln_b = jnp.zeros((Din,), jnp.float32)
    ts = min(S, _ROW_TILE)
    rep = lambda bb, si: (0, 0)
    out_spec = pl.BlockSpec((1, num_heads, ts, dh), lambda bb, si: (bb, 0, si, 0))
    return pl.pallas_call(
        functools.partial(_kv_proj_kernel, use_ln=use_ln,
                          num_heads=num_heads, head_dim=dh),
        out_shape=(jax.ShapeDtypeStruct((B, num_heads, S, dh), _COMPUTE_DTYPE),
                   jax.ShapeDtypeStruct((B, num_heads, S, dh), _COMPUTE_DTYPE)),
        grid=(B, pl.cdiv(S, ts)),
        in_specs=[
            pl.BlockSpec((1, ts, Din), lambda bb, si: (bb, si, 0)),
            pl.BlockSpec((1, Din), rep), pl.BlockSpec((1, Din), rep),
            pl.BlockSpec((Din, Dout2), rep), pl.BlockSpec((1, Dout2), rep),
        ],
        out_specs=(out_spec, out_spec),
        compiler_params=_cparams(("parallel", "parallel")),
    )(x, ln_g.reshape(1, Din), ln_b.reshape(1, Din), w, bias.reshape(1, Dout2))


# --------------------------------------------------------------------------
# Fused flash attention: (q LayerNorm + Q-proj) + kv-tiled online softmax in a
# head-major (H, tq, dh) layout + per-head out-proj + residual; optionally the
# FiLM gain/shift epilogue is fused in (cross-attention path).
# --------------------------------------------------------------------------

def _flash_attn_kernel(x_ref, g_ref, b_ref, wq_ref, bq_ref, k_ref, v_ref,
                       bias_ref, wo_ref, bo_ref, *rest,
                       num_heads, head_dim, scale, kv_len, tk, fuse_film):
    if fuse_film:
        wf_ref, bf_ref, o_ref, q_scr, acc_scr, m_scr, l_scr = rest
    else:
        o_ref, q_scr, acc_scr, m_scr, l_scr = rest

    ki = pl.program_id(2)
    nk = pl.num_programs(2)
    D = num_heads * head_dim

    @pl.when(ki == 0)
    def _():
        x = x_ref[0].astype(jnp.float32)
        h = _layernorm(x, g_ref[...], b_ref[...])
        q = (jnp.dot(_cast(h), wq_ref[...],
                     preferred_element_type=jnp.float32) + bq_ref[...]) * scale
        q = q.astype(q_scr.dtype)
        for hd in range(num_heads):                       # once per q block only
            q_scr[hd] = q[:, hd * head_dim:(hd + 1) * head_dim]
        acc_scr[...] = jnp.zeros_like(acc_scr)
        m_scr[...] = jnp.full_like(m_scr, _NEG_INF)
        l_scr[...] = jnp.zeros_like(l_scr)

    k = k_ref[0]                                          # (H, tk, dh) bf16
    v = v_ref[0]
    bias = bias_ref[0]                                    # (1, tk) f32
    if kv_len % tk != 0:                                  # trace-time: only if a
        rows = ki * tk + jax.lax.broadcasted_iota(jnp.int32, (tk, 1), 0)
        k = jnp.where(rows < kv_len, k, jnp.zeros_like(k))
        v = jnp.where(rows < kv_len, v, jnp.zeros_like(v))
        cols = ki * tk + jax.lax.broadcasted_iota(jnp.int32, (1, tk), 1)
        bias = jnp.where(cols < kv_len, bias, _NEG_INF)   # partial last block

    # hot path: full-ref reads/writes only, batched head einsums on the MXU
    s = jnp.einsum('hqd,hkd->hqk', q_scr[...], k,
                   preferred_element_type=jnp.float32) + bias       # (H, tq, tk)
    m_prev = m_scr[...]                                             # (H, tq, 1)
    m_new = jnp.maximum(m_prev, jnp.max(s, axis=-1, keepdims=True))
    alpha = jnp.exp(m_prev - m_new)
    p = jnp.exp(s - m_new)
    l_scr[...] = alpha * l_scr[...] + jnp.sum(p, axis=-1, keepdims=True)
    acc_scr[...] = alpha * acc_scr[...] + jnp.einsum(
        'hqk,hkd->hqd', p.astype(_COMPUTE_DTYPE), v,
        preferred_element_type=jnp.float32)
    m_scr[...] = m_new

    @pl.when(ki == nk - 1)
    def _():
        inv = pl.reciprocal(l_scr[...], approx=True)                # EUP slot
        attn = (acc_scr[...] * inv).astype(_COMPUTE_DTYPE)          # (H, tq, dh)
        res = x_ref[0].astype(jnp.float32)                          # residual
        y = bo_ref[...] + res
        for hd in range(num_heads):                                 # head merge via
            y = y + jnp.dot(attn[hd], wo_ref[hd],                   # per-head out-proj
                            preferred_element_type=jnp.float32)
        if fuse_film:
            gs = jnp.dot(_cast(y), wf_ref[...],
                         preferred_element_type=jnp.float32) + bf_ref[...]
            out = res * gs[:, :D] + gs[:, D:]                       # FiLM(residual, y)
        else:
            out = y
        o_ref[0] = out.astype(o_ref.dtype)


def fused_attention(x, k, v, bias, ln_g, ln_b, wq, bq, wo_h, bo, *, num_heads,
                    film_w=None, film_b=None):
    B, T, D = x.shape
    H = num_heads
    dh = D // H
    S = k.shape[2]
    tq = min(T, _ATTN_TILE)
    tk = min(S, _ATTN_TILE)
    fuse_film = film_w is not None
    rep2 = lambda b, qi, ki: (0, 0)
    rep3 = lambda b, qi, ki: (0, 0, 0)
    in_specs = [
        pl.BlockSpec((1, tq, D), lambda b, qi, ki: (b, qi, 0)),        # x (residual)
        pl.BlockSpec((1, D), rep2), pl.BlockSpec((1, D), rep2),        # LN g, b
        pl.BlockSpec((D, D), rep2), pl.BlockSpec((1, D), rep2),        # wq, bq
        # TODO(synk): pipeline_mode=pl.Buffered(3) on the kv stream once tuned.
        pl.BlockSpec((1, H, tk, dh), lambda b, qi, ki: (b, 0, ki, 0)),  # k
        pl.BlockSpec((1, H, tk, dh), lambda b, qi, ki: (b, 0, ki, 0)),  # v
        pl.BlockSpec((1, 1, tk), lambda b, qi, ki: (b, 0, ki)),         # key bias
        pl.BlockSpec((H, dh, D), rep3), pl.BlockSpec((1, D), rep2),     # wo, bo
    ]
    args = [x, ln_g.reshape(1, D), ln_b.reshape(1, D), wq, bq.reshape(1, D),
            k, v, bias, wo_h, bo.reshape(1, D)]
    if fuse_film:
        in_specs += [pl.BlockSpec((D, 2 * D), rep2),
                     pl.BlockSpec((1, 2 * D), rep2)]
        args += [film_w, film_b.reshape(1, 2 * D)]
    return pl.pallas_call(
        functools.partial(_flash_attn_kernel, num_heads=H, head_dim=dh,
                          scale=1.0 / math.sqrt(dh), kv_len=S, tk=tk,
                          fuse_film=fuse_film),
        out_shape=jax.ShapeDtypeStruct((B, T, D), _COMPUTE_DTYPE),
        grid=(B, pl.cdiv(T, tq), pl.cdiv(S, tk)),
        in_specs=in_specs,
        out_specs=pl.BlockSpec((1, tq, D), lambda b, qi, ki: (b, qi, 0)),
        scratch_shapes=[
            pltpu.VMEM((H, tq, dh), _COMPUTE_DTYPE),   # scaled q (head-major)
            pltpu.VMEM((H, tq, dh), jnp.float32),      # flash accumulator
            pltpu.VMEM((H, tq, 1), jnp.float32),       # running max
            pltpu.VMEM((H, tq, 1), jnp.float32),       # running sum
        ],
        compiler_params=_cparams(("parallel", "parallel", "arbitrary")),
    )(*args)


# --------------------------------------------------------------------------
# Fused convolution module: LN -> pointwise(2D) -> GLU -> depthwise(K) ->
# BatchNorm(eval, folded) -> SiLU -> pointwise(D) -> residual.
# Tiled over T with a (K-1)/2 halo built from the neighbouring tiles;
# depthwise taps are static sublane slices of the halo block.
# --------------------------------------------------------------------------

def _conv_module_kernel(xc_ref, xp_ref, xn_ref, g_ref, b_ref, w1_ref, b1_ref,
                        dww_ref, dwb_ref, bns_ref, bnb_ref, w2_ref, b2_ref,
                        o_ref, *, kernel_size, t_total, t_tile):
    pad = (kernel_size - 1) // 2
    j = pl.program_id(1)
    x_cur = xc_ref[0].astype(jnp.float32)                         # (tT, D)
    D = x_cur.shape[-1]
    if pad > 0:
        prev_tail = xp_ref[0, t_tile - pad:, :].astype(jnp.float32)
        next_head = xn_ref[0, :pad, :].astype(jnp.float32)
        xh = jnp.concatenate([prev_tail, x_cur, next_head], axis=0)
    else:
        xh = x_cur                                                # (tT + 2*pad, D)
    h = _layernorm(xh, g_ref[...], b_ref[...])
    h = jnp.dot(_cast(h), w1_ref[...],
                preferred_element_type=jnp.float32) + b1_ref[...]  # (tT+2p, 2D)
    glu = h[:, :D] * jax.nn.sigmoid(h[:, D:])                      # GLU
    if pad > 0:
        # zero rows outside [0, T): the 'SAME' zero padding of the depthwise conv
        gidx = (j * t_tile - pad
                + jax.lax.broadcasted_iota(jnp.int32, (t_tile + 2 * pad, 1), 0))
        glu = jnp.where((gidx >= 0) & (gidx < t_total), glu, 0.0)
    w = dww_ref[...]                                              # (K, D) f32
    acc = jnp.zeros((t_tile, D), jnp.float32)
    for kk in range(kernel_size):                                 # static halo slices
        acc = acc + glu[kk:kk + t_tile, :] * w[kk:kk + 1, :]
    y = acc + dwb_ref[...]
    y = y * bns_ref[...] + bnb_ref[...]                           # BatchNorm1d (eval)
    y = y * jax.nn.sigmoid(y)                                     # SiLU
    y = jnp.dot(_cast(y), w2_ref[...],
                preferred_element_type=jnp.float32) + b2_ref[...]
    o_ref[0] = (x_cur + y).astype(o_ref.dtype)                    # residual


def fused_conv_module(x, g, b, w1, b1, dw_w, dw_b, bn_scale, bn_shift, w2, b2,
                      *, kernel_size):
    B, T, D = x.shape
    pad = (kernel_size - 1) // 2
    tT = min(T, _ROW_TILE)
    assert tT >= pad, "time tile must cover the conv halo"
    nT = pl.cdiv(T, tT)
    rep = lambda bb, j: (0, 0)
    return pl.pallas_call(
        functools.partial(_conv_module_kernel, kernel_size=kernel_size,
                          t_total=T, t_tile=tT),
        out_shape=jax.ShapeDtypeStruct((B, T, D), _COMPUTE_DTYPE),
        grid=(B, nT),
        in_specs=[
            pl.BlockSpec((1, tT, D), lambda bb, j: (bb, j, 0)),                   # cur
            pl.BlockSpec((1, tT, D), lambda bb, j: (bb, jnp.maximum(j - 1, 0), 0)),   # prev (halo)
            pl.BlockSpec((1, tT, D), lambda bb, j: (bb, jnp.minimum(j + 1, nT - 1), 0)),  # next (halo)
            pl.BlockSpec((1, D), rep), pl.BlockSpec((1, D), rep),
            pl.BlockSpec((D, 2 * D), rep), pl.BlockSpec((1, 2 * D), rep),
            pl.BlockSpec((kernel_size, D), rep), pl.BlockSpec((1, D), rep),
            pl.BlockSpec((1, D), rep), pl.BlockSpec((1, D), rep),
            pl.BlockSpec((D, D), rep), pl.BlockSpec((1, D), rep),
        ],
        out_specs=pl.BlockSpec((1, tT, D), lambda bb, j: (bb, j, 0)),
        compiler_params=_cparams(("parallel", "parallel")),
    )(x, x, x, g.reshape(1, D), b.reshape(1, D), w1, b1.reshape(1, 2 * D),
      dw_w, dw_b.reshape(1, D), bn_scale.reshape(1, D), bn_shift.reshape(1, D),
      w2, b2.reshape(1, D))


# --------------------------------------------------------------------------
# Layer forward (mirrors CondConformerLayer.forward, eval mode)
# --------------------------------------------------------------------------

def cond_conformer_layer(p, x, cond, key_bias, cond_key_bias, *,
                         num_heads, kernel_size):
    """x: (B, T, D) f32; cond: (B, S, Dc) f32; key biases: (B,1,T) / (B,1,S)
    additive key-padding biases (0 = valid, -1e30 = padded)."""
    # TODO(synk): dropout and training-mode BatchNorm (batch stats) not modeled.
    B, T, D = x.shape
    M = B * T

    # ---- FFN1 (half-step residual) ----
    x2 = fused_ffn(x.reshape(M, D), p["ffn1_ln_g"], p["ffn1_ln_b"],
                   p["ffn1_w1"], p["ffn1_b1"], p["ffn1_w2"], p["ffn1_b2"],
                   res_scale=0.5)
    x3 = x2.reshape(B, T, D)

    # ---- Self-attention (pre-LN shared by q and kv; residual fused) ----
    # TODO(synk): fuse the self-attn KV projection into the attention kernel
    # (per-kv-tile LN + proj) when ceil(T/tq) is small.
    k_s, v_s = fused_kv_projection(x3, p["sa_wkv"], p["sa_bkv"],
                                   num_heads=num_heads,
                                   ln_g=p["sa_ln_g"], ln_b=p["sa_ln_b"])
    x3 = fused_attention(x3, k_s, v_s, key_bias, p["sa_ln_g"], p["sa_ln_b"],
                         p["sa_wq"], p["sa_bq"], p["sa_wo"], p["sa_bo"],
                         num_heads=num_heads)

    # ---- Convolution module (convolution_first=False => after self-attn) ----
    x3 = fused_conv_module(x3, p["conv_ln_g"], p["conv_ln_b"], p["conv_w1"],
                           p["conv_b1"], p["conv_dw_w"], p["conv_dw_b"],
                           p["conv_bn_scale"], p["conv_bn_shift"],
                           p["conv_w2"], p["conv_b2"], kernel_size=kernel_size)

    # ---- Cross-attention over cond_keyinfo + residual + FiLM (all fused) ----
    k_c, v_c = fused_kv_projection(cond, p["ca_wkv"], p["ca_bkv"],
                                   num_heads=num_heads)
    x3 = fused_attention(x3, k_c, v_c, cond_key_bias, p["ca_ln_g"], p["ca_ln_b"],
                         p["ca_wq"], p["ca_bq"], p["ca_wo"], p["ca_bo"],
                         num_heads=num_heads,
                         film_w=p["film_w"], film_b=p["film_b"])

    # ---- FFN2 (half-step residual) + final LayerNorm (fused) ----
    out = fused_ffn(x3.reshape(M, D), p["ffn2_ln_g"], p["ffn2_ln_b"],
                    p["ffn2_w1"], p["ffn2_b1"], p["ffn2_w2"], p["ffn2_b2"],
                    res_scale=0.5, final_ln_g=p["final_ln_g"],
                    final_ln_b=p["final_ln_b"], out_dtype=jnp.float32)
    return out.reshape(B, T, D)


# --------------------------------------------------------------------------
# Deterministic synthetic parameters.  Matmul weights stored in bf16 and in
# kernel-friendly layouts (q / packed K|V split, head-major out-proj, packed
# FiLM gain|bias, folded BatchNorm) -- all done once at init time.
# --------------------------------------------------------------------------

def init_params(key, *, D, F, Dc, H, K):
    dh = D // H
    keys = iter(jax.random.split(key, 64))

    def nrm(shape, s=0.05, dtype=jnp.float32):
        return (s * jax.random.normal(next(keys), shape, jnp.float32)).astype(dtype)

    wdt = _COMPUTE_DTYPE
    eps_bn = 1e-5
    bn_gamma = 1.0 + nrm((D,))
    bn_beta = nrm((D,))
    bn_mean = nrm((D,))
    bn_var = 1.0 + jnp.abs(nrm((D,)))
    bn_scale = bn_gamma * jax.lax.rsqrt(bn_var + eps_bn)
    bn_shift = bn_beta - bn_mean * bn_scale
    film_b = jnp.concatenate([jnp.ones((D,), jnp.float32),       # gain bias = 1
                              jnp.zeros((D,), jnp.float32)])     # bias bias = 0
    return {
        "ffn1_ln_g": jnp.ones((D,)), "ffn1_ln_b": jnp.zeros((D,)),
        "ffn1_w1": nrm((D, F), dtype=wdt), "ffn1_b1": nrm((F,)),
        "ffn1_w2": nrm((F, D), dtype=wdt), "ffn1_b2": nrm((D,)),
        # self-attention (in_proj split into q and packed k|v at init time)
        "sa_ln_g": jnp.ones((D,)), "sa_ln_b": jnp.zeros((D,)),
        "sa_wq": nrm((D, D), dtype=wdt), "sa_bq": nrm((D,)),
        "sa_wkv": nrm((D, 2 * D), dtype=wdt), "sa_bkv": nrm((2 * D,)),
        "sa_wo": nrm((H, dh, D), dtype=wdt), "sa_bo": nrm((D,)),
        # convolution module (bias=True)
        "conv_ln_g": jnp.ones((D,)), "conv_ln_b": jnp.zeros((D,)),
        "conv_w1": nrm((D, 2 * D), dtype=wdt), "conv_b1": nrm((2 * D,)),
        "conv_dw_w": nrm((K, D)), "conv_dw_b": nrm((D,)),
        "conv_bn_scale": bn_scale, "conv_bn_shift": bn_shift,
        "conv_w2": nrm((D, D), dtype=wdt), "conv_b2": nrm((D,)),
        # cross-attention (kdim = vdim = Dc)
        "ca_ln_g": jnp.ones((D,)), "ca_ln_b": jnp.zeros((D,)),
        "ca_wq": nrm((D, D), dtype=wdt), "ca_bq": nrm((D,)),
        "ca_wkv": nrm((Dc, 2 * D), dtype=wdt), "ca_bkv": nrm((2 * D,)),
        "ca_wo": nrm((H, dh, D), dtype=wdt), "ca_bo": nrm((D,)),
        # FiLM (gain|bias packed into one (D, 2D) matmul)
        "film_w": nrm((D, 2 * D), dtype=wdt), "film_b": film_b,
        "ffn2_ln_g": jnp.ones((D,)), "ffn2_ln_b": jnp.zeros((D,)),
        "ffn2_w1": nrm((D, F), dtype=wdt), "ffn2_b1": nrm((F,)),
        "ffn2_w2": nrm((F, D), dtype=wdt), "ffn2_b2": nrm((D,)),
        "final_ln_g": jnp.ones((D,)), "final_ln_b": jnp.zeros((D,)),
    }


# --------------------------------------------------------------------------
# Main
# --------------------------------------------------------------------------

if __name__ == "__main__":
    B, T, D = 2, 8, 32          # batch, frames, input_dim
    S, Dc = 8, 24               # cond_keyinfo length / cond_keyinfo_dim
    H, F, K = 4, 64, 7          # num_attention_heads, ffn_dim, depthwise kernel
    # NOTE: production shapes should keep D (and ideally head_dim) multiples of
    # 128; the demo shapes are for smoke-testing only.

    key = jax.random.PRNGKey(0)
    kx, kc, kp = jax.random.split(key, 3)

    x = jax.random.normal(kx, (B, T, D), dtype=jnp.float32)
    cond = jax.random.normal(kc, (B, S, Dc), dtype=jnp.float32)

    # key_padding_mask: 1 = valid frame, 0 = padded (batch 1 pads last 2 frames).
    # Fully-padded rows get a uniform (not NaN) softmax: finite -1e30 bias.
    masks = jnp.ones((B, T), jnp.float32).at[1, 6:].set(0.0)
    key_bias = jnp.where(masks > 0.5, 0.0, _NEG_INF)[:, None, :]     # (B, 1, T)
    # PyTorch passes the same key_padding_mask to self- and cross-attention
    # (implies S == T whenever a mask is given).
    cond_key_bias = key_bias

    params = init_params(kp, D=D, F=F, Dc=Dc, H=H, K=K)

    fwd = jax.jit(functools.partial(cond_conformer_layer,
                                    num_heads=H, kernel_size=K))
    out = fwd(params, x, cond, key_bias, cond_key_bias)
    out = jax.block_until_ready(out)

    assert out.shape == (B, T, D), out.shape
    assert bool(jnp.all(jnp.isfinite(out)))
    print("KERNEL_OK")
</pallas_src>

<mosaic_0001>
module attributes {stable_mosaic.version = 11 : i64} {
  func.func @_kv_proj_kernel(%arg0: i32, %arg1: i32, %arg2: memref<1x8x32xbf16, #tpu.memory_space<vmem>>, %arg3: memref<1x32xf32, #tpu.memory_space<vmem>>, %arg4: memref<1x32xf32, #tpu.memory_space<vmem>>, %arg5: memref<32x64xbf16, #tpu.memory_space<vmem>>, %arg6: memref<1x64xf32, #tpu.memory_space<vmem>>, %arg7: memref<1x4x8x8xbf16, #tpu.memory_space<vmem>>, %arg8: memref<1x4x8x8xbf16, #tpu.memory_space<vmem>>) attributes {dimension_semantics = [#tpu.dimension_semantics<parallel>, #tpu.dimension_semantics<parallel>], iteration_bounds = array<i64: 2, 1>, scalar_prefetch = 0 : i64, scratch_operands = 0 : i64, tpu.core_type = #tpu.core_type<tc>, window_params = [{transform_indices = @transform_0, window_bounds = array<i64: 1, 8, 32>}, {pipeline_mode = #tpu.pipeline_mode<synchronous>, transform_indices = @transform_1, window_bounds = array<i64: 1, 32>}, {pipeline_mode = #tpu.pipeline_mode<synchronous>, transform_indices = @transform_2, window_bounds = array<i64: 1, 32>}, {pipeline_mode = #tpu.pipeline_mode<synchronous>, transform_indices = @transform_3, window_bounds = array<i64: 32, 64>}, {pipeline_mode = #tpu.pipeline_mode<synchronous>, transform_indices = @transform_4, window_bounds = array<i64: 1, 64>}, {transform_indices = @transform_5, window_bounds = array<i64: 1, 4, 8, 8>}, {transform_indices = @transform_6, window_bounds = array<i64: 1, 4, 8, 8>}]} {
    %c0 = arith.constant 0 : index
    %c0_0 = arith.constant 0 : index
    %c0_1 = arith.constant 0 : index
    %0 = vector.load %arg2[%c0, %c0_0, %c0_1] : memref<1x8x32xbf16, #tpu.memory_space<vmem>>, vector<1x8x32xbf16>
    %1 = vector.shape_cast %0 : vector<1x8x32xbf16> to vector<8x32xbf16>
    %2 = arith.extf %1 : vector<8x32xbf16> to vector<8x32xf32>
    %c0_2 = arith.constant 0 : index
    %c0_3 = arith.constant 0 : index
    %3 = vector.load %arg3[%c0_2, %c0_3] : memref<1x32xf32, #tpu.memory_space<vmem>>, vector<1x32xf32>
    %c0_4 = arith.constant 0 : index
    %c0_5 = arith.constant 0 : index
    %4 = vector.load %arg4[%c0_4, %c0_5] : memref<1x32xf32, #tpu.memory_space<vmem>>, vector<1x32xf32>
    %cst = arith.constant dense<0.000000e+00> : vector<8xf32>
    %5 = vector.multi_reduction <add>, %2, %cst [1] : vector<8x32xf32> to vector<8xf32>
    %6 = vector.shape_cast %5 : vector<8xf32> to vector<8x1xf32>
    %cst_6 = arith.constant 3.200000e+01 : f32
    %7 = vector.broadcast %cst_6 : f32 to vector<8x1xf32>
    %8 = arith.divf %6, %7 : vector<8x1xf32>
    %9 = vector.broadcast %8 : vector<8x1xf32> to vector<8x32xf32>
    %10 = arith.subf %2, %9 : vector<8x32xf32>
    %11 = arith.mulf %10, %10 : vector<8x32xf32>
    %cst_7 = arith.constant dense<0.000000e+00> : vector<8xf32>
    %12 = vector.multi_reduction <add>, %11, %cst_7 [1] : vector<8x32xf32> to vector<8xf32>
    %13 = vector.shape_cast %12 : vector<8xf32> to vector<8x1xf32>
    %cst_8 = arith.constant 3.200000e+01 : f32
    %14 = vector.broadcast %cst_8 : f32 to vector<8x1xf32>
    %15 = arith.divf %13, %14 : vector<8x1xf32>
    %cst_9 = arith.constant 9.99999974E-6 : f32
    %16 = vector.broadcast %cst_9 : f32 to vector<8x1xf32>
    %17 = arith.addf %15, %16 : vector<8x1xf32>
    %18 = math.rsqrt %17 : vector<8x1xf32>
    %19 = vector.broadcast %18 : vector<8x1xf32> to vector<8x32xf32>
    %20 = arith.mulf %10, %19 : vector<8x32xf32>
    %21 = vector.broadcast %3 : vector<1x32xf32> to vector<8x32xf32>
    %22 = arith.mulf %20, %21 : vector<8x32xf32>
    %23 = vector.broadcast %4 : vector<1x32xf32> to vector<8x32xf32>
    %24 = arith.addf %22, %23 : vector<8x32xf32>
    %25 = arith.truncf %24 : vector<8x32xf32> to vector<8x32xbf16>
    %c0_10 = arith.constant 0 : index
    %c0_11 = arith.constant 0 : index
    %26 = vector.load %arg5[%c0_10, %c0_11] : memref<32x64xbf16, #tpu.memory_space<vmem>>, vector<32x64xbf16>
    %cst_12 = arith.constant dense<0.000000e+00> : vector<8x64xf32>
    %27 = tpu.matmul %25, %26, %cst_12 {dimension_numbers = #tpu.dot_dimension_numbers<[1], [0], [0], [1], [0, 0, 1, 1], [], []>} : vector<8x32xbf16>, vector<32x64xbf16>, vector<8x64xf32> -> vector<8x64xf32>
    %c0_13 = arith.constant 0 : index
    %c0_14 = arith.constant 0 : index
    %28 = vector.load %arg6[%c0_13, %c0_14] : memref<1x64xf32, #tpu.memory_space<vmem>>, vector<1x64xf32>
    %29 = vector.broadcast %28 : vector<1x64xf32> to vector<8x64xf32>
    %30 = arith.addf %27, %29 : vector<8x64xf32>
    %31 = vector.extract_strided_slice %30 {offsets = [0, 0], sizes = [8, 8], strides = [1, 1]} : vector<8x64xf32> to vector<8x8xf32>
    %32 = arith.truncf %31 : vector<8x8xf32> to vector<8x8xbf16>
    %c0_15 = arith.constant 0 : index
    %c0_16 = arith.constant 0 : index
    %c0_17 = arith.constant 0 : index
    %c0_18 = arith.constant 0 : index
    %33 = vector.load %arg7[%c0_15, %c0_16, %c0_17, %c0_18] : memref<1x4x8x8xbf16, #tpu.memory_space<vmem>>, vector<1x1x8x8xbf16>
    %34 = vector.shape_cast %33 : vector<1x1x8x8xbf16> to vector<8x8xbf16>
    %35 = vector.shape_cast %32 : vector<8x8xbf16> to vector<1x1x8x8xbf16>
    tpu.vector_store %arg7[%c0_15, %c0_16, %c0_17, %c0_18], %35 {strides = array<i32>} : memref<1x4x8x8xbf16, #tpu.memory_space<vmem>>, vector<1x1x8x8xbf16>,
    %36 = vector.extract_strided_slice %30 {offsets = [0, 32], sizes = [8, 8], strides = [1, 1]} : vector<8x64xf32> to vector<8x8xf32>
    %37 = arith.truncf %36 : vector<8x8xf32> to vector<8x8xbf16>
    %c0_19 = arith.constant 0 : index
    %c0_20 = arith.constant 0 : index
    %c0_21 = arith.constant 0 : index
    %c0_22 = arith.constant 0 : index
    %38 = vector.load %arg8[%c0_19, %c0_20, %c0_21, %c0_22] : memref<1x4x8x8xbf16, #tpu.memory_space<vmem>>, vector<1x1x8x8xbf16>
    %39 = vector.shape_cast %38 : vector<1x1x8x8xbf16> to vector<8x8xbf16>
    %40 = vector.shape_cast %37 : vector<8x8xbf16> to vector<1x1x8x8xbf16>
    tpu.vector_store %arg8[%c0_19, %c0_20, %c0_21, %c0_22], %40 {strides = array<i32>} : memref<1x4x8x8xbf16, #tpu.memory_space<vmem>>, vector<1x1x8x8xbf16>,
    %41 = vector.extract_strided_slice %30 {offsets = [0, 8], sizes = [8, 8], strides = [1, 1]} : vector<8x64xf32> to vector<8x8xf32>
    %42 = arith.truncf %41 : vector<8x8xf32> to vector<8x8xbf16>
    %c0_23 = arith.constant 0 : index
    %c1 = arith.constant 1 : index
    %c0_24 = arith.constant 0 : index
    %c0_25 = arith.constant 0 : index
    %43 = vector.load %arg7[%c0_23, %c1, %c0_24, %c0_25] : memref<1x4x8x8xbf16, #tpu.memory_space<vmem>>, vector<1x1x8x8xbf16>
    %44 = vector.shape_cast %43 : vector<1x1x8x8xbf16> to vector<8x8xbf16>
    %45 = vector.shape_cast %42 : vector<8x8xbf16> to vector<1x1x8x8xbf16>
    tpu.vector_store %arg7[%c0_23, %c1, %c0_24, %c0_25], %45 {strides = array<i32>} : memref<1x4x8x8xbf16, #tpu.memory_space<vmem>>, vector<1x1x8x8xbf16>,
    %46 = vector.extract_strided_slice %30 {offsets = [0, 40], sizes = [8, 8], strides = [1, 1]} : vector<8x64xf32> to vector<8x8xf32>
    %47 = arith.truncf %46 : vector<8x8xf32> to vector<8x8xbf16>
    %c0_26 = arith.constant 0 : index
    %c1_27 = arith.constant 1 : index
    %c0_28 = arith.constant 0 : index
    %c0_29 = arith.constant 0 : index
    %48 = vector.load %arg8[%c0_26, %c1_27, %c0_28, %c0_29] : memref<1x4x8x8xbf16, #tpu.memory_space<vmem>>, vector<1x1x8x8xbf16>
    %49 = vector.shape_cast %48 : vector<1x1x8x8xbf16> to vector<8x8xbf16>
    %50 = vector.shape_cast %47 : vector<8x8xbf16> to vector<1x1x8x8xbf16>
    tpu.vector_store %arg8[%c0_26, %c1_27, %c0_28, %c0_29], %50 {strides = array<i32>} : memref<1x4x8x8xbf16, #tpu.memory_space<vmem>>, vector<1x1x8x8xbf16>,
    %51 = vector.extract_strided_slice %30 {offsets = [0, 16], sizes = [8, 8], strides = [1, 1]} : vector<8x64xf32> to vector<8x8xf32>
    %52 = arith.truncf %51 : vector<8x8xf32> to vector<8x8xbf16>
    %c0_30 = arith.constant 0 : index
    %c2 = arith.constant 2 : index
    %c0_31 = arith.constant 0 : index
    %c0_32 = arith.constant 0 : index
    %53 = vector.load %arg7[%c0_30, %c2, %c0_31, %c0_32] : memref<1x4x8x8xbf16, #tpu.memory_space<vmem>>, vector<1x1x8x8xbf16>
    %54 = vector.shape_cast %53 : vector<1x1x8x8xbf16> to vector<8x8xbf16>
    %55 = vector.shape_cast %52 : vector<8x8xbf16> to vector<1x1x8x8xbf16>
    tpu.vector_store %arg7[%c0_30, %c2, %c0_31, %c0_32], %55 {strides = array<i32>} : memref<1x4x8x8xbf16, #tpu.memory_space<vmem>>, vector<1x1x8x8xbf16>,
    %56 = vector.extract_strided_slice %30 {offsets = [0, 48], sizes = [8, 8], strides = [1, 1]} : vector<8x64xf32> to vector<8x8xf32>
    %57 = arith.truncf %56 : vector<8x8xf32> to vector<8x8xbf16>
    %c0_33 = arith.constant 0 : index
    %c2_34 = arith.constant 2 : index
    %c0_35 = arith.constant 0 : index
    %c0_36 = arith.constant 0 : index
    %58 = vector.load %arg8[%c0_33, %c2_34, %c0_35, %c0_36] : memref<1x4x8x8xbf16, #tpu.memory_space<vmem>>, vector<1x1x8x8xbf16>
    %59 = vector.shape_cast %58 : vector<1x1x8x8xbf16> to vector<8x8xbf16>
    %60 = vector.shape_cast %57 : vector<8x8xbf16> to vector<1x1x8x8xbf16>
    tpu.vector_store %arg8[%c0_33, %c2_34, %c0_35, %c0_36], %60 {strides = array<i32>} : memref<1x4x8x8xbf16, #tpu.memory_space<vmem>>, vector<1x1x8x8xbf16>,
    %61 = vector.extract_strided_slice %30 {offsets = [0, 24], sizes = [8, 8], strides = [1, 1]} : vector<8x64xf32> to vector<8x8xf32>
    %62 = arith.truncf %61 : vector<8x8xf32> to vector<8x8xbf16>
    %c0_37 = arith.constant 0 : index
    %c3 = arith.constant 3 : index
    %c0_38 = arith.constant 0 : index
    %c0_39 = arith.constant 0 : index
    %63 = vector.load %arg7[%c0_37, %c3, %c0_38, %c0_39] : memref<1x4x8x8xbf16, #tpu.memory_space<vmem>>, vector<1x1x8x8xbf16>
    %64 = vector.shape_cast %63 : vector<1x1x8x8xbf16> to vector<8x8xbf16>
    %65 = vector.shape_cast %62 : vector<8x8xbf16> to vector<1x1x8x8xbf16>
    tpu.vector_store %arg7[%c0_37, %c3, %c0_38, %c0_39], %65 {strides = array<i32>} : memref<1x4x8x8xbf16, #tpu.memory_space<vmem>>, vector<1x1x8x8xbf16>,
    %66 = vector.extract_strided_slice %30 {offsets = [0, 56], sizes = [8, 8], strides = [1, 1]} : vector<8x64xf32> to vector<8x8xf32>
    %67 = arith.truncf %66 : vector<8x8xf32> to vector<8x8xbf16>
    %c0_40 = arith.constant 0 : index
    %c3_41 = arith.constant 3 : index
    %c0_42 = arith.constant 0 : index
    %c0_43 = arith.constant 0 : index
    %68 = vector.load %arg8[%c0_40, %c3_41, %c0_42, %c0_43] : memref<1x4x8x8xbf16, #tpu.memory_space<vmem>>, vector<1x1x8x8xbf16>
    %69 = vector.shape_cast %68 : vector<1x1x8x8xbf16> to vector<8x8xbf16>
    %70 = vector.shape_cast %67 : vector<8x8xbf16> to vector<1x1x8x8xbf16>
    tpu.vector_store %arg8[%c0_40, %c3_41, %c0_42, %c0_43], %70 {strides = array<i32>} : memref<1x4x8x8xbf16, #tpu.memory_space<vmem>>, vector<1x1x8x8xbf16>,
    return
  }
  func.func @transform_0(%arg0: i32, %arg1: i32) -> (i32, i32, i32) {
    %c0_i32 = arith.constant 0 : i32
    %c0_i32_0 = arith.constant 0 : i32
    return %arg0, %arg1, %c0_i32 : i32, i32, i32
  }
  func.func @transform_1(%arg0: i32, %arg1: i32) -> (i32, i32) {
    %c0_i32 = arith.constant 0 : i32
    %c0_i32_0 = arith.constant 0 : i32
    %c0_i32_1 = arith.constant 0 : i32
    return %c0_i32, %c0_i32_0 : i32, i32
  }
  func.func @transform_2(%arg0: i32, %arg1: i32) -> (i32, i32) {
    %c0_i32 = arith.constant 0 : i32
    %c0_i32_0 = arith.constant 0 : i32
    %c0_i32_1 = arith.constant 0 : i32
    return %c0_i32, %c0_i32_0 : i32, i32
  }
  func.func @transform_3(%arg0: i32, %arg1: i32) -> (i32, i32) {
    %c0_i32 = arith.constant 0 : i32
    %c0_i32_0 = arith.constant 0 : i32
    %c0_i32_1 = arith.constant 0 : i32
    return %c0_i32, %c0_i32_0 : i32, i32
  }
  func.func @transform_4(%arg0: i32, %arg1: i32) -> (i32, i32) {
    %c0_i32 = arith.constant 0 : i32
    %c0_i32_0 = arith.constant 0 : i32
    %c0_i32_1 = arith.constant 0 : i32
    return %c0_i32, %c0_i32_0 : i32, i32
  }
  func.func @transform_5(%arg0: i32, %arg1: i32) -> (i32, i32, i32, i32) {
    %c0_i32 = arith.constant 0 : i32
    %c0_i32_0 = arith.constant 0 : i32
    %c0_i32_1 = arith.constant 0 : i32
    return %arg0, %c0_i32, %arg1, %c0_i32_0 : i32, i32, i32, i32
  }
  func.func @transform_6(%arg0: i32, %arg1: i32) -> (i32, i32, i32, i32) {
    %c0_i32 = arith.constant 0 : i32
    %c0_i32_0 = arith.constant 0 : i32
    %c0_i32_1 = arith.constant 0 : i32
    return %arg0, %c0_i32, %arg1, %c0_i32_0 : i32, i32, i32, i32
  }
}

module attributes {stable_mosaic.version = 11 : i64} {
  func.func @_ffn_kernel(%arg0: i32, %arg1: memref<16x32xf32, #tpu.memory_space<vmem>>, %arg2: memref<1x32xf32, #tpu.memory_space<vmem>>, %arg3: memref<1x32xf32, #tpu.memory_space<vmem>>, %arg4: memref<32x64xbf16, #tpu.memory_space<vmem>>, %arg5: memref<1x64xf32, #tpu.memory_space<vmem>>, %arg6: memref<64x32xbf16, #tpu.memory_space<vmem>>, %arg7: memref<1x32xf32, #tpu.memory_space<vmem>>, %arg8: memref<1x32xf32, #tpu.memory_space<vmem>>, %arg9: memref<1x32xf32, #tpu.memory_space<vmem>>, %arg10: memref<16x32xbf16, #tpu.memory_space<vmem>>) attributes {dimension_semantics = [#tpu.dimension_semantics<parallel>], iteration_bounds = array<i64: 1>, scalar_prefetch = 0 : i64, scratch_operands = 0 : i64, tpu.core_type = #tpu.core_type<tc>, window_params = [{transform_indices = @transform_0, window_bounds = array<i64: 16, 32>}, {pipeline_mode = #tpu.pipeline_mode<synchronous>, transform_indices = @transform_1, window_bounds = array<i64: 1, 32>}, {pipeline_mode = #tpu.pipeline_mode<synchronous>, transform_indices = @transform_2, window_bounds = array<i64: 1, 32>}, {pipeline_mode = #tpu.pipeline_mode<synchronous>, transform_indices = @transform_3, window_bounds = array<i64: 32, 64>}, {pipeline_mode = #tpu.pipeline_mode<synchronous>, transform_indices = @transform_4, window_bounds = array<i64: 1, 64>}, {pipeline_mode = #tpu.pipeline_mode<synchronous>, transform_indices = @transform_5, window_bounds = array<i64: 64, 32>}, {pipeline_mode = #tpu.pipeline_mode<synchronous>, transform_indices = @transform_6, window_bounds = array<i64: 1, 32>}, {pipeline_mode = #tpu.pipeline_mode<synchronous>, transform_indices = @transform_7, window_bounds = array<i64: 1, 32>}, {pipeline_mode = #tpu.pipeline_mode<synchronous>, transform_indices = @transform_8, window_bounds = array<i64: 1, 32>}, {transform_indices = @transform_9, window_bounds = array<i64: 16, 32>}]} {
    %c0 = arith.constant 0 : index
    %c0_0 = arith.constant 0 : index
    %0 = vector.load %arg1[%c0, %c0_0] : memref<16x32xf32, #tpu.memory_space<vmem>>, vector<16x32xf32>
    %c0_1 = arith.constant 0 : index
    %c0_2 = arith.constant 0 : index
    %1 = vector.load %arg2[%c0_1, %c0_2] : memref<1x32xf32, #tpu.memory_space<vmem>>, vector<1x32xf32>
    %c0_3 = arith.constant 0 : index
    %c0_4 = arith.constant 0 : index
    %2 = vector.load %arg3[%c0_3, %c0_4] : memref<1x32xf32, #tpu.memory_space<vmem>>, vector<1x32xf32>
    %cst = arith.constant dense<0.000000e+00> : vector<16xf32>
    %3 = vector.multi_reduction <add>, %0, %cst [1] : vector<16x32xf32> to vector<16xf32>
    %4 = vector.shape_cast %3 : vector<16xf32> to vector<16x1xf32>
    %cst_5 = arith.constant 3.200000e+01 : f32
    %5 = vector.broadcast %cst_5 : f32 to vector<16x1xf32>
    %6 = arith.divf %4, %5 : vector<16x1xf32>
    %7 = vector.broadcast %6 : vector<16x1xf32> to vector<16x32xf32>
    %8 = arith.subf %0, %7 : vector<16x32xf32>
    %9 = arith.mulf %8, %8 : vector<16x32xf32>
    %cst_6 = arith.constant dense<0.000000e+00> : vector<16xf32>
    %10 = vector.multi_reduction <add>, %9, %cst_6 [1] : vector<16x32xf32> to vector<16xf32>
    %11 = vector.shape_cast %10 : vector<16xf32> to vector<16x1xf32>
    %cst_7 = arith.constant 3.200000e+01 : f32
    %12 = vector.broadcast %cst_7 : f32 to vector<16x1xf32>
    %13 = arith.divf %11, %12 : vector<16x1xf32>
    %cst_8 = arith.constant 9.99999974E-6 : f32
    %14 = vector.broadcast %cst_8 : f32 to vector<16x1xf32>
    %15 = arith.addf %13, %14 : vector<16x1xf32>
    %16 = math.rsqrt %15 : vector<16x1xf32>
    %17 = vector.broadcast %16 : vector<16x1xf32> to vector<16x32xf32>
    %18 = arith.mulf %8, %17 : vector<16x32xf32>
    %19 = vector.broadcast %1 : vector<1x32xf32> to vector<16x32xf32>
    %20 = arith.mulf %18, %19 : vector<16x32xf32>
    %21 = vector.broadcast %2 : vector<1x32xf32> to vector<16x32xf32>
    %22 = arith.addf %20, %21 : vector<16x32xf32>
    %23 = arith.truncf %22 : vector<16x32xf32> to vector<16x32xbf16>
    %c0_9 = arith.constant 0 : index
    %c0_10 = arith.constant 0 : index
    %24 = vector.load %arg4[%c0_9, %c0_10] : memref<32x64xbf16, #tpu.memory_space<vmem>>, vector<32x64xbf16>
    %cst_11 = arith.constant dense<0.000000e+00> : vector<16x64xf32>
    %25 = tpu.matmul %23, %24, %cst_11 {dimension_numbers = #tpu.dot_dimension_numbers<[1], [0], [0], [1], [0, 0, 1, 1], [], []>} : vector<16x32xbf16>, vector<32x64xbf16>, vector<16x64xf32> -> vector<16x64xf32>
    %c0_12 = arith.constant 0 : index
    %c0_13 = arith.constant 0 : index
    %26 = vector.load %arg5[%c0_12, %c0_13] : memref<1x64xf32, #tpu.memory_space<vmem>>, vector<1x64xf32>
    %27 = vector.broadcast %26 : vector<1x64xf32> to vector<16x64xf32>
    %28 = arith.addf %25, %27 : vector<16x64xf32>
    %29 = arith.negf %28 : vector<16x64xf32>
    %30 = math.exp %29 : vector<16x64xf32>
    %cst_14 = arith.constant 1.000000e+00 : f32
    %31 = vector.broadcast %cst_14 : f32 to vector<16x64xf32>
    %32 = arith.addf %31, %30 : vector<16x64xf32>
    %33 = arith.divf %31, %32 : vector<16x64xf32>
    %34 = arith.mulf %28, %33 : vector<16x64xf32>
    %35 = arith.truncf %34 : vector<16x64xf32> to vector<16x64xbf16>
    %c0_15 = arith.constant 0 : index
    %c0_16 = arith.constant 0 : index
    %36 = vector.load %arg6[%c0_15, %c0_16] : memref<64x32xbf16, #tpu.memory_space<vmem>>, vector<64x32xbf16>
    %cst_17 = arith.constant dense<0.000000e+00> : vector<16x32xf32>
    %37 = tpu.matmul %35, %36, %cst_17 {dimension_numbers = #tpu.dot_dimension_numbers<[1], [0], [0], [1], [0, 0, 1, 1], [], []>} : vector<16x64xbf16>, vector<64x32xbf16>, vector<16x32xf32> -> vector<16x32xf32>
    %c0_18 = arith.constant 0 : index
    %c0_19 = arith.constant 0 : index
    %38 = vector.load %arg7[%c0_18, %c0_19] : memref<1x32xf32, #tpu.memory_space<vmem>>, vector<1x32xf32>
    %39 = vector.broadcast %38 : vector<1x32xf32> to vector<16x32xf32>
    %40 = arith.addf %37, %39 : vector<16x32xf32>
    %cst_20 = arith.constant 5.000000e-01 : f32
    %41 = vector.broadcast %cst_20 : f32 to vector<16x32xf32>
    %42 = arith.mulf %41, %40 : vector<16x32xf32>
    %43 = arith.addf %0, %42 : vector<16x32xf32>
    %44 = arith.truncf %43 : vector<16x32xf32> to vector<16x32xbf16>
    %c0_21 = arith.constant 0 : index
    %c0_22 = arith.constant 0 : index
    %45 = vector.load %arg10[%c0_21, %c0_22] : memref<16x32xbf16, #tpu.memory_space<vmem>>, vector<16x32xbf16>
    tpu.vector_store %arg10[%c0_21, %c0_22], %44 {strides = array<i32>} : memref<16x32xbf16, #tpu.memory_space<vmem>>, vector<16x32xbf16>,
    return
  }
  func.func @transform_0(%arg0: i32) -> (i32, i32) {
    %c0_i32 = arith.constant 0 : i32
    %c0_i32_0 = arith.constant 0 : i32
    return %arg0, %c0_i32 : i32, i32
  }
  func.func @transform_1(%arg0: i32) -> (i32, i32) {
    %c0_i32 = arith.constant 0 : i32
    %c0_i32_0 = arith.constant 0 : i32
    %c0_i32_1 = arith.constant 0 : i32
    return %c0_i32, %c0_i32_0 : i32, i32
  }
  func.func @transform_2(%arg0: i32) -> (i32, i32) {
    %c0_i32 = arith.constant 0 : i32
    %c0_i32_0 = arith.constant 0 : i32
    %c0_i32_1 = arith.constant 0 : i32
    return %c0_i32, %c0_i32_0 : i32, i32
  }
  func.func @transform_3(%arg0: i32) -> (i32, i32) {
    %c0_i32 = arith.constant 0 : i32
    %c0_i32_0 = arith.constant 0 : i32
    %c0_i32_1 = arith.constant 0 : i32
    return %c0_i32, %c0_i32_0 : i32, i32
  }
  func.func @transform_4(%arg0: i32) -> (i32, i32) {
    %c0_i32 = arith.constant 0 : i32
    %c0_i32_0 = arith.constant 0 : i32
    %c0_i32_1 = arith.constant 0 : i32
    return %c0_i32, %c0_i32_0 : i32, i32
  }
  func.func @transform_5(%arg0: i32) -> (i32, i32) {
    %c0_i32 = arith.constant 0 : i32
    %c0_i32_0 = arith.constant 0 : i32
    %c0_i32_1 = arith.constant 0 : i32
    return %c0_i32, %c0_i32_0 : i32, i32
  }
  func.func @transform_6(%arg0: i32) -> (i32, i32) {
    %c0_i32 = arith.constant 0 : i32
    %c0_i32_0 = arith.constant 0 : i32
    %c0_i32_1 = arith.constant 0 : i32
    return %c0_i32, %c0_i32_0 : i32, i32
  }
  func.func @transform_7(%arg0: i32) -> (i32, i32) {
    %c0_i32 = arith.constant 0 : i32
    %c0_i32_0 = arith.constant 0 : i32
    %c0_i32_1 = arith.constant 0 : i32
    return %c0_i32, %c0_i32_0 : i32, i32
  }
  func.func @transform_8(%arg0: i32) -> (i32, i32) {
    %c0_i32 = arith.constant 0 : i32
    %c0_i32_0 = arith.constant 0 : i32
    %c0_i32_1 = arith.constant 0 : i32
    return %c0_i32, %c0_i32_0 : i32, i32
  }
  func.func @transform_9(%arg0: i32) -> (i32, i32) {
    %c0_i32 = arith.constant 0 : i32
    %c0_i32_0 = arith.constant 0 : i32
    return %arg0, %c0_i32 : i32, i32
  }
}

module attributes {stable_mosaic.version = 11 : i64} {
  func.func @_conv_module_kernel(%arg0: i32, %arg1: i32, %arg2: memref<1x8x32xbf16, #tpu.memory_space<vmem>>, %arg3: memref<1x8x32xbf16, #tpu.memory_space<vmem>>, %arg4: memref<1x8x32xbf16, #tpu.memory_space<vmem>>, %arg5: memref<1x32xf32, #tpu.memory_space<vmem>>, %arg6: memref<1x32xf32, #tpu.memory_space<vmem>>, %arg7: memref<32x64xbf16, #tpu.memory_space<vmem>>, %arg8: memref<1x64xf32, #tpu.memory_space<vmem>>, %arg9: memref<7x32xf32, #tpu.memory_space<vmem>>, %arg10: memref<1x32xf32, #tpu.memory_space<vmem>>, %arg11: memref<1x32xf32, #tpu.memory_space<vmem>>, %arg12: memref<1x32xf32, #tpu.memory_space<vmem>>, %arg13: memref<32x32xbf16, #tpu.memory_space<vmem>>, %arg14: memref<1x32xf32, #tpu.memory_space<vmem>>, %arg15: memref<1x8x32xbf16, #tpu.memory_space<vmem>>) attributes {dimension_semantics = [#tpu.dimension_semantics<parallel>, #tpu.dimension_semantics<parallel>], iteration_bounds = array<i64: 2, 1>, scalar_prefetch = 0 : i64, scratch_operands = 0 : i64, tpu.core_type = #tpu.core_type<tc>, window_params = [{transform_indices = @transform_0, window_bounds = array<i64: 1, 8, 32>}, {transform_indices = @transform_1, window_bounds = array<i64: 1, 8, 32>}, {transform_indices = @transform_2, window_bounds = array<i64: 1, 8, 32>}, {pipeline_mode = #tpu.pipeline_mode<synchronous>, transform_indices = @transform_3, window_bounds = array<i64: 1, 32>}, {pipeline_mode = #tpu.pipeline_mode<synchronous>, transform_indices = @transform_4, window_bounds = array<i64: 1, 32>}, {pipeline_mode = #tpu.pipeline_mode<synchronous>, transform_indices = @transform_5, window_bounds = array<i64: 32, 64>}, {pipeline_mode = #tpu.pipeline_mode<synchronous>, transform_indices = @transform_6, window_bounds = array<i64: 1, 64>}, {pipeline_mode = #tpu.pipeline_mode<synchronous>, transform_indices = @transform_7, window_bounds = array<i64: 7, 32>}, {pipeline_mode = #tpu.pipeline_mode<synchronous>, transform_indices = @transform_8, window_bounds = array<i64: 1, 32>}, {pipeline_mode = #tpu.pipeline_mode<synchronous>, transform_indices = @transform_9, window_bounds = array<i64: 1, 32>}, {pipeline_mode = #tpu.pipeline_mode<synchronous>, transform_indices = @transform_10, window_bounds = array<i64: 1, 32>}, {pipeline_mode = #tpu.pipeline_mode<synchronous>, transform_indices = @transform_11, window_bounds = array<i64: 32, 32>}, {pipeline_mode = #tpu.pipeline_mode<synchronous>, transform_indices = @transform_12, window_bounds = array<i64: 1, 32>}, {transform_indices = @transform_13, window_bounds = array<i64: 1, 8, 32>}]} {
    %c0 = arith.constant 0 : index
    %c0_0 = arith.constant 0 : index
    %c0_1 = arith.constant 0 : index
    %0 = vector.load %arg2[%c0, %c0_0, %c0_1] : memref<1x8x32xbf16, #tpu.memory_space<vmem>>, vector<1x8x32xbf16>
    %1 = vector.shape_cast %0 : vector<1x8x32xbf16> to vector<8x32xbf16>
    %2 = arith.extf %1 : vector<8x32xbf16> to vector<8x32xf32>
    %c0_2 = arith.constant 0 : index
    %c5 = arith.constant 5 : index
    %c0_3 = arith.constant 0 : index
    %3 = vector.load %arg3[%c0_2, %c5, %c0_3] : memref<1x8x32xbf16, #tpu.memory_space<vmem>>, vector<1x3x32xbf16>
    %4 = vector.shape_cast %3 : vector<1x3x32xbf16> to vector<3x32xbf16>
    %5 = arith.extf %4 : vector<3x32xbf16> to vector<3x32xf32>
    %c0_4 = arith.constant 0 : index
    %c0_5 = arith.constant 0 : index
    %c0_6 = arith.constant 0 : index
    %6 = vector.load %arg4[%c0_4, %c0_5, %c0_6] : memref<1x8x32xbf16, #tpu.memory_space<vmem>>, vector<1x3x32xbf16>
    %7 = vector.shape_cast %6 : vector<1x3x32xbf16> to vector<3x32xbf16>
    %8 = arith.extf %7 : vector<3x32xbf16> to vector<3x32xf32>
    %9 = tpu.concatenate %5, %2, %8 in 0 : vector<3x32xf32>, vector<8x32xf32>, vector<3x32xf32> -> vector<14x32xf32>
    %c0_7 = arith.constant 0 : index
    %c0_8 = arith.constant 0 : index
    %10 = vector.load %arg5[%c0_7, %c0_8] : memref<1x32xf32, #tpu.memory_space<vmem>>, vector<1x32xf32>
    %c0_9 = arith.constant 0 : index
    %c0_10 = arith.constant 0 : index
    %11 = vector.load %arg6[%c0_9, %c0_10] : memref<1x32xf32, #tpu.memory_space<vmem>>, vector<1x32xf32>
    %cst = arith.constant dense<0.000000e+00> : vector<14xf32>
    %12 = vector.multi_reduction <add>, %9, %cst [1] : vector<14x32xf32> to vector<14xf32>
    %13 = vector.shape_cast %12 : vector<14xf32> to vector<14x1xf32>
    %cst_11 = arith.constant 3.200000e+01 : f32
    %14 = vector.broadcast %cst_11 : f32 to vector<14x1xf32>
    %15 = arith.divf %13, %14 : vector<14x1xf32>
    %16 = vector.broadcast %15 : vector<14x1xf32> to vector<14x32xf32>
    %17 = arith.subf %9, %16 : vector<14x32xf32>
    %18 = arith.mulf %17, %17 : vector<14x32xf32>
    %cst_12 = arith.constant dense<0.000000e+00> : vector<14xf32>
    %19 = vector.multi_reduction <add>, %18, %cst_12 [1] : vector<14x32xf32> to vector<14xf32>
    %20 = vector.shape_cast %19 : vector<14xf32> to vector<14x1xf32>
    %cst_13 = arith.constant 3.200000e+01 : f32
    %21 = vector.broadcast %cst_13 : f32 to vector<14x1xf32>
    %22 = arith.divf %20, %21 : vector<14x1xf32>
    %cst_14 = arith.constant 9.99999974E-6 : f32
    %23 = vector.broadcast %cst_14 : f32 to vector<14x1xf32>
    %24 = arith.addf %22, %23 : vector<14x1xf32>
    %25 = math.rsqrt %24 : vector<14x1xf32>
    %26 = vector.broadcast %25 : vector<14x1xf32> to vector<14x32xf32>
    %27 = arith.mulf %17, %26 : vector<14x32xf32>
    %28 = vector.broadcast %10 : vector<1x32xf32> to vector<14x32xf32>
    %29 = arith.mulf %27, %28 : vector<14x32xf32>
    %30 = vector.broadcast %11 : vector<1x32xf32> to vector<14x32xf32>
    %31 = arith.addf %29, %30 : vector<14x32xf32>
    %32 = arith.truncf %31 : vector<14x32xf32> to vector<14x32xbf16>
    %c0_15 = arith.constant 0 : index
    %c0_16 = arith.constant 0 : index
    %33 = vector.load %arg7[%c0_15, %c0_16] : memref<32x64xbf16, #tpu.memory_space<vmem>>, vector<32x64xbf16>
    %cst_17 = arith.constant dense<0.000000e+00> : vector<14x64xf32>
    %34 = tpu.matmul %32, %33, %cst_17 {dimension_numbers = #tpu.dot_dimension_numbers<[1], [0], [0], [1], [0, 0, 1, 1], [], []>} : vector<14x32xbf16>, vector<32x64xbf16>, vector<14x64xf32> -> vector<14x64xf32>
    %c0_18 = arith.constant 0 : index
    %c0_19 = arith.constant 0 : index
    %35 = vector.load %arg8[%c0_18, %c0_19] : memref<1x64xf32, #tpu.memory_space<vmem>>, vector<1x64xf32>
    %36 = vector.broadcast %35 : vector<1x64xf32> to vector<14x64xf32>
    %37 = arith.addf %34, %36 : vector<14x64xf32>
    %38 = vector.extract_strided_slice %37 {offsets = [0, 0], sizes = [14, 32], strides = [1, 1]} : vector<14x64xf32> to vector<14x32xf32>
    %39 = vector.extract_strided_slice %37 {offsets = [0, 32], sizes = [14, 32], strides = [1, 1]} : vector<14x64xf32> to vector<14x32xf32>
    %40 = arith.negf %39 : vector<14x32xf32>
    %41 = math.exp %40 : vector<14x32xf32>
    %cst_20 = arith.constant 1.000000e+00 : f32
    %42 = vector.broadcast %cst_20 : f32 to vector<14x32xf32>
    %43 = arith.addf %42, %41 : vector<14x32xf32>
    %44 = arith.divf %42, %43 : vector<14x32xf32>
    %45 = arith.mulf %38, %44 : vector<14x32xf32>
    %c8_i32 = arith.constant 8 : i32
    %46 = arith.muli %arg1, %c8_i32 : i32
    %c3_i32 = arith.constant 3 : i32
    %47 = arith.subi %46, %c3_i32 : i32
    %48 = tpu.iota {dimensions = array<i32: 0>} : vector<14x1xi32>
    %49 = vector.broadcast %47 : i32 to vector<14x1xi32>
    %50 = arith.addi %49, %48 : vector<14x1xi32>
    %c0_i32 = arith.constant 0 : i32
    %51 = vector.broadcast %c0_i32 : i32 to vector<14x1xi32>
    %52 = arith.cmpi sge, %50, %51 : vector<14x1xi32>
    %c8_i32_21 = arith.constant 8 : i32
    %53 = vector.broadcast %c8_i32_21 : i32 to vector<14x1xi32>
    %54 = arith.cmpi slt, %50, %53 : vector<14x1xi32>
    %55 = arith.andi %52, %54 : vector<14x1xi1>
    %cst_22 = arith.constant 0.000000e+00 : f32
    %56 = vector.shape_cast %55 : vector<14x1xi1> to vector<14x1xi1>
    %57 = vector.broadcast %56 : vector<14x1xi1> to vector<14x32xi1>
    %58 = vector.broadcast %cst_22 : f32 to vector<14x32xf32>
    %59 = arith.select %57, %45, %58 : vector<14x32xi1>, vector<14x32xf32>
    %c0_23 = arith.constant 0 : index
    %c0_24 = arith.constant 0 : index
    %60 = vector.load %arg9[%c0_23, %c0_24] : memref<7x32xf32, #tpu.memory_space<vmem>>, vector<7x32xf32>
    %cst_25 = arith.constant 0.000000e+00 : f32
    %61 = vector.broadcast %cst_25 : f32 to vector<8x32xf32>
    %62 = vector.extract_strided_slice %59 {offsets = [0, 0], sizes = [8, 32], strides = [1, 1]} : vector<14x32xf32> to vector<8x32xf32>
    %63 = vector.extract_strided_slice %60 {offsets = [0, 0], sizes = [1, 32], strides = [1, 1]} : vector<7x32xf32> to vector<1x32xf32>
    %64 = vector.broadcast %63 : vector<1x32xf32> to vector<8x32xf32>
    %65 = arith.mulf %62, %64 : vector<8x32xf32>
    %66 = arith.addf %61, %65 : vector<8x32xf32>
    %67 = vector.extract_strided_slice %59 {offsets = [1, 0], sizes = [8, 32], strides = [1, 1]} : vector<14x32xf32> to vector<8x32xf32>
    %68 = vector.extract_strided_slice %60 {offsets = [1, 0], sizes = [1, 32], strides = [1, 1]} : vector<7x32xf32> to vector<1x32xf32>
    %69 = vector.broadcast %68 : vector<1x32xf32> to vector<8x32xf32>
    %70 = arith.mulf %67, %69 : vector<8x32xf32>
    %71 = arith.addf %66, %70 : vector<8x32xf32>
    %72 = vector.extract_strided_slice %59 {offsets = [2, 0], sizes = [8, 32], strides = [1, 1]} : vector<14x32xf32> to vector<8x32xf32>
    %73 = vector.extract_strided_slice %60 {offsets = [2, 0], sizes = [1, 32], strides = [1, 1]} : vector<7x32xf32> to vector<1x32xf32>
    %74 = vector.broadcast %73 : vector<1x32xf32> to vector<8x32xf32>
    %75 = arith.mulf %72, %74 : vector<8x32xf32>
    %76 = arith.addf %71, %75 : vector<8x32xf32>
    %77 = vector.extract_strided_slice %59 {offsets = [3, 0], sizes = [8, 32], strides = [1, 1]} : vector<14x32xf32> to vector<8x32xf32>
    %78 = vector.extract_strided_slice %60 {offsets = [3, 0], sizes = [1, 32], strides = [1, 1]} : vector<7x32xf32> to vector<1x32xf32>
    %79 = vector.broadcast %78 : vector<1x32xf32> to vector<8x32xf32>
    %80 = arith.mulf %77, %79 : vector<8x32xf32>
    %81 = arith.addf %76, %80 : vector<8x32xf32>
    %82 = vector.extract_strided_slice %59 {offsets = [4, 0], sizes = [8, 32], strides = [1, 1]} : vector<14x32xf32> to vector<8x32xf32>
    %83 = vector.extract_strided_slice %60 {offsets = [4, 0], sizes = [1, 32], strides = [1, 1]} : vector<7x32xf32> to vector<1x32xf32>
    %84 = vector.broadcast %83 : vector<1x32xf32> to vector<8x32xf32>
    %85 = arith.mulf %82, %84 : vector<8x32xf32>
    %86 = arith.addf %81, %85 : vector<8x32xf32>
    %87 = vector.extract_strided_slice %59 {offsets = [5, 0], sizes = [8, 32], strides = [1, 1]} : vector<14x32xf32> to vector<8x32xf32>
    %88 = vector.extract_strided_slice %60 {offsets = [5, 0], sizes = [1, 32], strides = [1, 1]} : vector<7x32xf32> to vector<1x32xf32>
    %89 = vector.broadcast %88 : vector<1x32xf32> to vector<8x32xf32>
    %90 = arith.mulf %87, %89 : vector<8x32xf32>
    %91 = arith.addf %86, %90 : vector<8x32xf32>
    %92 = vector.extract_strided_slice %59 {offsets = [6, 0], sizes = [8, 32], strides = [1, 1]} : vector<14x32xf32> to vector<8x32xf32>
    %93 = vector.extract_strided_slice %60 {offsets = [6, 0], sizes = [1, 32], strides = [1, 1]} : vector<7x32xf32> to vector<1x32xf32>
    %94 = vector.broadcast %93 : vector<1x32xf32> to vector<8x32xf32>
    %95 = arith.mulf %92, %94 : vector<8x32xf32>
    %96 = arith.addf %91, %95 : vector<8x32xf32>
    %c0_26 = arith.constant 0 : index
    %c0_27 = arith.constant 0 : index
    %97 = vector.load %arg10[%c0_26, %c0_27] : memref<1x32xf32, #tpu.memory_space<vmem>>, vector<1x32xf32>
    %98 = vector.broadcast %97 : vector<1x32xf32> to vector<8x32xf32>
    %99 = arith.addf %96, %98 : vector<8x32xf32>
    %c0_28 = arith.constant 0 : index
    %c0_29 = arith.constant 0 : index
    %100 = vector.load %arg11[%c0_28, %c0_29] : memref<1x32xf32, #tpu.memory_space<vmem>>, vector<1x32xf32>
    %101 = vector.broadcast %100 : vector<1x32xf32> to vector<8x32xf32>
    %102 = arith.mulf %99, %101 : vector<8x32xf32>
    %c0_30 = arith.constant 0 : index
    %c0_31 = arith.constant 0 : index
    %103 = vector.load %arg12[%c0_30, %c0_31] : memref<1x32xf32, #tpu.memory_space<vmem>>, vector<1x32xf32>
    %104 = vector.broadcast %103 : vector<1x32xf32> to vector<8x32xf32>
    %105 = arith.addf %102, %104 : vector<8x32xf32>
    %106 = arith.negf %105 : vector<8x32xf32>
    %107 = math.exp %106 : vector<8x32xf32>
    %cst_32 = arith.constant 1.000000e+00 : f32
    %108 = vector.broadcast %cst_32 : f32 to vector<8x32xf32>
    %109 = arith.addf %108, %107 : vector<8x32xf32>
    %110 = arith.divf %108, %109 : vector<8x32xf32>
    %111 = arith.mulf %105, %110 : vector<8x32xf32>
    %112 = arith.truncf %111 : vector<8x32xf32> to vector<8x32xbf16>
    %c0_33 = arith.constant 0 : index
    %c0_34 = arith.constant 0 : index
    %113 = vector.load %arg13[%c0_33, %c0_34] : memref<32x32xbf16, #tpu.memory_space<vmem>>, vector<32x32xbf16>
    %cst_35 = arith.constant dense<0.000000e+00> : vector<8x32xf32>
    %114 = tpu.matmul %112, %113, %cst_35 {dimension_numbers = #tpu.dot_dimension_numbers<[1], [0], [0], [1], [0, 0, 1, 1], [], []>} : vector<8x32xbf16>, vector<32x32xbf16>, vector<8x32xf32> -> vector<8x32xf32>
    %c0_36 = arith.constant 0 : index
    %c0_37 = arith.constant 0 : index
    %115 = vector.load %arg14[%c0_36, %c0_37] : memref<1x32xf32, #tpu.memory_space<vmem>>, vector<1x32xf32>
    %116 = vector.broadcast %115 : vector<1x32xf32> to vector<8x32xf32>
    %117 = arith.addf %114, %116 : vector<8x32xf32>
    %118 = arith.addf %2, %117 : vector<8x32xf32>
    %119 = arith.truncf %118 : vector<8x32xf32> to vector<8x32xbf16>
    %c0_38 = arith.constant 0 : index
    %c0_39 = arith.constant 0 : index
    %c0_40 = arith.constant 0 : index
    %120 = vector.load %arg15[%c0_38, %c0_39, %c0_40] : memref<1x8x32xbf16, #tpu.memory_space<vmem>>, vector<1x8x32xbf16>
    %121 = vector.shape_cast %120 : vector<1x8x32xbf16> to vector<8x32xbf16>
    %122 = vector.shape_cast %119 : vector<8x32xbf16> to vector<1x8x32xbf16>
    tpu.vector_store %arg15[%c0_38, %c0_39, %c0_40], %122 {strides = array<i32>} : memref<1x8x32xbf16, #tpu.memory_space<vmem>>, vector<1x8x32xbf16>,
    return
  }
  func.func @transform_0(%arg0: i32, %arg1: i32) -> (i32, i32, i32) {
    %c0_i32 = arith.constant 0 : i32
    %c0_i32_0 = arith.constant 0 : i32
    return %arg0, %arg1, %c0_i32 : i32, i32, i32
  }
  func.func @transform_1(%arg0: i32, %arg1: i32) -> (i32, i32, i32) {
    %c1_i32 = arith.constant 1 : i32
    %0 = arith.subi %arg1, %c1_i32 : i32
    %c0_i32 = arith.constant 0 : i32
    %1 = arith.maxsi %0, %c0_i32 : i32
    %c0_i32_0 = arith.constant 0 : i32
    %c0_i32_1 = arith.constant 0 : i32
    return %arg0, %1, %c0_i32_0 : i32, i32, i32
  }
  func.func @transform_2(%arg0: i32, %arg1: i32) -> (i32, i32, i32) {
    %c1_i32 = arith.constant 1 : i32
    %0 = arith.addi %arg1, %c1_i32 : i32
    %c0_i32 = arith.constant 0 : i32
    %1 = arith.minsi %0, %c0_i32 : i32
    %c0_i32_0 = arith.constant 0 : i32
    %c0_i32_1 = arith.constant 0 : i32
    return %arg0, %1, %c0_i32_0 : i32, i32, i32
  }
  func.func @transform_3(%arg0: i32, %arg1: i32) -> (i32, i32) {
    %c0_i32 = arith.constant 0 : i32
    %c0_i32_0 = arith.constant 0 : i32
    %c0_i32_1 = arith.constant 0 : i32
    return %c0_i32, %c0_i32_0 : i32, i32
  }
  func.func @transform_4(%arg0: i32, %arg1: i32) -> (i32, i32) {
    %c0_i32 = arith.constant 0 : i32
    %c0_i32_0 = arith.constant 0 : i32
    %c0_i32_1 = arith.constant 0 : i32
    return %c0_i32, %c0_i32_0 : i32, i32
  }
  func.func @transform_5(%arg0: i32, %arg1: i32) -> (i32, i32) {
    %c0_i32 = arith.constant 0 : i32
    %c0_i32_0 = arith.constant 0 : i32
    %c0_i32_1 = arith.constant 0 : i32
    return %c0_i32, %c0_i32_0 : i32, i32
  }
  func.func @transform_6(%arg0: i32, %arg1: i32) -> (i32, i32) {
    %c0_i32 = arith.constant 0 : i32
    %c0_i32_0 = arith.constant 0 : i32
    %c0_i32_1 = arith.constant 0 : i32
    return %c0_i32, %c0_i32_0 : i32, i32
  }
  func.func @transform_7(%arg0: i32, %arg1: i32) -> (i32, i32) {
    %c0_i32 = arith.constant 0 : i32
    %c0_i32_0 = arith.constant 0 : i32
    %c0_i32_1 = arith.constant 0 : i32
    return %c0_i32, %c0_i32_0 : i32, i32
  }
  func.func @transform_8(%arg0: i32, %arg1: i32) -> (i32, i32) {
    %c0_i32 = arith.constant 0 : i32
    %c0_i32_0 = arith.constant 0 : i32
    %c0_i32_1 = arith.constant 0 : i32
    return %c0_i32, %c0_i32_0 : i32, i32
  }
  func.func @transform_9(%arg0: i32, %arg1: i32) -> (i32, i32) {
    %c0_i32 = arith.constant 0 : i32
    %c0_i32_0 = arith.constant 0 : i32
    %c0_i32_1 = arith.constant 0 : i32
    return %c0_i32, %c0_i32_0 : i32, i32
  }
  func.func @transform_10(%arg0: i32, %arg1: i32) -> (i32, i32) {
    %c0_i32 = arith.constant 0 : i32
    %c0_i32_0 = arith.constant 0 : i32
    %c0_i32_1 = arith.constant 0 : i32
    return %c0_i32, %c0_i32_0 : i32, i32
  }
  func.func @transform_11(%arg0: i32, %arg1: i32) -> (i32, i32) {
    %c0_i32 = arith.constant 0 : i32
    %c0_i32_0 = arith.constant 0 : i32
    %c0_i32_1 = arith.constant 0 : i32
    return %c0_i32, %c0_i32_0 : i32, i32
  }
  func.func @transform_12(%arg0: i32, %arg1: i32) -> (i32, i32) {
    %c0_i32 = arith.constant 0 : i32
    %c0_i32_0 = arith.constant 0 : i32
    %c0_i32_1 = arith.constant 0 : i32
    return %c0_i32, %c0_i32_0 : i32, i32
  }
  func.func @transform_13(%arg0: i32, %arg1: i32) -> (i32, i32, i32) {
    %c0_i32 = arith.constant 0 : i32
    %c0_i32_0 = arith.constant 0 : i32
    return %arg0, %arg1, %c0_i32 : i32, i32, i32
  }
}

module attributes {stable_mosaic.version = 11 : i64} {
  func.func @_flash_attn_kernel(%arg0: i32, %arg1: i32, %arg2: i32, %arg3: memref<1x8x32xbf16, #tpu.memory_space<vmem>>, %arg4: memref<1x32xf32, #tpu.memory_space<vmem>>, %arg5: memref<1x32xf32, #tpu.memory_space<vmem>>, %arg6: memref<32x32xbf16, #tpu.memory_space<vmem>>, %arg7: memref<1x32xf32, #tpu.memory_space<vmem>>, %arg8: memref<1x4x8x8xbf16, #tpu.memory_space<vmem>>, %arg9: memref<1x4x8x8xbf16, #tpu.memory_space<vmem>>, %arg10: memref<1x1x8xf32, #tpu.memory_space<vmem>>, %arg11: memref<4x8x32xbf16, #tpu.memory_space<vmem>>, %arg12: memref<1x32xf32, #tpu.memory_space<vmem>>, %arg13: memref<1x8x32xbf16, #tpu.memory_space<vmem>>, %arg14: memref<4x8x8xbf16, #tpu.memory_space<vmem>>, %arg15: memref<4x8x8xf32, #tpu.memory_space<vmem>>, %arg16: memref<4x8x1xf32, #tpu.memory_space<vmem>>, %arg17: memref<4x8x1xf32, #tpu.memory_space<vmem>>) attributes {dimension_semantics = [#tpu.dimension_semantics<parallel>, #tpu.dimension_semantics<parallel>, #tpu.dimension_semantics<arbitrary>], iteration_bounds = array<i64: 2, 1, 1>, scalar_prefetch = 0 : i64, scratch_operands = 4 : i64, tpu.core_type = #tpu.core_type<tc>, window_params = [{transform_indices = @transform_0, window_bounds = array<i64: 1, 8, 32>}, {pipeline_mode = #tpu.pipeline_mode<synchronous>, transform_indices = @transform_1, window_bounds = array<i64: 1, 32>}, {pipeline_mode = #tpu.pipeline_mode<synchronous>, transform_indices = @transform_2, window_bounds = array<i64: 1, 32>}, {pipeline_mode = #tpu.pipeline_mode<synchronous>, transform_indices = @transform_3, window_bounds = array<i64: 32, 32>}, {pipeline_mode = #tpu.pipeline_mode<synchronous>, transform_indices = @transform_4, window_bounds = array<i64: 1, 32>}, {transform_indices = @transform_5, window_bounds = array<i64: 1, 4, 8, 8>}, {transform_indices = @transform_6, window_bounds = array<i64: 1, 4, 8, 8>}, {transform_indices = @transform_7, window_bounds = array<i64: 1, 1, 8>}, {pipeline_mode = #tpu.pipeline_mode<synchronous>, transform_indices = @transform_8, window_bounds = array<i64: 4, 8, 32>}, {pipeline_mode = #tpu.pipeline_mode<synchronous>, transform_indices = @transform_9, window_bounds = array<i64: 1, 32>}, {transform_indices = @transform_10, window_bounds = array<i64: 1, 8, 32>}]} {
    %c0_i32 = arith.constant 0 : i32
    %0 = arith.cmpi eq, %arg2, %c0_i32 : i32
    %1 = arith.extui %0 : i1 to i32
    %c0_i32_0 = arith.constant 0 : i32
    %2 = arith.cmpi ne, %1, %c0_i32_0 : i32
    scf.if %2 {
      %c0_37 = arith.constant 0 : index
      %c0_38 = arith.constant 0 : index
      %c0_39 = arith.constant 0 : index
      %40 = vector.load %arg3[%c0_37, %c0_38, %c0_39] : memref<1x8x32xbf16, #tpu.memory_space<vmem>>, vector<1x8x32xbf16>
      %41 = vector.shape_cast %40 : vector<1x8x32xbf16> to vector<8x32xbf16>
      %42 = arith.extf %41 : vector<8x32xbf16> to vector<8x32xf32>
      %c0_40 = arith.constant 0 : index
      %c0_41 = arith.constant 0 : index
      %43 = vector.load %arg4[%c0_40, %c0_41] : memref<1x32xf32, #tpu.memory_space<vmem>>, vector<1x32xf32>
      %c0_42 = arith.constant 0 : index
      %c0_43 = arith.constant 0 : index
      %44 = vector.load %arg5[%c0_42, %c0_43] : memref<1x32xf32, #tpu.memory_space<vmem>>, vector<1x32xf32>
      %cst_44 = arith.constant dense<0.000000e+00> : vector<8xf32>
      %45 = vector.multi_reduction <add>, %42, %cst_44 [1] : vector<8x32xf32> to vector<8xf32>
      %46 = vector.shape_cast %45 : vector<8xf32> to vector<8x1xf32>
      %cst_45 = arith.constant 3.200000e+01 : f32
      %47 = vector.broadcast %cst_45 : f32 to vector<8x1xf32>
      %48 = arith.divf %46, %47 : vector<8x1xf32>
      %49 = vector.broadcast %48 : vector<8x1xf32> to vector<8x32xf32>
      %50 = arith.subf %42, %49 : vector<8x32xf32>
      %51 = arith.mulf %50, %50 : vector<8x32xf32>
      %cst_46 = arith.constant dense<0.000000e+00> : vector<8xf32>
      %52 = vector.multi_reduction <add>, %51, %cst_46 [1] : vector<8x32xf32> to vector<8xf32>
      %53 = vector.shape_cast %52 : vector<8xf32> to vector<8x1xf32>
      %cst_47 = arith.constant 3.200000e+01 : f32
      %54 = vector.broadcast %cst_47 : f32 to vector<8x1xf32>
      %55 = arith.divf %53, %54 : vector<8x1xf32>
      %cst_48 = arith.constant 9.99999974E-6 : f32
      %56 = vector.broadcast %cst_48 : f32 to vector<8x1xf32>
      %57 = arith.addf %55, %56 : vector<8x1xf32>
      %58 = math.rsqrt %57 : vector<8x1xf32>
      %59 = vector.broadcast %58 : vector<8x1xf32> to vector<8x32xf32>
      %60 = arith.mulf %50, %59 : vector<8x32xf32>
      %61 = vector.broadcast %43 : vector<1x32xf32> to vector<8x32xf32>
      %62 = arith.mulf %60, %61 : vector<8x32xf32>
      %63 = vector.broadcast %44 : vector<1x32xf32> to vector<8x32xf32>
      %64 = arith.addf %62, %63 : vector<8x32xf32>
      %65 = arith.truncf %64 : vector<8x32xf32> to vector<8x32xbf16>
      %c0_49 = arith.constant 0 : index
      %c0_50 = arith.constant 0 : index
      %66 = vector.load %arg6[%c0_49, %c0_50] : memref<32x32xbf16, #tpu.memory_space<vmem>>, vector<32x32xbf16>
      %cst_51 = arith.constant dense<0.000000e+00> : vector<8x32xf32>
      %67 = tpu.matmul %65, %66, %cst_51 {dimension_numbers = #tpu.dot_dimension_numbers<[1], [0], [0], [1], [0, 0, 1, 1], [], []>} : vector<8x32xbf16>, vector<32x32xbf16>, vector<8x32xf32> -> vector<8x32xf32>
      %c0_52 = arith.constant 0 : index
      %c0_53 = arith.constant 0 : index
      %68 = vector.load %arg7[%c0_52, %c0_53] : memref<1x32xf32, #tpu.memory_space<vmem>>, vector<1x32xf32>
      %69 = vector.broadcast %68 : vector<1x32xf32> to vector<8x32xf32>
      %70 = arith.addf %67, %69 : vector<8x32xf32>
      %cst_54 = arith.constant 0.353553385 : f32
      %71 = vector.broadcast %cst_54 : f32 to vector<8x32xf32>
      %72 = arith.mulf %70, %71 : vector<8x32xf32>
      %73 = arith.truncf %72 : vector<8x32xf32> to vector<8x32xbf16>
      %74 = vector.extract_strided_slice %73 {offsets = [0, 0], sizes = [8, 8], strides = [1, 1]} : vector<8x32xbf16> to vector<8x8xbf16>
      %c0_55 = arith.constant 0 : index
      %c0_56 = arith.constant 0 : index
      %c0_57 = arith.constant 0 : index
      %75 = vector.load %arg14[%c0_55, %c0_56, %c0_57] : memref<4x8x8xbf16, #tpu.memory_space<vmem>>, vector<1x8x8xbf16>
      %76 = vector.shape_cast %75 : vector<1x8x8xbf16> to vector<8x8xbf16>
      %77 = vector.shape_cast %74 : vector<8x8xbf16> to vector<1x8x8xbf16>
      tpu.vector_store %arg14[%c0_55, %c0_56, %c0_57], %77 {strides = array<i32>} : memref<4x8x8xbf16, #tpu.memory_space<vmem>>, vector<1x8x8xbf16>,
      %78 = vector.extract_strided_slice %73 {offsets = [0, 8], sizes = [8, 8], strides = [1, 1]} : vector<8x32xbf16> to vector<8x8xbf16>
      %c1 = arith.constant 1 : index
      %c0_58 = arith.constant 0 : index
      %c0_59 = arith.constant 0 : index
      %79 = vector.load %arg14[%c1, %c0_58, %c0_59] : memref<4x8x8xbf16, #tpu.memory_space<vmem>>, vector<1x8x8xbf16>
      %80 = vector.shape_cast %79 : vector<1x8x8xbf16> to vector<8x8xbf16>
      %81 = vector.shape_cast %78 : vector<8x8xbf16> to vector<1x8x8xbf16>
      tpu.vector_store %arg14[%c1, %c0_58, %c0_59], %81 {strides = array<i32>} : memref<4x8x8xbf16, #tpu.memory_space<vmem>>, vector<1x8x8xbf16>,
      %82 = vector.extract_strided_slice %73 {offsets = [0, 16], sizes = [8, 8], strides = [1, 1]} : vector<8x32xbf16> to vector<8x8xbf16>
      %c2 = arith.constant 2 : index
      %c0_60 = arith.constant 0 : index
      %c0_61 = arith.constant 0 : index
      %83 = vector.load %arg14[%c2, %c0_60, %c0_61] : memref<4x8x8xbf16, #tpu.memory_space<vmem>>, vector<1x8x8xbf16>
      %84 = vector.shape_cast %83 : vector<1x8x8xbf16> to vector<8x8xbf16>
      %85 = vector.shape_cast %82 : vector<8x8xbf16> to vector<1x8x8xbf16>
      tpu.vector_store %arg14[%c2, %c0_60, %c0_61], %85 {strides = array<i32>} : memref<4x8x8xbf16, #tpu.memory_space<vmem>>, vector<1x8x8xbf16>,
      %86 = vector.extract_strided_slice %73 {offsets = [0, 24], sizes = [8, 8], strides = [1, 1]} : vector<8x32xbf16> to vector<8x8xbf16>
      %c3 = arith.constant 3 : index
      %c0_62 = arith.constant 0 : index
      %c0_63 = arith.constant 0 : index
      %87 = vector.load %arg14[%c3, %c0_62, %c0_63] : memref<4x8x8xbf16, #tpu.memory_space<vmem>>, vector<1x8x8xbf16>
      %88 = vector.shape_cast %87 : vector<1x8x8xbf16> to vector<8x8xbf16>
      %89 = vector.shape_cast %86 : vector<8x8xbf16> to vector<1x8x8xbf16>
      tpu.vector_store %arg14[%c3, %c0_62, %c0_63], %89 {strides = array<i32>} : memref<4x8x8xbf16, #tpu.memory_space<vmem>>, vector<1x8x8xbf16>,
      %cst_64 = arith.constant 0.000000e+00 : f32
      %90 = vector.broadcast %cst_64 : f32 to vector<4x8x8xf32>
      %c0_65 = arith.constant 0 : index
      %c0_66 = arith.constant 0 : index
      %c0_67 = arith.constant 0 : index
      %91 = vector.load %arg15[%c0_65, %c0_66, %c0_67] : memref<4x8x8xf32, #tpu.memory_space<vmem>>, vector<4x8x8xf32>
      tpu.vector_store %arg15[%c0_65, %c0_66, %c0_67], %90 {strides = array<i32>} : memref<4x8x8xf32, #tpu.memory_space<vmem>>, vector<4x8x8xf32>,
      %cst_68 = arith.constant -1.000000e+30 : f32
      %92 = vector.broadcast %cst_68 : f32 to vector<4x8x1xf32>
      %c0_69 = arith.constant 0 : index
      %c0_70 = arith.constant 0 : index
      %c0_71 = arith.constant 0 : index
      %93 = vector.load %arg16[%c0_69, %c0_70, %c0_71] : memref<4x8x1xf32, #tpu.memory_space<vmem>>, vector<4x8x1xf32>
      tpu.vector_store %arg16[%c0_69, %c0_70, %c0_71], %92 {strides = array<i32>} : memref<4x8x1xf32, #tpu.memory_space<vmem>>, vector<4x8x1xf32>,
      %cst_72 = arith.constant 0.000000e+00 : f32
      %94 = vector.broadcast %cst_72 : f32 to vector<4x8x1xf32>
      %c0_73 = arith.constant 0 : index
      %c0_74 = arith.constant 0 : index
      %c0_75 = arith.constant 0 : index
      %95 = vector.load %arg17[%c0_73, %c0_74, %c0_75] : memref<4x8x1xf32, #tpu.memory_space<vmem>>, vector<4x8x1xf32>
      tpu.vector_store %arg17[%c0_73, %c0_74, %c0_75], %94 {strides = array<i32>} : memref<4x8x1xf32, #tpu.memory_space<vmem>>, vector<4x8x1xf32>,
    } else {
    }
    %c0 = arith.constant 0 : index
    %c0_1 = arith.constant 0 : index
    %c0_2 = arith.constant 0 : index
    %c0_3 = arith.constant 0 : index
    %3 = vector.load %arg8[%c0, %c0_1, %c0_2, %c0_3] : memref<1x4x8x8xbf16, #tpu.memory_space<vmem>>, vector<1x4x8x8xbf16>
    %4 = vector.shape_cast %3 : vector<1x4x8x8xbf16> to vector<4x8x8xbf16>
    %c0_4 = arith.constant 0 : index
    %c0_5 = arith.constant 0 : index
    %c0_6 = arith.constant 0 : index
    %c0_7 = arith.constant 0 : index
    %5 = vector.load %arg9[%c0_4, %c0_5, %c0_6, %c0_7] : memref<1x4x8x8xbf16, #tpu.memory_space<vmem>>, vector<1x4x8x8xbf16>
    %6 = vector.shape_cast %5 : vector<1x4x8x8xbf16> to vector<4x8x8xbf16>
    %c0_8 = arith.constant 0 : index
    %c0_9 = arith.constant 0 : index
    %c0_10 = arith.constant 0 : index
    %7 = vector.load %arg10[%c0_8, %c0_9, %c0_10] : memref<1x1x8xf32, #tpu.memory_space<vmem>>, vector<1x1x8xf32>
    %8 = vector.shape_cast %7 : vector<1x1x8xf32> to vector<1x8xf32>
    %c0_11 = arith.constant 0 : index
    %c0_12 = arith.constant 0 : index
    %c0_13 = arith.constant 0 : index
    %9 = vector.load %arg14[%c0_11, %c0_12, %c0_13] : memref<4x8x8xbf16, #tpu.memory_space<vmem>>, vector<4x8x8xbf16>
    "tpu.trace_start"() <{level = 10 : i32, message = "hqd,hkd->hqk"}> : () -> ()
    %cst = arith.constant dense<0.000000e+00> : vector<4x8x8xf32>
    %10 = tpu.matmul %9, %4, %cst {dimension_numbers = #tpu.dot_dimension_numbers<[2], [2], [1], [1], [0, 0, 0, 1, 1, 1], [0], [0]>} : vector<4x8x8xbf16>, vector<4x8x8xbf16>, vector<4x8x8xf32> -> vector<4x8x8xf32>
    "tpu.trace_stop"() : () -> ()
    %11 = vector.shape_cast %8 : vector<1x8xf32> to vector<1x1x8xf32>
    %12 = vector.broadcast %11 : vector<1x1x8xf32> to vector<4x8x8xf32>
    %13 = arith.addf %10, %12 : vector<4x8x8xf32>
    %c0_14 = arith.constant 0 : index
    %c0_15 = arith.constant 0 : index
    %c0_16 = arith.constant 0 : index
    %14 = vector.load %arg16[%c0_14, %c0_15, %c0_16] : memref<4x8x1xf32, #tpu.memory_space<vmem>>, vector<4x8x1xf32>
    %cst_17 = arith.constant dense<0xFF800000> : vector<4x8xf32>
    %15 = vector.multi_reduction <maximumf>, %13, %cst_17 [2] : vector<4x8x8xf32> to vector<4x8xf32>
    %16 = vector.shape_cast %15 : vector<4x8xf32> to vector<4x8x1xf32>
    %17 = arith.maximumf %14, %16 : vector<4x8x1xf32>
    %18 = arith.subf %14, %17 : vector<4x8x1xf32>
    %19 = math.exp %18 : vector<4x8x1xf32>
    %20 = vector.broadcast %17 : vector<4x8x1xf32> to vector<4x8x8xf32>
    %21 = arith.subf %13, %20 : vector<4x8x8xf32>
    %22 = math.exp %21 : vector<4x8x8xf32>
    %c0_18 = arith.constant 0 : index
    %c0_19 = arith.constant 0 : index
    %c0_20 = arith.constant 0 : index
    %23 = vector.load %arg17[%c0_18, %c0_19, %c0_20] : memref<4x8x1xf32, #tpu.memory_space<vmem>>, vector<4x8x1xf32>
    %24 = arith.mulf %19, %23 : vector<4x8x1xf32>
    %cst_21 = arith.constant dense<0.000000e+00> : vector<4x8xf32>
    %25 = vector.multi_reduction <add>, %22, %cst_21 [2] : vector<4x8x8xf32> to vector<4x8xf32>
    %26 = vector.shape_cast %25 : vector<4x8xf32> to vector<4x8x1xf32>
    %27 = arith.addf %24, %26 : vector<4x8x1xf32>
    %c0_22 = arith.constant 0 : index
    %c0_23 = arith.constant 0 : index
    %c0_24 = arith.constant 0 : index
    %28 = vector.load %arg17[%c0_22, %c0_23, %c0_24] : memref<4x8x1xf32, #tpu.memory_space<vmem>>, vector<4x8x1xf32>
    tpu.vector_store %arg17[%c0_22, %c0_23, %c0_24], %27 {strides = array<i32>} : memref<4x8x1xf32, #tpu.memory_space<vmem>>, vector<4x8x1xf32>,
    %c0_25 = arith.constant 0 : index
    %c0_26 = arith.constant 0 : index
    %c0_27 = arith.constant 0 : index
    %29 = vector.load %arg15[%c0_25, %c0_26, %c0_27] : memref<4x8x8xf32, #tpu.memory_space<vmem>>, vector<4x8x8xf32>
    %30 = vector.broadcast %19 : vector<4x8x1xf32> to vector<4x8x8xf32>
    %31 = arith.mulf %30, %29 : vector<4x8x8xf32>
    %32 = arith.truncf %22 : vector<4x8x8xf32> to vector<4x8x8xbf16>
    "tpu.trace_start"() <{level = 10 : i32, message = "hqk,hkd->hqd"}> : () -> ()
    %cst_28 = arith.constant dense<0.000000e+00> : vector<4x8x8xf32>
    %33 = tpu.matmul %32, %6, %cst_28 {dimension_numbers = #tpu.dot_dimension_numbers<[2], [1], [1], [2], [0, 0, 0, 1, 1, 2], [0], [0]>} : vector<4x8x8xbf16>, vector<4x8x8xbf16>, vector<4x8x8xf32> -> vector<4x8x8xf32>
    "tpu.trace_stop"() : () -> ()
    %34 = arith.addf %31, %33 : vector<4x8x8xf32>
    %c0_29 = arith.constant 0 : index
    %c0_30 = arith.constant 0 : index
    %c0_31 = arith.constant 0 : index
    %35 = vector.load %arg15[%c0_29, %c0_30, %c0_31] : memref<4x8x8xf32, #tpu.memory_space<vmem>>, vector<4x8x8xf32>
    tpu.vector_store %arg15[%c0_29, %c0_30, %c0_31], %34 {strides = array<i32>} : memref<4x8x8xf32, #tpu.memory_space<vmem>>, vector<4x8x8xf32>,
    %c0_32 = arith.constant 0 : index
    %c0_33 = arith.constant 0 : index
    %c0_34 = arith.constant 0 : index
    %36 = vector.load %arg16[%c0_32, %c0_33, %c0_34] : memref<4x8x1xf32, #tpu.memory_space<vmem>>, vector<4x8x1xf32>
    tpu.vector_store %arg16[%c0_32, %c0_33, %c0_34], %17 {strides = array<i32>} : memref<4x8x1xf32, #tpu.memory_space<vmem>>, vector<4x8x1xf32>,
    %c0_i32_35 = arith.constant 0 : i32
    %37 = arith.cmpi eq, %arg2, %c0_i32_35 : i32
    %38 = arith.extui %37 : i1 to i32
    %c0_i32_36 = arith.constant 0 : i32
    %39 = arith.cmpi ne, %38, %c0_i32_36 : i32
    scf.if %39 {
      %c0_37 = arith.constant 0 : index
      %c0_38 = arith.constant 0 : index
      %c0_39 = arith.constant 0 : index
      %40 = vector.load %arg17[%c0_37, %c0_38, %c0_39] : memref<4x8x1xf32, #tpu.memory_space<vmem>>, vector<4x8x1xf32>
      %41 = tpu.reciprocal %40 {approx = true} : vector<4x8x1xf32> -> vector<4x8x1xf32>
      %c0_40 = arith.constant 0 : index
      %c0_41 = arith.constant 0 : index
      %c0_42 = arith.constant 0 : index
      %42 = vector.load %arg15[%c0_40, %c0_41, %c0_42] : memref<4x8x8xf32, #tpu.memory_space<vmem>>, vector<4x8x8xf32>
      %43 = vector.broadcast %41 : vector<4x8x1xf32> to vector<4x8x8xf32>
      %44 = arith.mulf %42, %43 : vector<4x8x8xf32>
      %45 = arith.truncf %44 : vector<4x8x8xf32> to vector<4x8x8xbf16>
      %c0_43 = arith.constant 0 : index
      %c0_44 = arith.constant 0 : index
      %c0_45 = arith.constant 0 : index
      %46 = vector.load %arg3[%c0_43, %c0_44, %c0_45] : memref<1x8x32xbf16, #tpu.memory_space<vmem>>, vector<1x8x32xbf16>
      %47 = vector.shape_cast %46 : vector<1x8x32xbf16> to vector<8x32xbf16>
      %48 = arith.extf %47 : vector<8x32xbf16> to vector<8x32xf32>
      %c0_46 = arith.constant 0 : index
      %c0_47 = arith.constant 0 : index
      %49 = vector.load %arg12[%c0_46, %c0_47] : memref<1x32xf32, #tpu.memory_space<vmem>>, vector<1x32xf32>
      %50 = vector.broadcast %49 : vector<1x32xf32> to vector<8x32xf32>
      %51 = arith.addf %50, %48 : vector<8x32xf32>
      %52 = vector.extract_strided_slice %45 {offsets = [0, 0, 0], sizes = [1, 8, 8], strides = [1, 1, 1]} : vector<4x8x8xbf16> to vector<1x8x8xbf16>
      %53 = vector.shape_cast %52 : vector<1x8x8xbf16> to vector<8x8xbf16>
      %c0_48 = arith.constant 0 : index
      %c0_49 = arith.constant 0 : index
      %c0_50 = arith.constant 0 : index
      %54 = vector.load %arg11[%c0_48, %c0_49, %c0_50] : memref<4x8x32xbf16, #tpu.memory_space<vmem>>, vector<1x8x32xbf16>
      %55 = vector.shape_cast %54 : vector<1x8x32xbf16> to vector<8x32xbf16>
      %cst_51 = arith.constant dense<0.000000e+00> : vector<8x32xf32>
      %56 = tpu.matmul %53, %55, %cst_51 {dimension_numbers = #tpu.dot_dimension_numbers<[1], [0], [0], [1], [0, 0, 1, 1], [], []>} : vector<8x8xbf16>, vector<8x32xbf16>, vector<8x32xf32> -> vector<8x32xf32>
      %57 = arith.addf %51, %56 : vector<8x32xf32>
      %58 = vector.extract_strided_slice %45 {offsets = [1, 0, 0], sizes = [1, 8, 8], strides = [1, 1, 1]} : vector<4x8x8xbf16> to vector<1x8x8xbf16>
      %59 = vector.shape_cast %58 : vector<1x8x8xbf16> to vector<8x8xbf16>
      %c1 = arith.constant 1 : index
      %c0_52 = arith.constant 0 : index
      %c0_53 = arith.constant 0 : index
      %60 = vector.load %arg11[%c1, %c0_52, %c0_53] : memref<4x8x32xbf16, #tpu.memory_space<vmem>>, vector<1x8x32xbf16>
      %61 = vector.shape_cast %60 : vector<1x8x32xbf16> to vector<8x32xbf16>
      %cst_54 = arith.constant dense<0.000000e+00> : vector<8x32xf32>
      %62 = tpu.matmul %59, %61, %cst_54 {dimension_numbers = #tpu.dot_dimension_numbers<[1], [0], [0], [1], [0, 0, 1, 1], [], []>} : vector<8x8xbf16>, vector<8x32xbf16>, vector<8x32xf32> -> vector<8x32xf32>
      %63 = arith.addf %57, %62 : vector<8x32xf32>
      %64 = vector.extract_strided_slice %45 {offsets = [2, 0, 0], sizes = [1, 8, 8], strides = [1, 1, 1]} : vector<4x8x8xbf16> to vector<1x8x8xbf16>
      %65 = vector.shape_cast %64 : vector<1x8x8xbf16> to vector<8x8xbf16>
      %c2 = arith.constant 2 : index
      %c0_55 = arith.constant 0 : index
      %c0_56 = arith.constant 0 : index
      %66 = vector.load %arg11[%c2, %c0_55, %c0_56] : memref<4x8x32xbf16, #tpu.memory_space<vmem>>, vector<1x8x32xbf16>
      %67 = vector.shape_cast %66 : vector<1x8x32xbf16> to vector<8x32xbf16>
      %cst_57 = arith.constant dense<0.000000e+00> : vector<8x32xf32>
      %68 = tpu.matmul %65, %67, %cst_57 {dimension_numbers = #tpu.dot_dimension_numbers<[1], [0], [0], [1], [0, 0, 1, 1], [], []>} : vector<8x8xbf16>, vector<8x32xbf16>, vector<8x32xf32> -> vector<8x32xf32>
      %69 = arith.addf %63, %68 : vector<8x32xf32>
      %70 = vector.extract_strided_slice %45 {offsets = [3, 0, 0], sizes = [1, 8, 8], strides = [1, 1, 1]} : vector<4x8x8xbf16> to vector<1x8x8xbf16>
      %71 = vector.shape_cast %70 : vector<1x8x8xbf16> to vector<8x8xbf16>
      %c3 = arith.constant 3 : index
      %c0_58 = arith.constant 0 : index
      %c0_59 = arith.constant 0 : index
      %72 = vector.load %arg11[%c3, %c0_58, %c0_59] : memref<4x8x32xbf16, #tpu.memory_space<vmem>>, vector<1x8x32xbf16>
      %73 = vector.shape_cast %72 : vector<1x8x32xbf16> to vector<8x32xbf16>
      %cst_60 = arith.constant dense<0.000000e+00> : vector<8x32xf32>
      %74 = tpu.matmul %71, %73, %cst_60 {dimension_numbers = #tpu.dot_dimension_numbers<[1], [0], [0], [1], [0, 0, 1, 1], [], []>} : vector<8x8xbf16>, vector<8x32xbf16>, vector<8x32xf32> -> vector<8x32xf32>
      %75 = arith.addf %69, %74 : vector<8x32xf32>
      %76 = arith.truncf %75 : vector<8x32xf32> to vector<8x32xbf16>
      %c0_61 = arith.constant 0 : index
      %c0_62 = arith.constant 0 : index
      %c0_63 = arith.constant 0 : index
      %77 = vector.load %arg13[%c0_61, %c0_62, %c0_63] : memref<1x8x32xbf16, #tpu.memory_space<vmem>>, vector<1x8x32xbf16>
      %78 = vector.shape_cast %77 : vector<1x8x32xbf16> to vector<8x32xbf16>
      %79 = vector.shape_cast %76 : vector<8x32xbf16> to vector<1x8x32xbf16>
      tpu.vector_store %arg13[%c0_61, %c0_62, %c0_63], %79 {strides = array<i32>} : memref<1x8x32xbf16, #tpu.memory_space<vmem>>, vector<1x8x32xbf16>,
    } else {
    }
    return
  }
  func.func @transform_0(%arg0: i32, %arg1: i32, %arg2: i32) -> (i32, i32, i32) {
    %c0_i32 = arith.constant 0 : i32
    %c0_i32_0 = arith.constant 0 : i32
    return %arg0, %arg1, %c0_i32 : i32, i32, i32
  }
  func.func @transform_1(%arg0: i32, %arg1: i32, %arg2: i32) -> (i32, i32) {
    %c0_i32 = arith.constant 0 : i32
    %c0_i32_0 = arith.constant 0 : i32
    %c0_i32_1 = arith.constant 0 : i32
    return %c0_i32, %c0_i32_0 : i32, i32
  }
  func.func @transform_2(%arg0: i32, %arg1: i32, %arg2: i32) -> (i32, i32) {
    %c0_i32 = arith.constant 0 : i32
    %c0_i32_0 = arith.constant 0 : i32
    %c0_i32_1 = arith.constant 0 : i32
    return %c0_i32, %c0_i32_0 : i32, i32
  }
  func.func @transform_3(%arg0: i32, %arg1: i32, %arg2: i32) -> (i32, i32) {
    %c0_i32 = arith.constant 0 : i32
    %c0_i32_0 = arith.constant 0 : i32
    %c0_i32_1 = arith.constant 0 : i32
    return %c0_i32, %c0_i32_0 : i32, i32
  }
  func.func @transform_4(%arg0: i32, %arg1: i32, %arg2: i32) -> (i32, i32) {
    %c0_i32 = arith.constant 0 : i32
    %c0_i32_0 = arith.constant 0 : i32
    %c0_i32_1 = arith.constant 0 : i32
    return %c0_i32, %c0_i32_0 : i32, i32
  }
  func.func @transform_5(%arg0: i32, %arg1: i32, %arg2: i32) -> (i32, i32, i32, i32) {
    %c0_i32 = arith.constant 0 : i32
    %c0_i32_0 = arith.constant 0 : i32
    %c0_i32_1 = arith.constant 0 : i32
    return %arg0, %c0_i32, %arg2, %c0_i32_0 : i32, i32, i32, i32
  }
  func.func @transform_6(%arg0: i32, %arg1: i32, %arg2: i32) -> (i32, i32, i32, i32) {
    %c0_i32 = arith.constant 0 : i32
    %c0_i32_0 = arith.constant 0 : i32
    %c0_i32_1 = arith.constant 0 : i32
    return %arg0, %c0_i32, %arg2, %c0_i32_0 : i32, i32, i32, i32
  }
  func.func @transform_7(%arg0: i32, %arg1: i32, %arg2: i32) -> (i32, i32, i32) {
    %c0_i32 = arith.constant 0 : i32
    %c0_i32_0 = arith.constant 0 : i32
    return %arg0, %c0_i32, %arg2 : i32, i32, i32
  }
  func.func @transform_8(%arg0: i32, %arg1: i32, %arg2: i32) -> (i32, i32, i32) {
    %c0_i32 = arith.constant 0 : i32
    %c0_i32_0 = arith.constant 0 : i32
    %c0_i32_1 = arith.constant 0 : i32
    %c0_i32_2 = arith.constant 0 : i32
    return %c0_i32, %c0_i32_0, %c0_i32_1 : i32, i32, i32
  }
  func.func @transform_9(%arg0: i32, %arg1: i32, %arg2: i32) -> (i32, i32) {
    %c0_i32 = arith.constant 0 : i32
    %c0_i32_0 = arith.constant 0 : i32
    %c0_i32_1 = arith.constant 0 : i32
    return %c0_i32, %c0_i32_0 : i32, i32
  }
  func.func @transform_10(%arg0: i32, %arg1: i32, %arg2: i32) -> (i32, i32, i32) {
    %c0_i32 = arith.constant 0 : i32
    %c0_i32_0 = arith.constant 0 : i32
    return %arg0, %arg1, %c0_i32 : i32, i32, i32
  }
}

module attributes {stable_mosaic.version = 11 : i64} {
  func.func @_kv_proj_kernel(%arg0: i32, %arg1: i32, %arg2: memref<1x8x24xf32, #tpu.memory_space<vmem>>, %arg3: memref<1x24xf32, #tpu.memory_space<vmem>>, %arg4: memref<1x24xf32, #tpu.memory_space<vmem>>, %arg5: memref<24x64xbf16, #tpu.memory_space<vmem>>, %arg6: memref<1x64xf32, #tpu.memory_space<vmem>>, %arg7: memref<1x4x8x8xbf16, #tpu.memory_space<vmem>>, %arg8: memref<1x4x8x8xbf16, #tpu.memory_space<vmem>>) attributes {dimension_semantics = [#tpu.dimension_semantics<parallel>, #tpu.dimension_semantics<parallel>], iteration_bounds = array<i64: 2, 1>, scalar_prefetch = 0 : i64, scratch_operands = 0 : i64, tpu.core_type = #tpu.core_type<tc>, window_params = [{transform_indices = @transform_0, window_bounds = array<i64: 1, 8, 24>}, {pipeline_mode = #tpu.pipeline_mode<synchronous>, transform_indices = @transform_1, window_bounds = array<i64: 1, 24>}, {pipeline_mode = #tpu.pipeline_mode<synchronous>, transform_indices = @transform_2, window_bounds = array<i64: 1, 24>}, {pipeline_mode = #tpu.pipeline_mode<synchronous>, transform_indices = @transform_3, window_bounds = array<i64: 24, 64>}, {pipeline_mode = #tpu.pipeline_mode<synchronous>, transform_indices = @transform_4, window_bounds = array<i64: 1, 64>}, {transform_indices = @transform_5, window_bounds = array<i64: 1, 4, 8, 8>}, {transform_indices = @transform_6, window_bounds = array<i64: 1, 4, 8, 8>}]} {
    %c0 = arith.constant 0 : index
    %c0_0 = arith.constant 0 : index
    %c0_1 = arith.constant 0 : index
    %0 = vector.load %arg2[%c0, %c0_0, %c0_1] : memref<1x8x24xf32, #tpu.memory_space<vmem>>, vector<1x8x24xf32>
    %1 = vector.shape_cast %0 : vector<1x8x24xf32> to vector<8x24xf32>
    %2 = arith.truncf %1 : vector<8x24xf32> to vector<8x24xbf16>
    %c0_2 = arith.constant 0 : index
    %c0_3 = arith.constant 0 : index
    %3 = vector.load %arg5[%c0_2, %c0_3] : memref<24x64xbf16, #tpu.memory_space<vmem>>, vector<24x64xbf16>
    %cst = arith.constant dense<0.000000e+00> : vector<8x64xf32>
    %4 = tpu.matmul %2, %3, %cst {dimension_numbers = #tpu.dot_dimension_numbers<[1], [0], [0], [1], [0, 0, 1, 1], [], []>} : vector<8x24xbf16>, vector<24x64xbf16>, vector<8x64xf32> -> vector<8x64xf32>
    %c0_4 = arith.constant 0 : index
    %c0_5 = arith.constant 0 : index
    %5 = vector.load %arg6[%c0_4, %c0_5] : memref<1x64xf32, #tpu.memory_space<vmem>>, vector<1x64xf32>
    %6 = vector.broadcast %5 : vector<1x64xf32> to vector<8x64xf32>
    %7 = arith.addf %4, %6 : vector<8x64xf32>
    %8 = vector.extract_strided_slice %7 {offsets = [0, 0], sizes = [8, 8], strides = [1, 1]} : vector<8x64xf32> to vector<8x8xf32>
    %9 = arith.truncf %8 : vector<8x8xf32> to vector<8x8xbf16>
    %c0_6 = arith.constant 0 : index
    %c0_7 = arith.constant 0 : index
    %c0_8 = arith.constant 0 : index
    %c0_9 = arith.constant 0 : index
    %10 = vector.load %arg7[%c0_6, %c0_7, %c0_8, %c0_9] : memref<1x4x8x8xbf16, #tpu.memory_space<vmem>>, vector<1x1x8x8xbf16>
    %11 = vector.shape_cast %10 : vector<1x1x8x8xbf16> to vector<8x8xbf16>
    %12 = vector.shape_cast %9 : vector<8x8xbf16> to vector<1x1x8x8xbf16>
    tpu.vector_store %arg7[%c0_6, %c0_7, %c0_8, %c0_9], %12 {strides = array<i32>} : memref<1x4x8x8xbf16, #tpu.memory_space<vmem>>, vector<1x1x8x8xbf16>,
    %13 = vector.extract_strided_slice %7 {offsets = [0, 32], sizes = [8, 8], strides = [1, 1]} : vector<8x64xf32> to vector<8x8xf32>
    %14 = arith.truncf %13 : vector<8x8xf32> to vector<8x8xbf16>
    %c0_10 = arith.constant 0 : index
    %c0_11 = arith.constant 0 : index
    %c0_12 = arith.constant 0 : index
    %c0_13 = arith.constant 0 : index
    %15 = vector.load %arg8[%c0_10, %c0_11, %c0_12, %c0_13] : memref<1x4x8x8xbf16, #tpu.memory_space<vmem>>, vector<1x1x8x8xbf16>
    %16 = vector.shape_cast %15 : vector<1x1x8x8xbf16> to vector<8x8xbf16>
    %17 = vector.shape_cast %14 : vector<8x8xbf16> to vector<1x1x8x8xbf16>
    tpu.vector_store %arg8[%c0_10, %c0_11, %c0_12, %c0_13], %17 {strides = array<i32>} : memref<1x4x8x8xbf16, #tpu.memory_space<vmem>>, vector<1x1x8x8xbf16>,
    %18 = vector.extract_strided_slice %7 {offsets = [0, 8], sizes = [8, 8], strides = [1, 1]} : vector<8x64xf32> to vector<8x8xf32>
    %19 = arith.truncf %18 : vector<8x8xf32> to vector<8x8xbf16>
    %c0_14 = arith.constant 0 : index
    %c1 = arith.constant 1 : index
    %c0_15 = arith.constant 0 : index
    %c0_16 = arith.constant 0 : index
    %20 = vector.load %arg7[%c0_14, %c1, %c0_15, %c0_16] : memref<1x4x8x8xbf16, #tpu.memory_space<vmem>>, vector<1x1x8x8xbf16>
    %21 = vector.shape_cast %20 : vector<1x1x8x8xbf16> to vector<8x8xbf16>
    %22 = vector.shape_cast %19 : vector<8x8xbf16> to vector<1x1x8x8xbf16>
    tpu.vector_store %arg7[%c0_14, %c1, %c0_15, %c0_16], %22 {strides = array<i32>} : memref<1x4x8x8xbf16, #tpu.memory_space<vmem>>, vector<1x1x8x8xbf16>,
    %23 = vector.extract_strided_slice %7 {offsets = [0, 40], sizes = [8, 8], strides = [1, 1]} : vector<8x64xf32> to vector<8x8xf32>
    %24 = arith.truncf %23 : vector<8x8xf32> to vector<8x8xbf16>
    %c0_17 = arith.constant 0 : index
    %c1_18 = arith.constant 1 : index
    %c0_19 = arith.constant 0 : index
    %c0_20 = arith.constant 0 : index
    %25 = vector.load %arg8[%c0_17, %c1_18, %c0_19, %c0_20] : memref<1x4x8x8xbf16, #tpu.memory_space<vmem>>, vector<1x1x8x8xbf16>
    %26 = vector.shape_cast %25 : vector<1x1x8x8xbf16> to vector<8x8xbf16>
    %27 = vector.shape_cast %24 : vector<8x8xbf16> to vector<1x1x8x8xbf16>
    tpu.vector_store %arg8[%c0_17, %c1_18, %c0_19, %c0_20], %27 {strides = array<i32>} : memref<1x4x8x8xbf16, #tpu.memory_space<vmem>>, vector<1x1x8x8xbf16>,
    %28 = vector.extract_strided_slice %7 {offsets = [0, 16], sizes = [8, 8], strides = [1, 1]} : vector<8x64xf32> to vector<8x8xf32>
    %29 = arith.truncf %28 : vector<8x8xf32> to vector<8x8xbf16>
    %c0_21 = arith.constant 0 : index
    %c2 = arith.constant 2 : index
    %c0_22 = arith.constant 0 : index
    %c0_23 = arith.constant 0 : index
    %30 = vector.load %arg7[%c0_21, %c2, %c0_22, %c0_23] : memref<1x4x8x8xbf16, #tpu.memory_space<vmem>>, vector<1x1x8x8xbf16>
    %31 = vector.shape_cast %30 : vector<1x1x8x8xbf16> to vector<8x8xbf16>
    %32 = vector.shape_cast %29 : vector<8x8xbf16> to vector<1x1x8x8xbf16>
    tpu.vector_store %arg7[%c0_21, %c2, %c0_22, %c0_23], %32 {strides = array<i32>} : memref<1x4x8x8xbf16, #tpu.memory_space<vmem>>, vector<1x1x8x8xbf16>,
    %33 = vector.extract_strided_slice %7 {offsets = [0, 48], sizes = [8, 8], strides = [1, 1]} : vector<8x64xf32> to vector<8x8xf32>
    %34 = arith.truncf %33 : vector<8x8xf32> to vector<8x8xbf16>
    %c0_24 = arith.constant 0 : index
    %c2_25 = arith.constant 2 : index
    %c0_26 = arith.constant 0 : index
    %c0_27 = arith.constant 0 : index
    %35 = vector.load %arg8[%c0_24, %c2_25, %c0_26, %c0_27] : memref<1x4x8x8xbf16, #tpu.memory_space<vmem>>, vector<1x1x8x8xbf16>
    %36 = vector.shape_cast %35 : vector<1x1x8x8xbf16> to vector<8x8xbf16>
    %37 = vector.shape_cast %34 : vector<8x8xbf16> to vector<1x1x8x8xbf16>
    tpu.vector_store %arg8[%c0_24, %c2_25, %c0_26, %c0_27], %37 {strides = array<i32>} : memref<1x4x8x8xbf16, #tpu.memory_space<vmem>>, vector<1x1x8x8xbf16>,
    %38 = vector.extract_strided_slice %7 {offsets = [0, 24], sizes = [8, 8], strides = [1, 1]} : vector<8x64xf32> to vector<8x8xf32>
    %39 = arith.truncf %38 : vector<8x8xf32> to vector<8x8xbf16>
    %c0_28 = arith.constant 0 : index
    %c3 = arith.constant 3 : index
    %c0_29 = arith.constant 0 : index
    %c0_30 = arith.constant 0 : index
    %40 = vector.load %arg7[%c0_28, %c3, %c0_29, %c0_30] : memref<1x4x8x8xbf16, #tpu.memory_space<vmem>>, vector<1x1x8x8xbf16>
    %41 = vector.shape_cast %40 : vector<1x1x8x8xbf16> to vector<8x8xbf16>
    %42 = vector.shape_cast %39 : vector<8x8xbf16> to vector<1x1x8x8xbf16>
    tpu.vector_store %arg7[%c0_28, %c3, %c0_29, %c0_30], %42 {strides = array<i32>} : memref<1x4x8x8xbf16, #tpu.memory_space<vmem>>, vector<1x1x8x8xbf16>,
    %43 = vector.extract_strided_slice %7 {offsets = [0, 56], sizes = [8, 8], strides = [1, 1]} : vector<8x64xf32> to vector<8x8xf32>
    %44 = arith.truncf %43 : vector<8x8xf32> to vector<8x8xbf16>
    %c0_31 = arith.constant 0 : index
    %c3_32 = arith.constant 3 : index
    %c0_33 = arith.constant 0 : index
    %c0_34 = arith.constant 0 : index
    %45 = vector.load %arg8[%c0_31, %c3_32, %c0_33, %c0_34] : memref<1x4x8x8xbf16, #tpu.memory_space<vmem>>, vector<1x1x8x8xbf16>
    %46 = vector.shape_cast %45 : vector<1x1x8x8xbf16> to vector<8x8xbf16>
    %47 = vector.shape_cast %44 : vector<8x8xbf16> to vector<1x1x8x8xbf16>
    tpu.vector_store %arg8[%c0_31, %c3_32, %c0_33, %c0_34], %47 {strides = array<i32>} : memref<1x4x8x8xbf16, #tpu.memory_space<vmem>>, vector<1x1x8x8xbf16>,
    return
  }
  func.func @transform_0(%arg0: i32, %arg1: i32) -> (i32, i32, i32) {
    %c0_i32 = arith.constant 0 : i32
    %c0_i32_0 = arith.constant 0 : i32
    return %arg0, %arg1, %c0_i32 : i32, i32, i32
  }
  func.func @transform_1(%arg0: i32, %arg1: i32) -> (i32, i32) {
    %c0_i32 = arith.constant 0 : i32
    %c0_i32_0 = arith.constant 0 : i32
    %c0_i32_1 = arith.constant 0 : i32
    return %c0_i32, %c0_i32_0 : i32, i32
  }
  func.func @transform_2(%arg0: i32, %arg1: i32) -> (i32, i32) {
    %c0_i32 = arith.constant 0 : i32
    %c0_i32_0 = arith.constant 0 : i32
    %c0_i32_1 = arith.constant 0 : i32
    return %c0_i32, %c0_i32_0 : i32, i32
  }
  func.func @transform_3(%arg0: i32, %arg1: i32) -> (i32, i32) {
    %c0_i32 = arith.constant 0 : i32
    %c0_i32_0 = arith.constant 0 : i32
    %c0_i32_1 = arith.constant 0 : i32
    return %c0_i32, %c0_i32_0 : i32, i32
  }
  func.func @transform_4(%arg0: i32, %arg1: i32) -> (i32, i32) {
    %c0_i32 = arith.constant 0 : i32
    %c0_i32_0 = arith.constant 0 : i32
    %c0_i32_1 = arith.constant 0 : i32
    return %c0_i32, %c0_i32_0 : i32, i32
  }
  func.func @transform_5(%arg0: i32, %arg1: i32) -> (i32, i32, i32, i32) {
    %c0_i32 = arith.constant 0 : i32
    %c0_i32_0 = arith.constant 0 : i32
    %c0_i32_1 = arith.constant 0 : i32
    return %arg0, %c0_i32, %arg1, %c0_i32_0 : i32, i32, i32, i32
  }
  func.func @transform_6(%arg0: i32, %arg1: i32) -> (i32, i32, i32, i32) {
    %c0_i32 = arith.constant 0 : i32
    %c0_i32_0 = arith.constant 0 : i32
    %c0_i32_1 = arith.constant 0 : i32
    return %arg0, %c0_i32, %arg1, %c0_i32_0 : i32, i32, i32, i32
  }
}

module attributes {stable_mosaic.version = 11 : i64} {
  func.func @_flash_attn_kernel(%arg0: i32, %arg1: i32, %arg2: i32, %arg3: memref<1x8x32xbf16, #tpu.memory_space<vmem>>, %arg4: memref<1x32xf32, #tpu.memory_space<vmem>>, %arg5: memref<1x32xf32, #tpu.memory_space<vmem>>, %arg6: memref<32x32xbf16, #tpu.memory_space<vmem>>, %arg7: memref<1x32xf32, #tpu.memory_space<vmem>>, %arg8: memref<1x4x8x8xbf16, #tpu.memory_space<vmem>>, %arg9: memref<1x4x8x8xbf16, #tpu.memory_space<vmem>>, %arg10: memref<1x1x8xf32, #tpu.memory_space<vmem>>, %arg11: memref<4x8x32xbf16, #tpu.memory_space<vmem>>, %arg12: memref<1x32xf32, #tpu.memory_space<vmem>>, %arg13: memref<32x64xbf16, #tpu.memory_space<vmem>>, %arg14: memref<1x64xf32, #tpu.memory_space<vmem>>, %arg15: memref<1x8x32xbf16, #tpu.memory_space<vmem>>, %arg16: memref<4x8x8xbf16, #tpu.memory_space<vmem>>, %arg17: memref<4x8x8xf32, #tpu.memory_space<vmem>>, %arg18: memref<4x8x1xf32, #tpu.memory_space<vmem>>, %arg19: memref<4x8x1xf32, #tpu.memory_space<vmem>>) attributes {dimension_semantics = [#tpu.dimension_semantics<parallel>, #tpu.dimension_semantics<parallel>, #tpu.dimension_semantics<arbitrary>], iteration_bounds = array<i64: 2, 1, 1>, scalar_prefetch = 0 : i64, scratch_operands = 4 : i64, tpu.core_type = #tpu.core_type<tc>, window_params = [{transform_indices = @transform_0, window_bounds = array<i64: 1, 8, 32>}, {pipeline_mode = #tpu.pipeline_mode<synchronous>, transform_indices = @transform_1, window_bounds = array<i64: 1, 32>}, {pipeline_mode = #tpu.pipeline_mode<synchronous>, transform_indices = @transform_2, window_bounds = array<i64: 1, 32>}, {pipeline_mode = #tpu.pipeline_mode<synchronous>, transform_indices = @transform_3, window_bounds = array<i64: 32, 32>}, {pipeline_mode = #tpu.pipeline_mode<synchronous>, transform_indices = @transform_4, window_bounds = array<i64: 1, 32>}, {transform_indices = @transform_5, window_bounds = array<i64: 1, 4, 8, 8>}, {transform_indices = @transform_6, window_bounds = array<i64: 1, 4, 8, 8>}, {transform_indices = @transform_7, window_bounds = array<i64: 1, 1, 8>}, {pipeline_mode = #tpu.pipeline_mode<synchronous>, transform_indices = @transform_8, window_bounds = array<i64: 4, 8, 32>}, {pipeline_mode = #tpu.pipeline_mode<synchronous>, transform_indices = @transform_9, window_bounds = array<i64: 1, 32>}, {pipeline_mode = #tpu.pipeline_mode<synchronous>, transform_indices = @transform_10, window_bounds = array<i64: 32, 64>}, {pipeline_mode = #tpu.pipeline_mode<synchronous>, transform_indices = @transform_11, window_bounds = array<i64: 1, 64>}, {transform_indices = @transform_12, window_bounds = array<i64: 1, 8, 32>}]} {
    %c0_i32 = arith.constant 0 : i32
    %0 = arith.cmpi eq, %arg2, %c0_i32 : i32
    %1 = arith.extui %0 : i1 to i32
    %c0_i32_0 = arith.constant 0 : i32
    %2 = arith.cmpi ne, %1, %c0_i32_0 : i32
    scf.if %2 {
      %c0_37 = arith.constant 0 : index
      %c0_38 = arith.constant 0 : index
      %c0_39 = arith.constant 0 : index
      %40 = vector.load %arg3[%c0_37, %c0_38, %c0_39] : memref<1x8x32xbf16, #tpu.memory_space<vmem>>, vector<1x8x32xbf16>
      %41 = vector.shape_cast %40 : vector<1x8x32xbf16> to vector<8x32xbf16>
      %42 = arith.extf %41 : vector<8x32xbf16> to vector<8x32xf32>
      %c0_40 = arith.constant 0 : index
      %c0_41 = arith.constant 0 : index
      %43 = vector.load %arg4[%c0_40, %c0_41] : memref<1x32xf32, #tpu.memory_space<vmem>>, vector<1x32xf32>
      %c0_42 = arith.constant 0 : index
      %c0_43 = arith.constant 0 : index
      %44 = vector.load %arg5[%c0_42, %c0_43] : memref<1x32xf32, #tpu.memory_space<vmem>>, vector<1x32xf32>
      %cst_44 = arith.constant dense<0.000000e+00> : vector<8xf32>
      %45 = vector.multi_reduction <add>, %42, %cst_44 [1] : vector<8x32xf32> to vector<8xf32>
      %46 = vector.shape_cast %45 : vector<8xf32> to vector<8x1xf32>
      %cst_45 = arith.constant 3.200000e+01 : f32
      %47 = vector.broadcast %cst_45 : f32 to vector<8x1xf32>
      %48 = arith.divf %46, %47 : vector<8x1xf32>
      %49 = vector.broadcast %48 : vector<8x1xf32> to vector<8x32xf32>
      %50 = arith.subf %42, %49 : vector<8x32xf32>
      %51 = arith.mulf %50, %50 : vector<8x32xf32>
      %cst_46 = arith.constant dense<0.000000e+00> : vector<8xf32>
      %52 = vector.multi_reduction <add>, %51, %cst_46 [1] : vector<8x32xf32> to vector<8xf32>
      %53 = vector.shape_cast %52 : vector<8xf32> to vector<8x1xf32>
      %cst_47 = arith.constant 3.200000e+01 : f32
      %54 = vector.broadcast %cst_47 : f32 to vector<8x1xf32>
      %55 = arith.divf %53, %54 : vector<8x1xf32>
      %cst_48 = arith.constant 9.99999974E-6 : f32
      %56 = vector.broadcast %cst_48 : f32 to vector<8x1xf32>
      %57 = arith.addf %55, %56 : vector<8x1xf32>
      %58 = math.rsqrt %57 : vector<8x1xf32>
      %59 = vector.broadcast %58 : vector<8x1xf32> to vector<8x32xf32>
      %60 = arith.mulf %50, %59 : vector<8x32xf32>
      %61 = vector.broadcast %43 : vector<1x32xf32> to vector<8x32xf32>
      %62 = arith.mulf %60, %61 : vector<8x32xf32>
      %63 = vector.broadcast %44 : vector<1x32xf32> to vector<8x32xf32>
      %64 = arith.addf %62, %63 : vector<8x32xf32>
      %65 = arith.truncf %64 : vector<8x32xf32> to vector<8x32xbf16>
      %c0_49 = arith.constant 0 : index
      %c0_50 = arith.constant 0 : index
      %66 = vector.load %arg6[%c0_49, %c0_50] : memref<32x32xbf16, #tpu.memory_space<vmem>>, vector<32x32xbf16>
      %cst_51 = arith.constant dense<0.000000e+00> : vector<8x32xf32>
      %67 = tpu.matmul %65, %66, %cst_51 {dimension_numbers = #tpu.dot_dimension_numbers<[1], [0], [0], [1], [0, 0, 1, 1], [], []>} : vector<8x32xbf16>, vector<32x32xbf16>, vector<8x32xf32> -> vector<8x32xf32>
      %c0_52 = arith.constant 0 : index
      %c0_53 = arith.constant 0 : index
      %68 = vector.load %arg7[%c0_52, %c0_53] : memref<1x32xf32, #tpu.memory_space<vmem>>, vector<1x32xf32>
      %69 = vector.broadcast %68 : vector<1x32xf32> to vector<8x32xf32>
      %70 = arith.addf %67, %69 : vector<8x32xf32>
      %cst_54 = arith.constant 0.353553385 : f32
      %71 = vector.broadcast %cst_54 : f32 to vector<8x32xf32>
      %72 = arith.mulf %70, %71 : vector<8x32xf32>
      %73 = arith.truncf %72 : vector<8x32xf32> to vector<8x32xbf16>
      %74 = vector.extract_strided_slice %73 {offsets = [0, 0], sizes = [8, 8], strides = [1, 1]} : vector<8x32xbf16> to vector<8x8xbf16>
      %c0_55 = arith.constant 0 : index
      %c0_56 = arith.constant 0 : index
      %c0_57 = arith.constant 0 : index
      %75 = vector.load %arg16[%c0_55, %c0_56, %c0_57] : memref<4x8x8xbf16, #tpu.memory_space<vmem>>, vector<1x8x8xbf16>
      %76 = vector.shape_cast %75 : vector<1x8x8xbf16> to vector<8x8xbf16>
      %77 = vector.shape_cast %74 : vector<8x8xbf16> to vector<1x8x8xbf16>
      tpu.vector_store %arg16[%c0_55, %c0_56, %c0_57], %77 {strides = array<i32>} : memref<4x8x8xbf16, #tpu.memory_space<vmem>>, vector<1x8x8xbf16>,
      %78 = vector.extract_strided_slice %73 {offsets = [0, 8], sizes = [8, 8], strides = [1, 1]} : vector<8x32xbf16> to vector<8x8xbf16>
      %c1 = arith.constant 1 : index
      %c0_58 = arith.constant 0 : index
      %c0_59 = arith.constant 0 : index
      %79 = vector.load %arg16[%c1, %c0_58, %c0_59] : memref<4x8x8xbf16, #tpu.memory_space<vmem>>, vector<1x8x8xbf16>
      %80 = vector.shape_cast %79 : vector<1x8x8xbf16> to vector<8x8xbf16>
      %81 = vector.shape_cast %78 : vector<8x8xbf16> to vector<1x8x8xbf16>
      tpu.vector_store %arg16[%c1, %c0_58, %c0_59], %81 {strides = array<i32>} : memref<4x8x8xbf16, #tpu.memory_space<vmem>>, vector<1x8x8xbf16>,
      %82 = vector.extract_strided_slice %73 {offsets = [0, 16], sizes = [8, 8], strides = [1, 1]} : vector<8x32xbf16> to vector<8x8xbf16>
      %c2 = arith.constant 2 : index
      %c0_60 = arith.constant 0 : index
      %c0_61 = arith.constant 0 : index
      %83 = vector.load %arg16[%c2, %c0_60, %c0_61] : memref<4x8x8xbf16, #tpu.memory_space<vmem>>, vector<1x8x8xbf16>
      %84 = vector.shape_cast %83 : vector<1x8x8xbf16> to vector<8x8xbf16>
      %85 = vector.shape_cast %82 : vector<8x8xbf16> to vector<1x8x8xbf16>
      tpu.vector_store %arg16[%c2, %c0_60, %c0_61], %85 {strides = array<i32>} : memref<4x8x8xbf16, #tpu.memory_space<vmem>>, vector<1x8x8xbf16>,
      %86 = vector.extract_strided_slice %73 {offsets = [0, 24], sizes = [8, 8], strides = [1, 1]} : vector<8x32xbf16> to vector<8x8xbf16>
      %c3 = arith.constant 3 : index
      %c0_62 = arith.constant 0 : index
      %c0_63 = arith.constant 0 : index
      %87 = vector.load %arg16[%c3, %c0_62, %c0_63] : memref<4x8x8xbf16, #tpu.memory_space<vmem>>, vector<1x8x8xbf16>
      %88 = vector.shape_cast %87 : vector<1x8x8xbf16> to vector<8x8xbf16>
      %89 = vector.shape_cast %86 : vector<8x8xbf16> to vector<1x8x8xbf16>
      tpu.vector_store %arg16[%c3, %c0_62, %c0_63], %89 {strides = array<i32>} : memref<4x8x8xbf16, #tpu.memory_space<vmem>>, vector<1x8x8xbf16>,
      %cst_64 = arith.constant 0.000000e+00 : f32
      %90 = vector.broadcast %cst_64 : f32 to vector<4x8x8xf32>
      %c0_65 = arith.constant 0 : index
      %c0_66 = arith.constant 0 : index
      %c0_67 = arith.constant 0 : index
      %91 = vector.load %arg17[%c0_65, %c0_66, %c0_67] : memref<4x8x8xf32, #tpu.memory_space<vmem>>, vector<4x8x8xf32>
      tpu.vector_store %arg17[%c0_65, %c0_66, %c0_67], %90 {strides = array<i32>} : memref<4x8x8xf32, #tpu.memory_space<vmem>>, vector<4x8x8xf32>,
      %cst_68 = arith.constant -1.000000e+30 : f32
      %92 = vector.broadcast %cst_68 : f32 to vector<4x8x1xf32>
      %c0_69 = arith.constant 0 : index
      %c0_70 = arith.constant 0 : index
      %c0_71 = arith.constant 0 : index
      %93 = vector.load %arg18[%c0_69, %c0_70, %c0_71] : memref<4x8x1xf32, #tpu.memory_space<vmem>>, vector<4x8x1xf32>
      tpu.vector_store %arg18[%c0_69, %c0_70, %c0_71], %92 {strides = array<i32>} : memref<4x8x1xf32, #tpu.memory_space<vmem>>, vector<4x8x1xf32>,
      %cst_72 = arith.constant 0.000000e+00 : f32
      %94 = vector.broadcast %cst_72 : f32 to vector<4x8x1xf32>
      %c0_73 = arith.constant 0 : index
      %c0_74 = arith.constant 0 : index
      %c0_75 = arith.constant 0 : index
      %95 = vector.load %arg19[%c0_73, %c0_74, %c0_75] : memref<4x8x1xf32, #tpu.memory_space<vmem>>, vector<4x8x1xf32>
      tpu.vector_store %arg19[%c0_73, %c0_74, %c0_75], %94 {strides = array<i32>} : memref<4x8x1xf32, #tpu.memory_space<vmem>>, vector<4x8x1xf32>,
    } else {
    }
    %c0 = arith.constant 0 : index
    %c0_1 = arith.constant 0 : index
    %c0_2 = arith.constant 0 : index
    %c0_3 = arith.constant 0 : index
    %3 = vector.load %arg8[%c0, %c0_1, %c0_2, %c0_3] : memref<1x4x8x8xbf16, #tpu.memory_space<vmem>>, vector<1x4x8x8xbf16>
    %4 = vector.shape_cast %3 : vector<1x4x8x8xbf16> to vector<4x8x8xbf16>
    %c0_4 = arith.constant 0 : index
    %c0_5 = arith.constant 0 : index
    %c0_6 = arith.constant 0 : index
    %c0_7 = arith.constant 0 : index
    %5 = vector.load %arg9[%c0_4, %c0_5, %c0_6, %c0_7] : memref<1x4x8x8xbf16, #tpu.memory_space<vmem>>, vector<1x4x8x8xbf16>
    %6 = vector.shape_cast %5 : vector<1x4x8x8xbf16> to vector<4x8x8xbf16>
    %c0_8 = arith.constant 0 : index
    %c0_9 = arith.constant 0 : index
    %c0_10 = arith.constant 0 : index
    %7 = vector.load %arg10[%c0_8, %c0_9, %c0_10] : memref<1x1x8xf32, #tpu.memory_space<vmem>>, vector<1x1x8xf32>
    %8 = vector.shape_cast %7 : vector<1x1x8xf32> to vector<1x8xf32>
    %c0_11 = arith.constant 0 : index
    %c0_12 = arith.constant 0 : index
    %c0_13 = arith.constant 0 : index
    %9 = vector.load %arg16[%c0_11, %c0_12, %c0_13] : memref<4x8x8xbf16, #tpu.memory_space<vmem>>, vector<4x8x8xbf16>
    "tpu.trace_start"() <{level = 10 : i32, message = "hqd,hkd->hqk"}> : () -> ()
    %cst = arith.constant dense<0.000000e+00> : vector<4x8x8xf32>
    %10 = tpu.matmul %9, %4, %cst {dimension_numbers = #tpu.dot_dimension_numbers<[2], [2], [1], [1], [0, 0, 0, 1, 1, 1], [0], [0]>} : vector<4x8x8xbf16>, vector<4x8x8xbf16>, vector<4x8x8xf32> -> vector<4x8x8xf32>
    "tpu.trace_stop"() : () -> ()
    %11 = vector.shape_cast %8 : vector<1x8xf32> to vector<1x1x8xf32>
    %12 = vector.broadcast %11 : vector<1x1x8xf32> to vector<4x8x8xf32>
    %13 = arith.addf %10, %12 : vector<4x8x8xf32>
    %c0_14 = arith.constant 0 : index
    %c0_15 = arith.constant 0 : index
    %c0_16 = arith.constant 0 : index
    %14 = vector.load %arg18[%c0_14, %c0_15, %c0_16] : memref<4x8x1xf32, #tpu.memory_space<vmem>>, vector<4x8x1xf32>
    %cst_17 = arith.constant dense<0xFF800000> : vector<4x8xf32>
    %15 = vector.multi_reduction <maximumf>, %13, %cst_17 [2] : vector<4x8x8xf32> to vector<4x8xf32>
    %16 = vector.shape_cast %15 : vector<4x8xf32> to vector<4x8x1xf32>
    %17 = arith.maximumf %14, %16 : vector<4x8x1xf32>
    %18 = arith.subf %14, %17 : vector<4x8x1xf32>
    %19 = math.exp %18 : vector<4x8x1xf32>
    %20 = vector.broadcast %17 : vector<4x8x1xf32> to vector<4x8x8xf32>
    %21 = arith.subf %13, %20 : vector<4x8x8xf32>
    %22 = math.exp %21 : vector<4x8x8xf32>
    %c0_18 = arith.constant 0 : index
    %c0_19 = arith.constant 0 : index
    %c0_20 = arith.constant 0 : index
    %23 = vector.load %arg19[%c0_18, %c0_19, %c0_20] : memref<4x8x1xf32, #tpu.memory_space<vmem>>, vector<4x8x1xf32>
    %24 = arith.mulf %19, %23 : vector<4x8x1xf32>
    %cst_21 = arith.constant dense<0.000000e+00> : vector<4x8xf32>
    %25 = vector.multi_reduction <add>, %22, %cst_21 [2] : vector<4x8x8xf32> to vector<4x8xf32>
    %26 = vector.shape_cast %25 : vector<4x8xf32> to vector<4x8x1xf32>
    %27 = arith.addf %24, %26 : vector<4x8x1xf32>
    %c0_22 = arith.constant 0 : index
    %c0_23 = arith.constant 0 : index
    %c0_24 = arith.constant 0 : index
    %28 = vector.load %arg19[%c0_22, %c0_23, %c0_24] : memref<4x8x1xf32, #tpu.memory_space<vmem>>, vector<4x8x1xf32>
    tpu.vector_store %arg19[%c0_22, %c0_23, %c0_24], %27 {strides = array<i32>} : memref<4x8x1xf32, #tpu.memory_space<vmem>>, vector<4x8x1xf32>,
    %c0_25 = arith.constant 0 : index
    %c0_26 = arith.constant 0 : index
    %c0_27 = arith.constant 0 : index
    %29 = vector.load %arg17[%c0_25, %c0_26, %c0_27] : memref<4x8x8xf32, #tpu.memory_space<vmem>>, vector<4x8x8xf32>
    %30 = vector.broadcast %19 : vector<4x8x1xf32> to vector<4x8x8xf32>
    %31 = arith.mulf %30, %29 : vector<4x8x8xf32>
    %32 = arith.truncf %22 : vector<4x8x8xf32> to vector<4x8x8xbf16>
    "tpu.trace_start"() <{level = 10 : i32, message = "hqk,hkd->hqd"}> : () -> ()
    %cst_28 = arith.constant dense<0.000000e+00> : vector<4x8x8xf32>
    %33 = tpu.matmul %32, %6, %cst_28 {dimension_numbers = #tpu.dot_dimension_numbers<[2], [1], [1], [2], [0, 0, 0, 1, 1, 2], [0], [0]>} : vector<4x8x8xbf16>, vector<4x8x8xbf16>, vector<4x8x8xf32> -> vector<4x8x8xf32>
    "tpu.trace_stop"() : () -> ()
    %34 = arith.addf %31, %33 : vector<4x8x8xf32>
    %c0_29 = arith.constant 0 : index
    %c0_30 = arith.constant 0 : index
    %c0_31 = arith.constant 0 : index
    %35 = vector.load %arg17[%c0_29, %c0_30, %c0_31] : memref<4x8x8xf32, #tpu.memory_space<vmem>>, vector<4x8x8xf32>
    tpu.vector_store %arg17[%c0_29, %c0_30, %c0_31], %34 {strides = array<i32>} : memref<4x8x8xf32, #tpu.memory_space<vmem>>, vector<4x8x8xf32>,
    %c0_32 = arith.constant 0 : index
    %c0_33 = arith.constant 0 : index
    %c0_34 = arith.constant 0 : index
    %36 = vector.load %arg18[%c0_32, %c0_33, %c0_34] : memref<4x8x1xf32, #tpu.memory_space<vmem>>, vector<4x8x1xf32>
    tpu.vector_store %arg18[%c0_32, %c0_33, %c0_34], %17 {strides = array<i32>} : memref<4x8x1xf32, #tpu.memory_space<vmem>>, vector<4x8x1xf32>,
    %c0_i32_35 = arith.constant 0 : i32
    %37 = arith.cmpi eq, %arg2, %c0_i32_35 : i32
    %38 = arith.extui %37 : i1 to i32
    %c0_i32_36 = arith.constant 0 : i32
    %39 = arith.cmpi ne, %38, %c0_i32_36 : i32
    scf.if %39 {
      %c0_37 = arith.constant 0 : index
      %c0_38 = arith.constant 0 : index
      %c0_39 = arith.constant 0 : index
      %40 = vector.load %arg19[%c0_37, %c0_38, %c0_39] : memref<4x8x1xf32, #tpu.memory_space<vmem>>, vector<4x8x1xf32>
      %41 = tpu.reciprocal %40 {approx = true} : vector<4x8x1xf32> -> vector<4x8x1xf32>
      %c0_40 = arith.constant 0 : index
      %c0_41 = arith.constant 0 : index
      %c0_42 = arith.constant 0 : index
      %42 = vector.load %arg17[%c0_40, %c0_41, %c0_42] : memref<4x8x8xf32, #tpu.memory_space<vmem>>, vector<4x8x8xf32>
      %43 = vector.broadcast %41 : vector<4x8x1xf32> to vector<4x8x8xf32>
      %44 = arith.mulf %42, %43 : vector<4x8x8xf32>
      %45 = arith.truncf %44 : vector<4x8x8xf32> to vector<4x8x8xbf16>
      %c0_43 = arith.constant 0 : index
      %c0_44 = arith.constant 0 : index
      %c0_45 = arith.constant 0 : index
      %46 = vector.load %arg3[%c0_43, %c0_44, %c0_45] : memref<1x8x32xbf16, #tpu.memory_space<vmem>>, vector<1x8x32xbf16>
      %47 = vector.shape_cast %46 : vector<1x8x32xbf16> to vector<8x32xbf16>
      %48 = arith.extf %47 : vector<8x32xbf16> to vector<8x32xf32>
      %c0_46 = arith.constant 0 : index
      %c0_47 = arith.constant 0 : index
      %49 = vector.load %arg12[%c0_46, %c0_47] : memref<1x32xf32, #tpu.memory_space<vmem>>, vector<1x32xf32>
      %50 = vector.broadcast %49 : vector<1x32xf32> to vector<8x32xf32>
      %51 = arith.addf %50, %48 : vector<8x32xf32>
      %52 = vector.extract_strided_slice %45 {offsets = [0, 0, 0], sizes = [1, 8, 8], strides = [1, 1, 1]} : vector<4x8x8xbf16> to vector<1x8x8xbf16>
      %53 = vector.shape_cast %52 : vector<1x8x8xbf16> to vector<8x8xbf16>
      %c0_48 = arith.constant 0 : index
      %c0_49 = arith.constant 0 : index
      %c0_50 = arith.constant 0 : index
      %54 = vector.load %arg11[%c0_48, %c0_49, %c0_50] : memref<4x8x32xbf16, #tpu.memory_space<vmem>>, vector<1x8x32xbf16>
      %55 = vector.shape_cast %54 : vector<1x8x32xbf16> to vector<8x32xbf16>
      %cst_51 = arith.constant dense<0.000000e+00> : vector<8x32xf32>
      %56 = tpu.matmul %53, %55, %cst_51 {dimension_numbers = #tpu.dot_dimension_numbers<[1], [0], [0], [1], [0, 0, 1, 1], [], []>} : vector<8x8xbf16>, vector<8x32xbf16>, vector<8x32xf32> -> vector<8x32xf32>
      %57 = arith.addf %51, %56 : vector<8x32xf32>
      %58 = vector.extract_strided_slice %45 {offsets = [1, 0, 0], sizes = [1, 8, 8], strides = [1, 1, 1]} : vector<4x8x8xbf16> to vector<1x8x8xbf16>
      %59 = vector.shape_cast %58 : vector<1x8x8xbf16> to vector<8x8xbf16>
      %c1 = arith.constant 1 : index
      %c0_52 = arith.constant 0 : index
      %c0_53 = arith.constant 0 : index
      %60 = vector.load %arg11[%c1, %c0_52, %c0_53] : memref<4x8x32xbf16, #tpu.memory_space<vmem>>, vector<1x8x32xbf16>
      %61 = vector.shape_cast %60 : vector<1x8x32xbf16> to vector<8x32xbf16>
      %cst_54 = arith.constant dense<0.000000e+00> : vector<8x32xf32>
      %62 = tpu.matmul %59, %61, %cst_54 {dimension_numbers = #tpu.dot_dimension_numbers<[1], [0], [0], [1], [0, 0, 1, 1], [], []>} : vector<8x8xbf16>, vector<8x32xbf16>, vector<8x32xf32> -> vector<8x32xf32>
      %63 = arith.addf %57, %62 : vector<8x32xf32>
      %64 = vector.extract_strided_slice %45 {offsets = [2, 0, 0], sizes = [1, 8, 8], strides = [1, 1, 1]} : vector<4x8x8xbf16> to vector<1x8x8xbf16>
      %65 = vector.shape_cast %64 : vector<1x8x8xbf16> to vector<8x8xbf16>
      %c2 = arith.constant 2 : index
      %c0_55 = arith.constant 0 : index
      %c0_56 = arith.constant 0 : index
      %66 = vector.load %arg11[%c2, %c0_55, %c0_56] : memref<4x8x32xbf16, #tpu.memory_space<vmem>>, vector<1x8x32xbf16>
      %67 = vector.shape_cast %66 : vector<1x8x32xbf16> to vector<8x32xbf16>
      %cst_57 = arith.constant dense<0.000000e+00> : vector<8x32xf32>
      %68 = tpu.matmul %65, %67, %cst_57 {dimension_numbers = #tpu.dot_dimension_numbers<[1], [0], [0], [1], [0, 0, 1, 1], [], []>} : vector<8x8xbf16>, vector<8x32xbf16>, vector<8x32xf32> -> vector<8x32xf32>
      %69 = arith.addf %63, %68 : vector<8x32xf32>
      %70 = vector.extract_strided_slice %45 {offsets = [3, 0, 0], sizes = [1, 8, 8], strides = [1, 1, 1]} : vector<4x8x8xbf16> to vector<1x8x8xbf16>
      %71 = vector.shape_cast %70 : vector<1x8x8xbf16> to vector<8x8xbf16>
      %c3 = arith.constant 3 : index
      %c0_58 = arith.constant 0 : index
      %c0_59 = arith.constant 0 : index
      %72 = vector.load %arg11[%c3, %c0_58, %c0_59] : memref<4x8x32xbf16, #tpu.memory_space<vmem>>, vector<1x8x32xbf16>
      %73 = vector.shape_cast %72 : vector<1x8x32xbf16> to vector<8x32xbf16>
      %cst_60 = arith.constant dense<0.000000e+00> : vector<8x32xf32>
      %74 = tpu.matmul %71, %73, %cst_60 {dimension_numbers = #tpu.dot_dimension_numbers<[1], [0], [0], [1], [0, 0, 1, 1], [], []>} : vector<8x8xbf16>, vector<8x32xbf16>, vector<8x32xf32> -> vector<8x32xf32>
      %75 = arith.addf %69, %74 : vector<8x32xf32>
      %76 = arith.truncf %75 : vector<8x32xf32> to vector<8x32xbf16>
      %c0_61 = arith.constant 0 : index
      %c0_62 = arith.constant 0 : index
      %77 = vector.load %arg13[%c0_61, %c0_62] : memref<32x64xbf16, #tpu.memory_space<vmem>>, vector<32x64xbf16>
      %cst_63 = arith.constant dense<0.000000e+00> : vector<8x64xf32>
      %78 = tpu.matmul %76, %77, %cst_63 {dimension_numbers = #tpu.dot_dimension_numbers<[1], [0], [0], [1], [0, 0, 1, 1], [], []>} : vector<8x32xbf16>, vector<32x64xbf16>, vector<8x64xf32> -> vector<8x64xf32>
      %c0_64 = arith.constant 0 : index
      %c0_65 = arith.constant 0 : index
      %79 = vector.load %arg14[%c0_64, %c0_65] : memref<1x64xf32, #tpu.memory_space<vmem>>, vector<1x64xf32>
      %80 = vector.broadcast %79 : vector<1x64xf32> to vector<8x64xf32>
      %81 = arith.addf %78, %80 : vector<8x64xf32>
      %82 = vector.extract_strided_slice %81 {offsets = [0, 0], sizes = [8, 32], strides = [1, 1]} : vector<8x64xf32> to vector<8x32xf32>
      %83 = arith.mulf %48, %82 : vector<8x32xf32>
      %84 = vector.extract_strided_slice %81 {offsets = [0, 32], sizes = [8, 32], strides = [1, 1]} : vector<8x64xf32> to vector<8x32xf32>
      %85 = arith.addf %83, %84 : vector<8x32xf32>
      %86 = arith.truncf %85 : vector<8x32xf32> to vector<8x32xbf16>
      %c0_66 = arith.constant 0 : index
      %c0_67 = arith.constant 0 : index
      %c0_68 = arith.constant 0 : index
      %87 = vector.load %arg15[%c0_66, %c0_67, %c0_68] : memref<1x8x32xbf16, #tpu.memory_space<vmem>>, vector<1x8x32xbf16>
      %88 = vector.shape_cast %87 : vector<1x8x32xbf16> to vector<8x32xbf16>
      %89 = vector.shape_cast %86 : vector<8x32xbf16> to vector<1x8x32xbf16>
      tpu.vector_store %arg15[%c0_66, %c0_67, %c0_68], %89 {strides = array<i32>} : memref<1x8x32xbf16, #tpu.memory_space<vmem>>, vector<1x8x32xbf16>,
    } else {
    }
    return
  }
  func.func @transform_0(%arg0: i32, %arg1: i32, %arg2: i32) -> (i32, i32, i32) {
    %c0_i32 = arith.constant 0 : i32
    %c0_i32_0 = arith.constant 0 : i32
    return %arg0, %arg1, %c0_i32 : i32, i32, i32
  }
  func.func @transform_1(%arg0: i32, %arg1: i32, %arg2: i32) -> (i32, i32) {
    %c0_i32 = arith.constant 0 : i32
    %c0_i32_0 = arith.constant 0 : i32
    %c0_i32_1 = arith.constant 0 : i32
    return %c0_i32, %c0_i32_0 : i32, i32
  }
  func.func @transform_2(%arg0: i32, %arg1: i32, %arg2: i32) -> (i32, i32) {
    %c0_i32 = arith.constant 0 : i32
    %c0_i32_0 = arith.constant 0 : i32
    %c0_i32_1 = arith.constant 0 : i32
    return %c0_i32, %c0_i32_0 : i32, i32
  }
  func.func @transform_3(%arg0: i32, %arg1: i32, %arg2: i32) -> (i32, i32) {
    %c0_i32 = arith.constant 0 : i32
    %c0_i32_0 = arith.constant 0 : i32
    %c0_i32_1 = arith.constant 0 : i32
    return %c0_i32, %c0_i32_0 : i32, i32
  }
  func.func @transform_4(%arg0: i32, %arg1: i32, %arg2: i32) -> (i32, i32) {
    %c0_i32 = arith.constant 0 : i32
    %c0_i32_0 = arith.constant 0 : i32
    %c0_i32_1 = arith.constant 0 : i32
    return %c0_i32, %c0_i32_0 : i32, i32
  }
  func.func @transform_5(%arg0: i32, %arg1: i32, %arg2: i32) -> (i32, i32, i32, i32) {
    %c0_i32 = arith.constant 0 : i32
    %c0_i32_0 = arith.constant 0 : i32
    %c0_i32_1 = arith.constant 0 : i32
    return %arg0, %c0_i32, %arg2, %c0_i32_0 : i32, i32, i32, i32
  }
  func.func @transform_6(%arg0: i32, %arg1: i32, %arg2: i32) -> (i32, i32, i32, i32) {
    %c0_i32 = arith.constant 0 : i32
    %c0_i32_0 = arith.constant 0 : i32
    %c0_i32_1 = arith.constant 0 : i32
    return %arg0, %c0_i32, %arg2, %c0_i32_0 : i32, i32, i32, i32
  }
  func.func @transform_7(%arg0: i32, %arg1: i32, %arg2: i32) -> (i32, i32, i32) {
    %c0_i32 = arith.constant 0 : i32
    %c0_i32_0 = arith.constant 0 : i32
    return %arg0, %c0_i32, %arg2 : i32, i32, i32
  }
  func.func @transform_8(%arg0: i32, %arg1: i32, %arg2: i32) -> (i32, i32, i32) {
    %c0_i32 = arith.constant 0 : i32
    %c0_i32_0 = arith.constant 0 : i32
    %c0_i32_1 = arith.constant 0 : i32
    %c0_i32_2 = arith.constant 0 : i32
    return %c0_i32, %c0_i32_0, %c0_i32_1 : i32, i32, i32
  }
  func.func @transform_9(%arg0: i32, %arg1: i32, %arg2: i32) -> (i32, i32) {
    %c0_i32 = arith.constant 0 : i32
    %c0_i32_0 = arith.constant 0 : i32
    %c0_i32_1 = arith.constant 0 : i32
    return %c0_i32, %c0_i32_0 : i32, i32
  }
  func.func @transform_10(%arg0: i32, %arg1: i32, %arg2: i32) -> (i32, i32) {
    %c0_i32 = arith.constant 0 : i32
    %c0_i32_0 = arith.constant 0 : i32
    %c0_i32_1 = arith.constant 0 : i32
    return %c0_i32, %c0_i32_0 : i32, i32
  }
  func.func @transform_11(%arg0: i32, %arg1: i32, %arg2: i32) -> (i32, i32) {
    %c0_i32 = arith.constant 0 : i32
    %c0_i32_0 = arith.constant 0 : i32
    %c0_i32_1 = arith.constant 0 : i32
    return %c0_i32, %c0_i32_0 : i32, i32
  }
  func.func @transform_12(%arg0: i32, %arg1: i32, %arg2: i32) -> (i32, i32, i32) {
    %c0_i32 = arith.constant 0 : i32
    %c0_i32_0 = arith.constant 0 : i32
    return %arg0, %arg1, %c0_i32 : i32, i32, i32
  }
}

module attributes {stable_mosaic.version = 11 : i64} {
  func.func @_ffn_kernel(%arg0: i32, %arg1: memref<16x32xbf16, #tpu.memory_space<vmem>>, %arg2: memref<1x32xf32, #tpu.memory_space<vmem>>, %arg3: memref<1x32xf32, #tpu.memory_space<vmem>>, %arg4: memref<32x64xbf16, #tpu.memory_space<vmem>>, %arg5: memref<1x64xf32, #tpu.memory_space<vmem>>, %arg6: memref<64x32xbf16, #tpu.memory_space<vmem>>, %arg7: memref<1x32xf32, #tpu.memory_space<vmem>>, %arg8: memref<1x32xf32, #tpu.memory_space<vmem>>, %arg9: memref<1x32xf32, #tpu.memory_space<vmem>>, %arg10: memref<16x32xf32, #tpu.memory_space<vmem>>) attributes {dimension_semantics = [#tpu.dimension_semantics<parallel>], iteration_bounds = array<i64: 1>, scalar_prefetch = 0 : i64, scratch_operands = 0 : i64, tpu.core_type = #tpu.core_type<tc>, window_params = [{transform_indices = @transform_0, window_bounds = array<i64: 16, 32>}, {pipeline_mode = #tpu.pipeline_mode<synchronous>, transform_indices = @transform_1, window_bounds = array<i64: 1, 32>}, {pipeline_mode = #tpu.pipeline_mode<synchronous>, transform_indices = @transform_2, window_bounds = array<i64: 1, 32>}, {pipeline_mode = #tpu.pipeline_mode<synchronous>, transform_indices = @transform_3, window_bounds = array<i64: 32, 64>}, {pipeline_mode = #tpu.pipeline_mode<synchronous>, transform_indices = @transform_4, window_bounds = array<i64: 1, 64>}, {pipeline_mode = #tpu.pipeline_mode<synchronous>, transform_indices = @transform_5, window_bounds = array<i64: 64, 32>}, {pipeline_mode = #tpu.pipeline_mode<synchronous>, transform_indices = @transform_6, window_bounds = array<i64: 1, 32>}, {pipeline_mode = #tpu.pipeline_mode<synchronous>, transform_indices = @transform_7, window_bounds = array<i64: 1, 32>}, {pipeline_mode = #tpu.pipeline_mode<synchronous>, transform_indices = @transform_8, window_bounds = array<i64: 1, 32>}, {transform_indices = @transform_9, window_bounds = array<i64: 16, 32>}]} {
    %c0 = arith.constant 0 : index
    %c0_0 = arith.constant 0 : index
    %0 = vector.load %arg1[%c0, %c0_0] : memref<16x32xbf16, #tpu.memory_space<vmem>>, vector<16x32xbf16>
    %1 = arith.extf %0 : vector<16x32xbf16> to vector<16x32xf32>
    %c0_1 = arith.constant 0 : index
    %c0_2 = arith.constant 0 : index
    %2 = vector.load %arg2[%c0_1, %c0_2] : memref<1x32xf32, #tpu.memory_space<vmem>>, vector<1x32xf32>
    %c0_3 = arith.constant 0 : index
    %c0_4 = arith.constant 0 : index
    %3 = vector.load %arg3[%c0_3, %c0_4] : memref<1x32xf32, #tpu.memory_space<vmem>>, vector<1x32xf32>
    %cst = arith.constant dense<0.000000e+00> : vector<16xf32>
    %4 = vector.multi_reduction <add>, %1, %cst [1] : vector<16x32xf32> to vector<16xf32>
    %5 = vector.shape_cast %4 : vector<16xf32> to vector<16x1xf32>
    %cst_5 = arith.constant 3.200000e+01 : f32
    %6 = vector.broadcast %cst_5 : f32 to vector<16x1xf32>
    %7 = arith.divf %5, %6 : vector<16x1xf32>
    %8 = vector.broadcast %7 : vector<16x1xf32> to vector<16x32xf32>
    %9 = arith.subf %1, %8 : vector<16x32xf32>
    %10 = arith.mulf %9, %9 : vector<16x32xf32>
    %cst_6 = arith.constant dense<0.000000e+00> : vector<16xf32>
    %11 = vector.multi_reduction <add>, %10, %cst_6 [1] : vector<16x32xf32> to vector<16xf32>
    %12 = vector.shape_cast %11 : vector<16xf32> to vector<16x1xf32>
    %cst_7 = arith.constant 3.200000e+01 : f32
    %13 = vector.broadcast %cst_7 : f32 to vector<16x1xf32>
    %14 = arith.divf %12, %13 : vector<16x1xf32>
    %cst_8 = arith.constant 9.99999974E-6 : f32
    %15 = vector.broadcast %cst_8 : f32 to vector<16x1xf32>
    %16 = arith.addf %14, %15 : vector<16x1xf32>
    %17 = math.rsqrt %16 : vector<16x1xf32>
    %18 = vector.broadcast %17 : vector<16x1xf32> to vector<16x32xf32>
    %19 = arith.mulf %9, %18 : vector<16x32xf32>
    %20 = vector.broadcast %2 : vector<1x32xf32> to vector<16x32xf32>
    %21 = arith.mulf %19, %20 : vector<16x32xf32>
    %22 = vector.broadcast %3 : vector<1x32xf32> to vector<16x32xf32>
    %23 = arith.addf %21, %22 : vector<16x32xf32>
    %24 = arith.truncf %23 : vector<16x32xf32> to vector<16x32xbf16>
    %c0_9 = arith.constant 0 : index
    %c0_10 = arith.constant 0 : index
    %25 = vector.load %arg4[%c0_9, %c0_10] : memref<32x64xbf16, #tpu.memory_space<vmem>>, vector<32x64xbf16>
    %cst_11 = arith.constant dense<0.000000e+00> : vector<16x64xf32>
    %26 = tpu.matmul %24, %25, %cst_11 {dimension_numbers = #tpu.dot_dimension_numbers<[1], [0], [0], [1], [0, 0, 1, 1], [], []>} : vector<16x32xbf16>, vector<32x64xbf16>, vector<16x64xf32> -> vector<16x64xf32>
    %c0_12 = arith.constant 0 : index
    %c0_13 = arith.constant 0 : index
    %27 = vector.load %arg5[%c0_12, %c0_13] : memref<1x64xf32, #tpu.memory_space<vmem>>, vector<1x64xf32>
    %28 = vector.broadcast %27 : vector<1x64xf32> to vector<16x64xf32>
    %29 = arith.addf %26, %28 : vector<16x64xf32>
    %30 = arith.negf %29 : vector<16x64xf32>
    %31 = math.exp %30 : vector<16x64xf32>
    %cst_14 = arith.constant 1.000000e+00 : f32
    %32 = vector.broadcast %cst_14 : f32 to vector<16x64xf32>
    %33 = arith.addf %32, %31 : vector<16x64xf32>
    %34 = arith.divf %32, %33 : vector<16x64xf32>
    %35 = arith.mulf %29, %34 : vector<16x64xf32>
    %36 = arith.truncf %35 : vector<16x64xf32> to vector<16x64xbf16>
    %c0_15 = arith.constant 0 : index
    %c0_16 = arith.constant 0 : index
    %37 = vector.load %arg6[%c0_15, %c0_16] : memref<64x32xbf16, #tpu.memory_space<vmem>>, vector<64x32xbf16>
    %cst_17 = arith.constant dense<0.000000e+00> : vector<16x32xf32>
    %38 = tpu.matmul %36, %37, %cst_17 {dimension_numbers = #tpu.dot_dimension_numbers<[1], [0], [0], [1], [0, 0, 1, 1], [], []>} : vector<16x64xbf16>, vector<64x32xbf16>, vector<16x32xf32> -> vector<16x32xf32>
    %c0_18 = arith.constant 0 : index
    %c0_19 = arith.constant 0 : index
    %39 = vector.load %arg7[%c0_18, %c0_19] : memref<1x32xf32, #tpu.memory_space<vmem>>, vector<1x32xf32>
    %40 = vector.broadcast %39 : vector<1x32xf32> to vector<16x32xf32>
    %41 = arith.addf %38, %40 : vector<16x32xf32>
    %cst_20 = arith.constant 5.000000e-01 : f32
    %42 = vector.broadcast %cst_20 : f32 to vector<16x32xf32>
    %43 = arith.mulf %42, %41 : vector<16x32xf32>
    %44 = arith.addf %1, %43 : vector<16x32xf32>
    %c0_21 = arith.constant 0 : index
    %c0_22 = arith.constant 0 : index
    %45 = vector.load %arg8[%c0_21, %c0_22] : memref<1x32xf32, #tpu.memory_space<vmem>>, vector<1x32xf32>
    %c0_23 = arith.constant 0 : index
    %c0_24 = arith.constant 0 : index
    %46 = vector.load %arg9[%c0_23, %c0_24] : memref<1x32xf32, #tpu.memory_space<vmem>>, vector<1x32xf32>
    %cst_25 = arith.constant dense<0.000000e+00> : vector<16xf32>
    %47 = vector.multi_reduction <add>, %44, %cst_25 [1] : vector<16x32xf32> to vector<16xf32>
    %48 = vector.shape_cast %47 : vector<16xf32> to vector<16x1xf32>
    %cst_26 = arith.constant 3.200000e+01 : f32
    %49 = vector.broadcast %cst_26 : f32 to vector<16x1xf32>
    %50 = arith.divf %48, %49 : vector<16x1xf32>
    %51 = vector.broadcast %50 : vector<16x1xf32> to vector<16x32xf32>
    %52 = arith.subf %44, %51 : vector<16x32xf32>
    %53 = arith.mulf %52, %52 : vector<16x32xf32>
    %cst_27 = arith.constant dense<0.000000e+00> : vector<16xf32>
    %54 = vector.multi_reduction <add>, %53, %cst_27 [1] : vector<16x32xf32> to vector<16xf32>
    %55 = vector.shape_cast %54 : vector<16xf32> to vector<16x1xf32>
    %cst_28 = arith.constant 3.200000e+01 : f32
    %56 = vector.broadcast %cst_28 : f32 to vector<16x1xf32>
    %57 = arith.divf %55, %56 : vector<16x1xf32>
    %cst_29 = arith.constant 9.99999974E-6 : f32
    %58 = vector.broadcast %cst_29 : f32 to vector<16x1xf32>
    %59 = arith.addf %57, %58 : vector<16x1xf32>
    %60 = math.rsqrt %59 : vector<16x1xf32>
    %61 = vector.broadcast %60 : vector<16x1xf32> to vector<16x32xf32>
    %62 = arith.mulf %52, %61 : vector<16x32xf32>
    %63 = vector.broadcast %45 : vector<1x32xf32> to vector<16x32xf32>
    %64 = arith.mulf %62, %63 : vector<16x32xf32>
    %65 = vector.broadcast %46 : vector<1x32xf32> to vector<16x32xf32>
    %66 = arith.addf %64, %65 : vector<16x32xf32>
    %c0_30 = arith.constant 0 : index
    %c0_31 = arith.constant 0 : index
    %67 = vector.load %arg10[%c0_30, %c0_31] : memref<16x32xf32, #tpu.memory_space<vmem>>, vector<16x32xf32>
    tpu.vector_store %arg10[%c0_30, %c0_31], %66 {strides = array<i32>} : memref<16x32xf32, #tpu.memory_space<vmem>>, vector<16x32xf32>,
    return
  }
  func.func @transform_0(%arg0: i32) -> (i32, i32) {
    %c0_i32 = arith.constant 0 : i32
    %c0_i32_0 = arith.constant 0 : i32
    return %arg0, %c0_i32 : i32, i32
  }
  func.func @transform_1(%arg0: i32) -> (i32, i32) {
    %c0_i32 = arith.constant 0 : i32
    %c0_i32_0 = arith.constant 0 : i32
    %c0_i32_1 = arith.constant 0 : i32
    return %c0_i32, %c0_i32_0 : i32, i32
  }
  func.func @transform_2(%arg0: i32) -> (i32, i32) {
    %c0_i32 = arith.constant 0 : i32
    %c0_i32_0 = arith.constant 0 : i32
    %c0_i32_1 = arith.constant 0 : i32
    return %c0_i32, %c0_i32_0 : i32, i32
  }
  func.func @transform_3(%arg0: i32) -> (i32, i32) {
    %c0_i32 = arith.constant 0 : i32
    %c0_i32_0 = arith.constant 0 : i32
    %c0_i32_1 = arith.constant 0 : i32
    return %c0_i32, %c0_i32_0 : i32, i32
  }
  func.func @transform_4(%arg0: i32) -> (i32, i32) {
    %c0_i32 = arith.constant 0 : i32
    %c0_i32_0 = arith.constant 0 : i32
    %c0_i32_1 = arith.constant 0 : i32
    return %c0_i32, %c0_i32_0 : i32, i32
  }
  func.func @transform_5(%arg0: i32) -> (i32, i32) {
    %c0_i32 = arith.constant 0 : i32
    %c0_i32_0 = arith.constant 0 : i32
    %c0_i32_1 = arith.constant 0 : i32
    return %c0_i32, %c0_i32_0 : i32, i32
  }
  func.func @transform_6(%arg0: i32) -> (i32, i32) {
    %c0_i32 = arith.constant 0 : i32
    %c0_i32_0 = arith.constant 0 : i32
    %c0_i32_1 = arith.constant 0 : i32
    return %c0_i32, %c0_i32_0 : i32, i32
  }
  func.func @transform_7(%arg0: i32) -> (i32, i32) {
    %c0_i32 = arith.constant 0 : i32
    %c0_i32_0 = arith.constant 0 : i32
    %c0_i32_1 = arith.constant 0 : i32
    return %c0_i32, %c0_i32_0 : i32, i32
  }
  func.func @transform_8(%arg0: i32) -> (i32, i32) {
    %c0_i32 = arith.constant 0 : i32
    %c0_i32_0 = arith.constant 0 : i32
    %c0_i32_1 = arith.constant 0 : i32
    return %c0_i32, %c0_i32_0 : i32, i32
  }
  func.func @transform_9(%arg0: i32) -> (i32, i32) {
    %c0_i32 = arith.constant 0 : i32
    %c0_i32_0 = arith.constant 0 : i32
    return %arg0, %c0_i32 : i32, i32
  }
}

</mosaic_0001>

<bundles_post_ra>
// kernel: cond_conformer_layer.8
= control target key start
LH: loop header
LB: loop body
LE: loop exit
PB: predicated region body
PF: predicated region fallthrough
CT: control target
= control target key end

     0   :  { %12 = vsyncpa [#allocation3], 0  ;;  %s930_s0 = inlined_call_operand.vmem [shape: bf16[2,8,32], index: 0, kind: input, shape index: {}]   ;;  %s931_s1 = inlined_call_operand.vmem [shape: f32[1,32], index: 1, kind: input, shape index: {}]   ;;  %s932_s2 = inlined_call_operand.hbm [shape: f32[1,32], index: 2, kind: input, shape index: {}]   ;;  %s933_s3 = inlined_call_operand.vmem [shape: bf16[32,64], index: 3, kind: input, shape index: {}]   ;;  %s934_s4 = inlined_call_operand.hbm [shape: f32[1,64], index: 4, kind: input, shape index: {}]   ;;  %s935_s5 = inlined_call_operand.vmem [shape: bf16[2,4,8,8], index: 5, kind: output, shape index: {0}]   ;;  %s936_s6 = inlined_call_operand.vmem [shape: bf16[2,4,8,8], index: 6, kind: output, shape index: {1}]  }
   0x1   :  { %13 = vsyncpa [#allocation5], 0  ;;  %s831_s21 = smov 0   ;;  %s833_s22 = smov 0  }
   0x2   :  { %s835_s23 = smov 0  }
   0x3 LB: > { %s599_s24 = sadd.s32 4294967295, %s784_s23   ;;  %s31_s25 = sadd.s32 1, %s780_s22  ;;  %s784_s23 = sphi %s835_s23, %s19_s23   ;;  %s780_s22 = sphi %s833_s22, %s940_s22   ;;  %s776_s21 = sphi %s831_s21, %s939_s21  }
   0x4   : > { %p33_p0 = scmp.ge.s32.totalorder %s31_s25, 2  ;;  %p601_p1 = scmp.ge.s32.totalorder %s784_s23, 1 }
   0x5   : > { %p204_p2 = scmp.lt.s32.totalorder %s784_s23, 3  ;;  %p856_p4 = scmp.eq.s32.totalorder %s599_s24, 0 }
   0x6   : > { %s942_s25 = smov (%p33_p0, %s31_s25), 0  ;;  %s219_s30 = sshll.u32 %s932_s2, 4  ;;  %s220_s30 = int_to_ptr.hbm [resolvable:$true] %s219_s30 }
   0x7   : > { %p852_p3 = pnand %p601_p1, %p204_p2  ;;  %s786_s7 = smov [#allocation2]  }
   0x8   : > { %s221_s8 = sshll.u32 %s786_s7, 4  ;;  %s234_s11 = sshll.u32 %s934_s4, 4  ;;  %s222_s8 = int_to_ptr.vmem [resolvable:$true] %s221_s8  ;;  %s235_s11 = int_to_ptr.hbm [resolvable:$true] %s234_s11 }
   0x9   : > { %p642_p5 = pneg %p852_p3  ;;  %s787_s12 = smov [#allocation4]  }
   0xa   : > { %s236_s13 = sshll.u32 %s787_s12, 4  ;;  %259 = sbr.rel (%p852_p3) target bundleno = 559 (0x22f), region = 40  ;;  %s237_s13 = int_to_ptr.vmem [resolvable:$true] %s236_s13 }
   0xb   : > { %p643_p6 = pnand %p856_p4, %p642_p5 }
   0xd   : > { %645 = dma.hbm_to_vmem [thread:$0]  (!%p643_p6), %s220_s30, 16, %s222_s8, [#allocation3]  }
   0xe   : > { %648 = dma.hbm_to_vmem [thread:$0]  (!%p643_p6), %s235_s11, 16, %s237_s13, [#allocation5]  }
   0xf   : > { %767 = dma.done.wait (%p856_p4), [#allocation3], 16  }
  0x10   : > { %769 = vsyncadd (%p856_p4), [#allocation3], 4294967280 }
  0x11   : > { %771 = dma.done.wait (%p856_p4), [#allocation5], 16  }
  0x12   : > { %773 = vsyncadd (%p856_p4), [#allocation5], 4294967280  ;;  %p308_p7 = scmp.lt.s32.totalorder %s776_s21, 1  ;;  %vm336_vm0 = vcmask 261120   ;;  %v788_v3 = vmov 32.0   ;;  %v633_v15 = vld [vmem:[%s933_s3 + $0x8] sm:$0xff] }
  0x13   : > { %690 = vrcp.f32 %v788_v3  ;;  %404 = vmatpush.bf16.msra.mxu0 %v633_v15  ;;  %v632_v16 = vld [vmem:[%s933_s3] sm:$0xff]  ;;  %vm412_vm5 = vcmask 60416   ;;  %s789_s8 = smov 80   ;;  %s790_s9 = smov 88  }
  0x14   : > { %s944_s21 = smov (!%p308_p7, %s776_s21), 1  ;;  %v687_v26 = vld [vmem:[%s931_s1] ss:$0 sm:$0xff]  ;;  %v689_v33 = vld [vmem:[#allocation4] ss:$0 sm:$0xff]  ;;  %s791_s10 = smov 96  }
  0x15   : > { %s608_s14 = sshll.u32 %s944_s21, 2  ;;  %v688_v29 = vld [vmem:[#allocation2] ss:$0 sm:$0xff]  ;;  %s630_s28 = sshll.u32 %s944_s21, 4 }
  0x16   : > { %s314_s17 = scalar_lea.vmem %s930_s0, %s608_s14  ;;  %s904_s7 = scalar_lea.vmem %s935_s5, %s630_s28 }
  0x17   : > { %v332_v0 = vld [vmem:[%s314_s17] sm:$0xf]  ;;  %405 = vmatpush.bf16.msra.mxu0 %v632_v16  ;;  %s792_s21 = smov 112   ;;  %s793_s11 = smov 120  }
  0x18   : > { %v333_v1 = vunpack.c.l.bf16 %v332_v0  ;;  %s794_s12 = smov 72   ;;  %s795_s13 = smov 104  }
  0x19   : > { %v691_v4 = vpop.eup %690  ;;  %s330_s16 = scalar_lea.vmem %s936_s6, %s630_s28 }
  0x1a   : > { %v337_v2 = vsel %vm336_vm0, %v333_v1, 0.0  ;;  %v341_v5 = vmul.f32 32.0, %v691_v4  ;;  %vm345_vm1 = vweird.f32 %v691_v4 }
  0x1b   : > { %338 = vadd.xlane.f32.xlu0 %v337_v2 }
  0x1c   : > { %v342_v6 = vsub.f32 1.0, %v341_v5 }
  0x1e   : > { %v343_v7 = vmul.f32 %v691_v4, %v342_v6 }
  0x20   : > { %v344_v8 = vadd.f32 %v691_v4, %v343_v7 }
  0x22   : > { %v346_v9 = vsel %vm345_vm1, %v691_v4, %v344_v8 }
  0x8e   : > { %v339_v10 = vpop.xlane.xlu0 %338 }
  0x8f   : > { %v347_v11 = vmul.f32 %v346_v9, %v339_v10 }
  0x91   : > { %v348_v12 = vsub.f32 %v333_v1, %v347_v11 }
  0x93   : > { %v349_v13 = vmul.f32 %v348_v12, %v348_v12 }
  0x95   : > { %v350_v14 = vsel %vm336_vm0, %v349_v13, 0.0 }
  0x96   : > { %351 = vadd.xlane.f32.xlu0 %v350_v14 }
 0x109   : > { %v352_v17 = vpop.xlane.xlu0 %351 }
 0x10a   : > { %v353_v18 = vmul.f32 %v352_v17, %v346_v9 }
 0x10c   : > { %v354_v19 = vadd.f32 1e-05, %v353_v18 }
 0x10e   : > { %692 = vrsqrt.f32 %v354_v19  ;;  %vm361_vm3 = vweird.f32 %v354_v19 }
 0x114   : > { %v693_v20 = vpop.eup %692 }
 0x115   : > { %v356_v21 = vmul.f32 %v693_v20, %v354_v19  ;;  %vm362_vm2 = vweird.f32 %v693_v20 }
 0x116   : > { %vm363_vm4 = vmor %vm361_vm3, %vm362_vm2 }
 0x117   : > { %v357_v22 = vmul.f32 %v693_v20, %v356_v21 }
 0x119   : > { %v358_v23 = vmul.f32 0.5, %v357_v22 }
 0x11b   : > { %v359_v24 = vsub.f32 1.5, %v358_v23 }
 0x11d   : > { %v360_v25 = vmul.f32 %v693_v20, %v359_v24 }
 0x11f   : > { %v364_v27 = vsel %vm363_vm4, %v693_v20, %v360_v25 }
 0x120   : > { %v365_v28 = vmul.f32 %v364_v27, %v348_v12 }
 0x122   : > { %v369_v30 = vmul.f32 %v687_v26, %v365_v28 }
 0x124   : > { %v373_v31 = vadd.f32 %v688_v29, %v369_v30 }
 0x126   : > { %v374_v32 = vpack.c.bf16 %v373_v31, %v373_v31 }
 0x128   : > { %621 = vmatmul.msk.bf16.vlgmr.msra.gmra.mxu0 %vm336_vm0, %v374_v32 }
 0x1a5   : > { %v407_v34 = vpop.f32.mrf.mxu0 }
 0x1a6   : > { %v408_v35 = vadd.f32 %v689_v33, %v407_v34 }
 0x1a8   : > { %v411_v36 = vpack.c.bf16 %v408_v35, %v408_v35 }
 0x1aa   : > { %434 = vrot.lane.b32.xlu0 %v411_v36, %s789_s8  ;;  %424 = vrot.lane.b32.xlu2 %v411_v36, %s790_s9  ;;  %413 = vst.msk [vmem:[%s904_s7] sm:$0xf] %vm412_vm5, %v411_v36 }
 0x1ab   : > { %415 = vrot.lane.b32.xlu1 %v411_v36, %s791_s10 }
 0x1ad   : > { %v409_v37 = vpop.f32.mrf.mxu0 }
 0x1b2   : > { %429 = vrot.lane.b32.xlu2 %v411_v36, %s792_s21 }
 0x1b3   : > { %419 = vrot.lane.b32.xlu1 %v411_v36, %s793_s11 }
 0x1ba   : > { %444 = vrot.lane.b32.xlu2 %v411_v36, %s794_s12 }
 0x1bb   : > { %439 = vrot.lane.b32.xlu1 %v411_v36, %s795_s13 }
 0x204   : > { %v425_v38 = vpop.permute.xlu2 %424 }
 0x205   : > { %623 = vst.msk [vmem:[%s330_s16 + $0x4] sm:$0xf] %vm412_vm5, %v425_v38 }
 0x20c   : > { %v430_v39 = vpop.permute.xlu2 %429 }
 0x20d   : > { %624 = vst.msk [vmem:[%s904_s7 + $0x8] sm:$0xf] %vm412_vm5, %v430_v39 }
 0x214   : > { %v445_v40 = vpop.permute.xlu2 %444 }
 0x215   : > { %627 = vst.msk [vmem:[%s330_s16 + $0xc] sm:$0xf] %vm412_vm5, %v445_v40 }
 0x21c   : > { %v435_v41 = vpop.permute.xlu0 %434 }
 0x21d   : > { %625 = vst.msk [vmem:[%s330_s16 + $0x8] sm:$0xf] %vm412_vm5, %v435_v41  ;;  %v416_v42 = vpop.permute.xlu1 %415 }
 0x21e   : > { %418 = vst.msk [vmem:[%s330_s16] sm:$0xf] %vm412_vm5, %v416_v42 }
 0x225   : > { %v420_v43 = vpop.permute.xlu1 %419 }
 0x226   : > { %622 = vst.msk [vmem:[%s904_s7 + $0x4] sm:$0xf] %vm412_vm5, %v420_v43 }
 0x22d   : > { %v440_v44 = vpop.permute.xlu1 %439 }
 0x22e   : > { %626 = vst.msk [vmem:[%s904_s7 + $0xc] sm:$0xf] %vm412_vm5, %v440_v44 }
 0x22f PF: > { %s19_s23 = sadd.s32 1, %s784_s23   ;;  %s939_s21 = smov %s780_s22 }
 0x230   : > { %p16_p8 = scmp.ge.s32.totalorder %s19_s23, 4   ;;  %s940_s22 = smov %s942_s25 }
 0x232   :  { %18 = sbr.rel (!%p16_p8) target bundleno = 3 (0x3), region = 97 }
 0x237   :  { %498 = vsyncpa [#allocation3], 1 }
 0x238   :  { %500 = vsyncpa [#allocation3 + $0x1], 1 }
 0x239   :  { %501 = vsyncpa [#allocation5], 1 }

// kernel: cond_conformer_layer.7
= control target key start
LH: loop header
LB: loop body
LE: loop exit
PB: predicated region body
PF: predicated region fallthrough
CT: control target
= control target key end

     0   :  { %vm37_vm0 = vcmask 261120   ;;  %v298_v4 = vmov 32.0   ;;  %s406_s0 = inlined_call_operand.vmem [shape: f32[16,32], index: 0, kind: input, shape index: {}]   ;;  %s407_s7 = inlined_call_operand.vmem [shape: f32[1,32], index: 7, kind: input, shape index: {}]   ;;  %s408_s8 = inlined_call_operand.vmem [shape: f32[1,32], index: 8, kind: input, shape index: {}]   ;;  %s409_s1 = inlined_call_operand.vmem [shape: f32[1,32], index: 1, kind: input, shape index: {}]   ;;  %s410_s2 = inlined_call_operand.vmem [shape: f32[1,32], index: 2, kind: input, shape index: {}]   ;;  %s411_s4 = inlined_call_operand.vmem [shape: f32[1,64], index: 4, kind: input, shape index: {}]   ;;  %s412_s3 = inlined_call_operand.vmem [shape: bf16[32,64], index: 3, kind: input, shape index: {}]   ;;  %s413_s6 = inlined_call_operand.vmem [shape: f32[1,32], index: 6, kind: input, shape index: {}]   ;;  %s414_s5 = inlined_call_operand.vmem [shape: bf16[64,32], index: 5, kind: input, shape index: {}]   ;;  %s415_s9 = inlined_call_operand.vmem [shape: bf16[16,32], index: 9, kind: output, shape index: {}]  }
   0x1   :  { %v352_v0 = vld [vmem:[%s406_s0] sm:$0xff]  ;;  %v359_v2 = vld [vmem:[%s406_s0 + $0x8] sm:$0xff]  ;;  %284 = vrcp.f32 %v298_v4  ;;  %v278_v52 = vld [vmem:[%s414_s5 + $0x18] sm:$0xff] }
   0x2   :  { %v38_v1 = vsel %vm37_vm0, %v352_v0, 0.0  ;;  %v41_v3 = vsel %vm37_vm0, %v359_v2, 0.0  ;;  %v274_v21 = vld [vmem:[%s412_s3 + $0x8] sm:$0xff]  ;;  %v273_v23 = vld [vmem:[%s412_s3] sm:$0xff]  ;;  %222 = vmatpush.bf16.msra.mxu1 %v278_v52  ;;  %v277_v54 = vld [vmem:[%s414_s5 + $0x10] sm:$0xff] }
   0x3   :  { %39 = vadd.xlane.f32.xlu0 %v38_v1  ;;  %129 = vmatpush.bf16.msra.mxu0 %v274_v21  ;;  %v280_v42 = vld [vmem:[%s409_s1] ss:$0 sm:$0xff]  ;;  %v276_v57 = vld [vmem:[%s414_s5 + $0x8] sm:$0xff] }
   0x4   :  { %v281_v47 = vld [vmem:[%s410_s2] ss:$0 sm:$0xff] }
   0x5   :  { %v282_v53 = vld [vmem:[%s411_s4] ss:$0 sm:$0xff] }
   0x6   :  { %223 = vmatpush.bf16.msra.mxu1 %v277_v54  ;;  %v275_v59 = vld [vmem:[%s414_s5] sm:$0xff] }
   0x7   :  { %v285_v5 = vpop.eup %284  ;;  %130 = vmatpush.bf16.msra.mxu0 %v273_v23 }
   0x8   :  { %v45_v6 = vmul.f32 32.0, %v285_v5  ;;  %vm49_vm1 = vweird.f32 %v285_v5 }
   0xa   :  { %v46_v7 = vsub.f32 1.0, %v45_v6  ;;  %224 = vmatpush.bf16.msra.mxu1 %v276_v57 }
   0xb   :  { %42 = vadd.xlane.f32.xlu0 %v41_v3 }
   0xc   :  { %v47_v8 = vmul.f32 %v285_v5, %v46_v7 }
   0xe   :  { %v48_v9 = vadd.f32 %v285_v5, %v47_v8  ;;  %225 = vmatpush.bf16.msra.mxu1 %v275_v59 }
  0x10   :  { %v50_v10 = vsel %vm49_vm1, %v285_v5, %v48_v9  ;;  %vm238_vm1 = vcmask 257024  }
  0x76   :  { %v40_v11 = vpop.xlane.xlu0 %39 }
  0x77   :  { %v51_v12 = vmul.f32 %v50_v10, %v40_v11 }
  0x79   :  { %v53_v13 = vsub.f32 %v352_v0, %v51_v12 }
  0x7b   :  { %v55_v14 = vmul.f32 %v53_v13, %v53_v13 }
  0x7d   :  { %v57_v15 = vsel %vm37_vm0, %v55_v14, 0.0 }
  0x7e   :  { %58 = vadd.xlane.f32.xlu1 %v57_v15  ;;  %v43_v16 = vpop.xlane.xlu0 %42 }
  0x7f   :  { %v52_v17 = vmul.f32 %v50_v10, %v43_v16 }
  0x81   :  { %v54_v18 = vsub.f32 %v359_v2, %v52_v17 }
  0x83   :  { %v56_v19 = vmul.f32 %v54_v18, %v54_v18 }
  0x85   :  { %v60_v20 = vsel %vm37_vm0, %v56_v19, 0.0 }
  0x86   :  { %61 = vadd.xlane.f32.xlu1 %v60_v20 }
  0xf1   :  { %v59_v22 = vpop.xlane.xlu1 %58 }
  0xf2   :  { %v63_v24 = vmul.f32 %v59_v22, %v50_v10 }
  0xf4   :  { %v65_v25 = vadd.f32 1e-05, %v63_v24 }
  0xf6   :  { %286 = vrsqrt.f32 %v65_v25  ;;  %vm73_vm3 = vweird.f32 %v65_v25 }
  0xf9   :  { %v62_v26 = vpop.xlane.xlu1 %61 }
  0xfa   :  { %v64_v27 = vmul.f32 %v62_v26, %v50_v10 }
  0xfc   :  { %v287_v28 = vpop.eup %286  ;;  %v66_v29 = vadd.f32 1e-05, %v64_v27 }
  0xfd   :  { %v68_v30 = vmul.f32 %v287_v28, %v65_v25  ;;  %vm74_vm2 = vweird.f32 %v287_v28 }
  0xfe   :  { %288 = vrsqrt.f32 %v66_v29  ;;  %vm75_vm4 = vmor %vm73_vm3, %vm74_vm2  ;;  %vm83_vm6 = vweird.f32 %v66_v29 }
  0xff   :  { %v69_v31 = vmul.f32 %v287_v28, %v68_v30 }
 0x101   :  { %v70_v32 = vmul.f32 0.5, %v69_v31 }
 0x103   :  { %v71_v33 = vsub.f32 1.5, %v70_v32 }
 0x104   :  { %v289_v34 = vpop.eup %288 }
 0x105   :  { %v72_v35 = vmul.f32 %v287_v28, %v71_v33  ;;  %v78_v36 = vmul.f32 %v289_v34, %v66_v29  ;;  %vm84_vm5 = vweird.f32 %v289_v34 }
 0x106   :  { %vm85_vm7 = vmor %vm83_vm6, %vm84_vm5 }
 0x107   :  { %v79_v37 = vmul.f32 %v289_v34, %v78_v36  ;;  %v76_v38 = vsel %vm75_vm4, %v287_v28, %v72_v35  ;;  %v283_v28 = vld [vmem:[%s413_s6] ss:$0 sm:$0xff] }
 0x108   :  { %v87_v41 = vmul.f32 %v76_v38, %v53_v13 }
 0x109   :  { %v80_v39 = vmul.f32 0.5, %v79_v37 }
 0x10a   :  { %v92_v46 = vmul.f32 %v280_v42, %v87_v41 }
 0x10b   :  { %v81_v40 = vsub.f32 1.5, %v80_v39 }
 0x10c   :  { %v97_v49 = vadd.f32 %v281_v47, %v92_v46 }
 0x10d   :  { %v82_v43 = vmul.f32 %v289_v34, %v81_v40 }
 0x10f   :  { %v86_v44 = vsel %vm85_vm7, %v289_v34, %v82_v43 }
 0x110   :  { %v88_v45 = vmul.f32 %v86_v44, %v54_v18 }
 0x112   :  { %v93_v48 = vmul.f32 %v280_v42, %v88_v45 }
 0x114   :  { %v98_v50 = vadd.f32 %v281_v47, %v93_v48 }
 0x116   :  { %v99_v51 = vpack.c.bf16 %v98_v50, %v97_v49 }
 0x118   :  { %253 = vmatmul.msk.bf16.vlgmr.msra.gmra.mxu0 %vm37_vm0, %v99_v51  ;;  %vm214_vm0 = vcmask 523264  }
 0x195   :  { %v132_v55 = vpop.f32.mrf.mxu0 }
 0x196   :  { %v133_v56 = vadd.f32 %v282_v53, %v132_v55 }
 0x198   :  { %v254_v58 = vmul.f32 -1.442695, %v133_v56 }
 0x19a   :  { %290 = vpow2.f32 %v254_v58 }
 0x19d   :  { %v134_v60 = vpop.f32.mrf.mxu0 }
 0x19e   :  { %v135_v61 = vadd.f32 %v282_v53, %v134_v60 }
 0x1a0   :  { %v291_v62 = vpop.eup %290  ;;  %v255_v63 = vmul.f32 -1.442695, %v135_v61 }
 0x1a1   :  { %v143_v1 = vadd.f32 1.0, %v291_v62 }
 0x1a2   :  { %292 = vpow2.f32 %v255_v63 }
 0x1a3   :  { %294 = vrcp.f32 %v143_v1  ;;  %v156_v12 = vand.u32 2147483648, %v143_v1  ;;  %vm150_vm9 = vweird.f32 %v143_v1  ;;  %v154_v13 = vand.u32 2147483647, %v143_v1 }
 0x1a5   :  { %v157_v19 = vor.u32 1.1754944e-38, %v156_v12  ;;  %vm155_vm12 = vcmp.eq.f32.partialorder %v154_v13, 8.507059e+37 }
 0x1a8   :  { %v293_v3 = vpop.eup %292 }
 0x1a9   :  { %v295_v4 = vpop.eup %294  ;;  %v144_v5 = vadd.f32 1.0, %v293_v3 }
 0x1aa   :  { %v146_v6 = vmul.f32 %v295_v4, %v143_v1  ;;  %vm151_vm8 = vweird.f32 %v295_v4 }
 0x1ab   :  { %296 = vrcp.f32 %v144_v5  ;;  %vm152_vm10 = vmor %vm150_vm9, %vm151_vm8  ;;  %v171_v15 = vand.u32 2147483648, %v144_v5  ;;  %v169_v18 = vand.u32 2147483647, %v144_v5  ;;  %vm165_vm13 = vweird.f32 %v144_v5 }
 0x1ac   :  { %v147_v7 = vsub.f32 1.0, %v146_v6 }
 0x1ad   :  { %v172_v22 = vor.u32 1.1754944e-38, %v171_v15  ;;  %vm170_vm15 = vcmp.eq.f32.partialorder %v169_v18, 8.507059e+37 }
 0x1ae   :  { %v148_v8 = vmul.f32 %v295_v4, %v147_v7 }
 0x1b0   :  { %v149_v10 = vadd.f32 %v295_v4, %v148_v8 }
 0x1b1   :  { %v297_v9 = vpop.eup %296 }
 0x1b2   :  { %v161_v11 = vmul.f32 %v297_v9, %v144_v5  ;;  %v153_v16 = vsel %vm152_vm10, %v295_v4, %v149_v10  ;;  %vm166_vm11 = vweird.f32 %v297_v9 }
 0x1b3   :  { %v158_v21 = vsel %vm155_vm12, %v157_v19, %v153_v16  ;;  %vm167_vm14 = vmor %vm165_vm13, %vm166_vm11 }
 0x1b4   :  { %v162_v14 = vsub.f32 1.0, %v161_v11  ;;  %v175_v25 = vmul.f32 %v158_v21, %v133_v56 }
 0x1b6   :  { %v163_v17 = vmul.f32 %v297_v9, %v162_v14 }
 0x1b8   :  { %v164_v20 = vadd.f32 %v297_v9, %v163_v17 }
 0x1ba   :  { %v168_v23 = vsel %vm167_vm14, %v297_v9, %v164_v20 }
 0x1bb   :  { %v173_v24 = vsel %vm170_vm15, %v172_v22, %v168_v23 }
 0x1bc   :  { %v176_v26 = vmul.f32 %v173_v24, %v135_v61 }
 0x1be   :  { %v177_v27 = vpack.c.bf16 %v176_v26, %v175_v25 }
 0x1c0   :  { %272 = vmatmul.msk.bf16.vlgmr.msra.gmra.mxu1 %vm214_vm0, %v177_v27 }
 0x23d   :  { %v227_v29 = vpop.f32.mrf.mxu1 }
 0x23e   :  { %v228_v30 = vadd.f32 %v283_v28, %v227_v29 }
 0x240   :  { %v232_v31 = vmul.f32 0.5, %v228_v30 }
 0x242   :  { %v234_v32 = vadd.f32 %v232_v31, %v352_v0 }
 0x244   :  { %v236_v33 = vpack.c.bf16 %v234_v32, %v234_v32 }
 0x245   :  { %v229_v34 = vpop.f32.mrf.mxu1 }
 0x246   :  { %239 = vst.msk [vmem:[%s415_s9] sm:$0xf] %vm238_vm1, %v236_v33  ;;  %v230_v35 = vadd.f32 %v283_v28, %v229_v34 }
 0x248   :  { %v233_v36 = vmul.f32 0.5, %v230_v35 }
 0x24a   :  { %v235_v37 = vadd.f32 %v233_v36, %v359_v2 }
 0x24c   :  { %v237_v38 = vpack.c.bf16 %v235_v37, %v235_v37 }
 0x24e   :  { %240 = vst.msk [vmem:[%s415_s9 + $0x4] sm:$0xf] %vm238_vm1, %v237_v38 }

// kernel: cond_conformer_layer.10
= control target key start
LH: loop header
LB: loop body
LE: loop exit
PB: predicated region body
PF: predicated region fallthrough
CT: control target
= control target key end

     0   :  { %s1975_s0 = inlined_call_operand.vmem [shape: bf16[2,8,32], index: 0, kind: input, shape index: {}, may-alias: {0,1,2}]   ;;  %s1976_s1 = inlined_call_operand.vmem [shape: bf16[2,8,32], index: 1, kind: input, shape index: {}, may-alias: {0,1,2}]   ;;  %s1977_s2 = inlined_call_operand.vmem [shape: bf16[2,8,32], index: 2, kind: input, shape index: {}, may-alias: {0,1,2}]   ;;  %s1978_s3 = inlined_call_operand.hbm [shape: f32[1,32], index: 3, kind: input, shape index: {}]   ;;  %s1979_s4 = inlined_call_operand.hbm [shape: f32[1,32], index: 4, kind: input, shape index: {}]   ;;  %s1980_s5 = inlined_call_operand.hbm [shape: bf16[32,64], index: 5, kind: input, shape index: {}]   ;;  %s1981_s6 = inlined_call_operand.hbm [shape: f32[1,64], index: 6, kind: input, shape index: {}]   ;;  %s1982_s7 = inlined_call_operand.vmem [shape: f32[7,32], index: 7, kind: input, shape index: {}]   ;;  %s1983_s8 = inlined_call_operand.hbm [shape: f32[1,32], index: 8, kind: input, shape index: {}]   ;;  %s1984_s9 = inlined_call_operand.hbm [shape: f32[1,32], index: 9, kind: input, shape index: {}]   ;;  %s1985_s10 = inlined_call_operand.hbm [shape: f32[1,32], index: 10, kind: input, shape index: {}]   ;;  %s1986_s11 = inlined_call_operand.hbm [shape: bf16[32,32], index: 11, kind: input, shape index: {}]   ;;  %s1987_s12 = inlined_call_operand.hbm [shape: f32[1,32], index: 12, kind: input, shape index: {}]   ;;  %s1988_s13 = inlined_call_operand.vmem [shape: bf16[2,8,32], index: 13, kind: output, shape index: {}]  }
   0x1   :  { %1989 = sst [smem:[#allocation21_spill]] %s1978_s3 }
   0x2   :  { %1990 = sst [smem:[#allocation22_spill]] %s1979_s4 }
   0x3   :  { %1991 = sst [smem:[#allocation23_spill]] %s1980_s5 }
   0x4   :  { %1992 = sst [smem:[#allocation24_spill]] %s1981_s6 }
   0x5   :  { %1993 = sst [smem:[#allocation25_spill]] %s1984_s9 }
   0x6   :  { %18 = vsyncpa [#allocation3], 0 }
   0x7   :  { %19 = vsyncpa [#allocation5], 0 }
   0x8   :  { %20 = vsyncpa [#allocation8], 0 }
   0x9   :  { %21 = vsyncpa [#allocation11], 0 }
   0xa   :  { %22 = vsyncpa [#allocation14], 0  ;;  %s1823_s25 = smov 0   ;;  %s1825_s26 = smov 0  }
   0xb   :  { %s1827_s27 = smov 0  }
   0xc LB: > { %s1994_s4 = sld [smem:[#allocation22_spill]]  ;;  %s1228_s14 = sadd.s32 4294967295, %s1738_s27   ;;  %s1738_s27 = sphi %s1827_s27, %s28_s27   ;;  %s1734_s26 = sphi %s1825_s26, %s2003_s26   ;;  %s1730_s25 = sphi %s1823_s25, %s2002_s25  }
   0xd   : > { %p1230_p0 = scmp.ge.s32.totalorder %s1738_s27, 1  ;;  %p379_p1 = scmp.lt.s32.totalorder %s1738_s27, 3 }
   0xe   : > { %p1844_p2 = scmp.eq.s32.totalorder %s1228_s14, 0  ;;  %s1740_s17 = smov [#allocation4]  }
   0xf   : > { %p1848_p3 = pnand %p1230_p0, %p379_p1  ;;  %s405_s18 = sshll.u32 %s1740_s17, 4  ;;  %s406_s18 = int_to_ptr.vmem [resolvable:$true] %s405_s18 }
  0x10   : > { %s1997_s6 = sld [smem:[#allocation24_spill]]  ;;  %s1741_s29 = smov [#allocation7]  }
  0x11   : > { %p1318_p4 = pneg %p1848_p3  ;;  %s1998_s9 = sld [smem:[#allocation25_spill]] }
  0x12   : > { %s403_s30 = sshll.u32 %s1994_s4, 4  ;;  %s431_s14 = sshll.u32 %s1741_s29, 4  ;;  %s404_s30 = int_to_ptr.hbm [resolvable:$true] %s403_s30  ;;  %s432_s14 = int_to_ptr.vmem [resolvable:$true] %s431_s14 }
  0x13   : > { %p1862_p5 = pnand %p1844_p2, %p1318_p4  ;;  %s1742_s17 = smov [#allocation10]  }
  0x14   : > { %s458_s19 = sshll.u32 %s1742_s17, 4  ;;  %s479_s23 = sshll.u32 %s1986_s11, 4  ;;  %s459_s19 = int_to_ptr.vmem [resolvable:$true] %s458_s19  ;;  %s480_s23 = int_to_ptr.hbm [resolvable:$true] %s479_s23 }
  0x15   : > { %1324 = dma.hbm_to_vmem [thread:$0]  (!%p1862_p5), %s404_s30, 16, %s406_s18, [#allocation5]  }
  0x16   : > { %s429_s21 = sshll.u32 %s1997_s6, 4  ;;  %s1743_s4 = smov [#allocation13]   ;;  %s430_s21 = int_to_ptr.hbm [resolvable:$true] %s429_s21 }
  0x17   : > { %s456_s24 = sshll.u32 %s1998_s9, 4  ;;  %s481_s29 = sshll.u32 %s1743_s4, 4  ;;  %s457_s24 = int_to_ptr.hbm [resolvable:$true] %s456_s24  ;;  %s482_s29 = int_to_ptr.vmem [resolvable:$true] %s481_s29 }
  0x18   : > { %1330 = dma.hbm_to_vmem [thread:$0]  (!%p1862_p5), %s430_s21, 16, %s432_s14, [#allocation8]  }
  0x19   : > { %1336 = dma.hbm_to_vmem [thread:$0]  (!%p1862_p5), %s457_s24, 16, %s459_s19, [#allocation11]  }
  0x1a   : > { %s1744_s6 = smov 64   ;;  %s1745_s9 = smov 4  }
  0x1b   : > { %1342 = dma.hbm_to_vmem [thread:$0]  (!%p1862_p5), %s480_s23, 256, %s482_s29, [#allocation14], %s1744_s6, %s1744_s6, %s1745_s9  }
  0x1c   : > { %s2000_s3 = sld [smem:[#allocation21_spill]]  ;;  %s40_s14 = sadd.s32 1, %s1734_s26 }
  0x1d   : > { %p42_p6 = scmp.ge.s32.totalorder %s40_s14, 2  ;;  %s1746_s24 = smov [#allocation2]  }
  0x1e   : > { %s393_s17 = sshll.u32 %s1746_s24, 4  ;;  %s2001_s5 = sld [smem:[#allocation23_spill]]  ;;  %s394_s17 = int_to_ptr.vmem [resolvable:$true] %s393_s17 }
  0x1f   : > { %s2005_s14 = smov (%p42_p6, %s40_s14), 0  ;;  %s444_s29 = sshll.u32 %s1983_s8, 4  ;;  %s445_s29 = int_to_ptr.hbm [resolvable:$true] %s444_s29 }
  0x20   : > { %s1747_s30 = smov [#allocation6]   ;;  %s1748_s24 = smov [#allocation9]  }
  0x21   : > { %s416_s18 = sshll.u32 %s1747_s30, 4  ;;  %s446_s19 = sshll.u32 %s1748_s24, 4  ;;  %s417_s18 = int_to_ptr.vmem [resolvable:$true] %s416_s18  ;;  %s447_s19 = int_to_ptr.vmem [resolvable:$true] %s446_s19 }
  0x22   : > { %s391_s21 = sshll.u32 %s2000_s3, 4  ;;  %s494_s4 = sshll.u32 %s1987_s12, 4  ;;  %s392_s21 = int_to_ptr.hbm [resolvable:$true] %s391_s21  ;;  %s495_s4 = int_to_ptr.hbm [resolvable:$true] %s494_s4 }
  0x23   : > { %1321 = dma.hbm_to_vmem [thread:$0]  (!%p1862_p5), %s392_s21, 16, %s394_s17, [#allocation3]  }
  0x24   : > { %s414_s22 = sshll.u32 %s2001_s5, 4  ;;  %s468_s5 = sshll.u32 %s1985_s10, 4  ;;  %s415_s22 = int_to_ptr.hbm [resolvable:$true] %s414_s22  ;;  %s469_s5 = int_to_ptr.hbm [resolvable:$true] %s468_s5 }
  0x25   : > { %1327 = dma.hbm_to_vmem [thread:$0]  (!%p1862_p5), %s415_s22, 256, %s417_s18, [#allocation5], %s1744_s6, %s1744_s6, %s1745_s9  }
  0x26   : > { %1333 = dma.hbm_to_vmem [thread:$0]  (!%p1862_p5), %s445_s29, 16, %s447_s19, [#allocation8]  }
  0x27   : > { %s1749_s23 = smov [#allocation12]   ;;  %s1750_s6 = smov [#allocation15]  }
  0x28   : > { %s470_s30 = sshll.u32 %s1749_s23, 4  ;;  %s496_s9 = sshll.u32 %s1750_s6, 4  ;;  %s471_s30 = int_to_ptr.vmem [resolvable:$true] %s470_s30  ;;  %s497_s9 = int_to_ptr.vmem [resolvable:$true] %s496_s9 }
  0x29   : > { %1339 = dma.hbm_to_vmem [thread:$0]  (!%p1862_p5), %s469_s5, 16, %s471_s30, [#allocation11]  }
  0x2a   : > { %1345 = dma.hbm_to_vmem [thread:$0]  (!%p1862_p5), %s495_s4, 16, %s497_s9, [#allocation14]  }
  0x2b   : > { %551 = sbr.rel (%p1848_p3) target bundleno = 794 (0x31a), region = 72 }
  0x30   : > { %1709 = dma.done.wait (%p1844_p2), [#allocation3], 16  }
  0x31   : > { %1711 = vsyncadd (%p1844_p2), [#allocation3], 4294967280 }
  0x32   : > { %1713 = dma.done.wait (%p1844_p2), [#allocation5], 272  }
  0x33   : > { %1715 = vsyncadd (%p1844_p2), [#allocation5], 4294967024 }
  0x34   : > { %1717 = dma.done.wait (%p1844_p2), [#allocation8], 32  }
  0x35   : > { %1719 = vsyncadd (%p1844_p2), [#allocation8], 4294967264 }
  0x36   : > { %1721 = dma.done.wait (%p1844_p2), [#allocation11], 32  }
  0x37   : > { %1723 = vsyncadd (%p1844_p2), [#allocation11], 4294967264 }
  0x38   : > { %1725 = dma.done.wait (%p1844_p2), [#allocation14], 272  }
  0x39   : > { %1727 = vsyncadd (%p1844_p2), [#allocation14], 4294967024  ;;  %p660_p7 = scmp.lt.s32.totalorder %s1730_s25, 1  ;;  %vm716_vm0 = vcmask 1042432   ;;  %vm721_vm1 = vcmask 261120   ;;  %vm725_vm2 = vcmask 259072  }
  0x3a   : > { %v1751_v13 = vmov 32.0   ;;  %v1279_v30 = vld [vmem:[#allocation6 + $0x8] sm:$0xff]  ;;  %v1278_v32 = vld [vmem:[#allocation6] sm:$0xff]  ;;  %v1401_v51 = vld [vmem:[#allocation2] ss:$0 sm:$0xff] }
  0x3b   : > { %s2007_s25 = smov (!%p660_p7, %s1730_s25), 1  ;;  %1408 = vrcp.f32 %v1751_v13  ;;  %814 = vmatpush.bf16.msra.mxu0 %v1279_v30  ;;  %v1402_v56 = vld [vmem:[#allocation4] ss:$0 sm:$0xff]  ;;  %v1403_v61 = vld [vmem:[#allocation7] ss:$0 sm:$0xff]  ;;  %v1281_v30 = vld [vmem:[#allocation13 + $0x8] sm:$0xff] }
  0x3c   : > { %s1929_s3 = sshll.u32 %s2007_s25, 2  ;;  %s1752_s25 = smov 96   ;;  %1024 = vmatpush.bf16.msra.mxu1 %v1281_v30 }
  0x3d   : > { %s666_s28 = scalar_lea.vmem %s1975_s0, %s1929_s3  ;;  %s676_s18 = scalar_lea.vmem %s1976_s1, %s1929_s3 }
  0x3e   : > { %s689_s19 = scalar_lea.vmem %s1977_s2, %s1929_s3  ;;  %v1943_v0 = vld [vmem:[%s666_s28] sm:$0xf]  ;;  %s699_s23 = scalar_lea.vmem %s1988_s13, %s1929_s3 }
  0x3f   : > { %v703_v1 = vld [vmem:[%s676_s18] sm:$0xc]  ;;  %v705_v2 = vld [vmem:[%s689_s19] sm:$0x3]  ;;  %v702_v3 = vunpack.c.l.bf16 %v1943_v0  ;;  %815 = vmatpush.bf16.msra.mxu0 %v1278_v32  ;;  %v872_v32 = vlaneseq }
  0x40   : > { %v704_v4 = vunpack.c.l.bf16 %v703_v1  ;;  %v706_v5 = vunpack.c.l.bf16 %v705_v2 }
  0x41   : > { %v711_v7 = vrot.slane %v702_v3, 5  ;;  %v1409_v14 = vpop.eup %1408 }
  0x42   : > { %v708_v6 = vrot.slane %v704_v4, 5  ;;  %v714_v9 = vrot.slane %v706_v5, 5  ;;  %v730_v15 = vmul.f32 32.0, %v1409_v14  ;;  %vm734_vm3 = vweird.f32 %v1409_v14 }
  0x44   : > { %v717_v8 = vsel %vm716_vm0, %v708_v6, %v711_v7  ;;  %v718_v11 = vsel %vm716_vm0, %v711_v7, %v714_v9  ;;  %v731_v16 = vsub.f32 1.0, %v730_v15 }
  0x45   : > { %v722_v10 = vsel %vm721_vm1, %v717_v8, 0.0  ;;  %v726_v12 = vsel %vm725_vm2, %v718_v11, 0.0 }
  0x46   : > { %723 = vadd.xlane.f32.xlu0 %v722_v10  ;;  %v732_v17 = vmul.f32 %v1409_v14, %v731_v16 }
  0x48   : > { %v733_v18 = vadd.f32 %v1409_v14, %v732_v17 }
  0x4a   : > { %v735_v19 = vsel %vm734_vm3, %v1409_v14, %v733_v18 }
  0x4e   : > { %727 = vadd.xlane.f32.xlu0 %v726_v12 }
  0xb9   : > { %v724_v20 = vpop.xlane.xlu0 %723 }
  0xba   : > { %v736_v21 = vmul.f32 %v735_v19, %v724_v20 }
  0xbc   : > { %v738_v22 = vsub.f32 %v717_v8, %v736_v21 }
  0xbe   : > { %v740_v23 = vmul.f32 %v738_v22, %v738_v22 }
  0xc0   : > { %v742_v24 = vsel %vm721_vm1, %v740_v23, 0.0 }
  0xc1   : > { %743 = vadd.xlane.f32.xlu1 %v742_v24  ;;  %v728_v25 = vpop.xlane.xlu0 %727 }
  0xc2   : > { %v737_v26 = vmul.f32 %v735_v19, %v728_v25 }
  0xc4   : > { %v739_v27 = vsub.f32 %v718_v11, %v737_v26 }
  0xc6   : > { %v741_v28 = vmul.f32 %v739_v27, %v739_v27 }
  0xc8   : > { %v745_v29 = vsel %vm725_vm2, %v741_v28, 0.0 }
  0xc9   : > { %746 = vadd.xlane.f32.xlu1 %v745_v29 }
 0x134   : > { %v744_v31 = vpop.xlane.xlu1 %743 }
 0x135   : > { %v748_v33 = vmul.f32 %v744_v31, %v735_v19  ;;  %v1280_v31 = vld [vmem:[#allocation13] sm:$0xff] }
 0x136   : > { %1025 = vmatpush.bf16.msra.mxu1 %v1280_v31 }
 0x137   : > { %v750_v34 = vadd.f32 1e-05, %v748_v33  ;;  %v873_v33 = vshrl.u32 %v872_v32, 7 }
 0x139   : > { %1410 = vrsqrt.f32 %v750_v34  ;;  %vm758_vm5 = vweird.f32 %v750_v34 }
 0x13c   : > { %v747_v35 = vpop.xlane.xlu1 %746 }
 0x13d   : > { %v749_v36 = vmul.f32 %v747_v35, %v735_v19 }
 0x13f   : > { %v1411_v37 = vpop.eup %1410  ;;  %v751_v38 = vadd.f32 1e-05, %v749_v36  ;;  %v874_v36 = vadd.s32 8, %v873_v33 }
 0x140   : > { %v753_v39 = vmul.f32 %v1411_v37, %v750_v34  ;;  %vm759_vm4 = vweird.f32 %v1411_v37  ;;  %v876_v34 = vadd.s32 4294967293, %v873_v33 }
 0x141   : > { %1412 = vrsqrt.f32 %v751_v38  ;;  %vm760_vm6 = vmor %vm758_vm5, %vm759_vm4  ;;  %vm768_vm8 = vweird.f32 %v751_v38 }
 0x142   : > { %v754_v40 = vmul.f32 %v1411_v37, %v753_v39  ;;  %vm878_vm4 = vcmp.ge.s32.totalorder %v876_v34, 0  ;;  %v877_v39 = vadd.s32 4294967293, %v874_v36 }
 0x144   : > { %v755_v41 = vmul.f32 0.5, %v754_v40  ;;  %vm881_vm5 = vcmp.lt.s32.totalorder %v877_v39, 8 }
 0x146   : > { %v756_v42 = vsub.f32 1.5, %v755_v41 }
 0x147   : > { %v1413_v43 = vpop.eup %1412 }
 0x148   : > { %v757_v44 = vmul.f32 %v1411_v37, %v756_v42  ;;  %v763_v45 = vmul.f32 %v1413_v43, %v751_v38  ;;  %vm769_vm7 = vweird.f32 %v1413_v43 }
 0x149   : > { %vm770_vm9 = vmor %vm768_vm8, %vm769_vm7  ;;  %vm910_vm7 = vcmask 1045504   ;;  %vm921_vm8 = vcmask 1044480  }
 0x14a   : > { %v764_v46 = vmul.f32 %v1413_v43, %v763_v45  ;;  %v761_v47 = vsel %vm760_vm6, %v1411_v37, %v757_v44  ;;  %v890_v37 = vld [vmem:[%s1982_s7] sm:$0x7f]  ;;  %vm899_vm6 = vcmask 1046528  }
 0x14b   : > { %v772_v50 = vmul.f32 %v761_v47, %v738_v22  ;;  %v894_v40 = vperm.slane %v890_v37, 1  ;;  %v905_v42 = vperm.slane %v890_v37, 2  ;;  %v916_v44 = vperm.slane %v890_v37, 3 }
 0x14c   : > { %v765_v48 = vmul.f32 0.5, %v764_v46  ;;  %v891_v47 = vperm.slane %v890_v37, 0 }
 0x14d   : > { %v777_v55 = vmul.f32 %v1401_v51, %v772_v50 }
 0x14e   : > { %v766_v49 = vsub.f32 1.5, %v765_v48  ;;  %v927_v48 = vperm.slane %v890_v37, 4 }
 0x14f   : > { %v782_v58 = vadd.f32 %v1402_v56, %v777_v55  ;;  %v938_v55 = vperm.slane %v890_v37, 5 }
 0x150   : > { %v767_v52 = vmul.f32 %v1413_v43, %v766_v49 }
 0x152   : > { %v771_v53 = vsel %vm770_vm9, %v1413_v43, %v767_v52  ;;  %vm932_vm9 = vcmask 1043456  }
 0x153   : > { %v773_v54 = vmul.f32 %v771_v53, %v739_v27 }
 0x155   : > { %v778_v57 = vmul.f32 %v1401_v51, %v773_v54 }
 0x157   : > { %v783_v59 = vadd.f32 %v1402_v56, %v778_v57 }
 0x159   : > { %v784_v60 = vpack.c.bf16 %v783_v59, %v782_v58 }
 0x15b   : > { %1263 = vmatmul.msk.bf16.vlgmr.msra.gmra.mxu0 %vm721_vm1, %v784_v60 }
 0x1d8   : > { %v817_v62 = vpop.f32.mrf.mxu0 }
 0x1d9   : > { %v818_v63 = vadd.f32 %v1403_v61, %v817_v62  ;;  %v948_v62 = vperm.slane %v890_v37, 6 }
 0x1db   : > { %v1264_v1 = vmul.f32 -1.442695, %v818_v63 }
 0x1dd   : > { %1414 = vpow2.f32 %v1264_v1 }
 0x1e0   : > { %v819_v2 = vpop.f32.mrf.mxu0 }
 0x1e1   : > { %v820_v4 = vadd.f32 %v1403_v61, %v819_v2 }
 0x1e3   : > { %v1415_v5 = vpop.eup %1414  ;;  %v1265_v6 = vmul.f32 -1.442695, %v820_v4 }
 0x1e4   : > { %v828_v7 = vadd.f32 1.0, %v1415_v5 }
 0x1e5   : > { %1416 = vpow2.f32 %v1265_v6 }
 0x1e6   : > { %1418 = vrcp.f32 %v828_v7  ;;  %v841_v13 = vand.u32 2147483648, %v828_v7  ;;  %v839_v15 = vand.u32 2147483647, %v828_v7  ;;  %vm835_vm11 = vweird.f32 %v828_v7 }
 0x1e8   : > { %v842_v18 = vor.u32 1.1754944e-38, %v841_v13  ;;  %vm840_vm13 = vcmp.eq.f32.partialorder %v839_v15, 8.507059e+37 }
 0x1eb   : > { %v1417_v8 = vpop.eup %1416 }
 0x1ec   : > { %v1419_v9 = vpop.eup %1418  ;;  %v829_v10 = vadd.f32 1.0, %v1417_v8 }
 0x1ed   : > { %v831_v11 = vmul.f32 %v1419_v9, %v828_v7  ;;  %vm836_vm10 = vweird.f32 %v1419_v9 }
 0x1ee   : > { %1420 = vrcp.f32 %v829_v10  ;;  %vm837_vm12 = vmor %vm835_vm11, %vm836_vm10  ;;  %v856_v23 = vand.u32 2147483648, %v829_v10  ;;  %v854_v25 = vand.u32 2147483647, %v829_v10  ;;  %vm850_vm15 = vweird.f32 %v829_v10 }
 0x1ef   : > { %v832_v12 = vsub.f32 1.0, %v831_v11  ;;  %vm953_vm10 = vcmask 1041408  }
 0x1f0   : > { %v857_v27 = vor.u32 1.1754944e-38, %v856_v23  ;;  %vm855_vm3 = vcmp.eq.f32.partialorder %v854_v25, 8.507059e+37 }
 0x1f1   : > { %v833_v14 = vmul.f32 %v1419_v9, %v832_v12 }
 0x1f3   : > { %v834_v16 = vadd.f32 %v1419_v9, %v833_v14 }
 0x1f4   : > { %v1421_v17 = vpop.eup %1420 }
 0x1f5   : > { %v838_v19 = vsel %vm837_vm12, %v1419_v9, %v834_v16  ;;  %v846_v20 = vmul.f32 %v1421_v17, %v829_v10  ;;  %vm851_vm14 = vweird.f32 %v1421_v17 }
 0x1f6   : > { %v843_v21 = vsel %vm840_vm13, %v842_v18, %v838_v19  ;;  %vm852_vm2 = vmor %vm850_vm15, %vm851_vm14  ;;  %vm1033_vm14 = vcmask 257024  }
 0x1f7   : > { %862 = vrot.lane.b32.xlu2 %v843_v21, %s1752_s25  ;;  %v847_v22 = vsub.f32 1.0, %v846_v20 }
 0x1f9   : > { %v848_v24 = vmul.f32 %v1421_v17, %v847_v22 }
 0x1fb   : > { %v849_v26 = vadd.f32 %v1421_v17, %v848_v24  ;;  %v1404_v24 = vld [vmem:[#allocation9] ss:$0 sm:$0xff] }
 0x1fd   : > { %v853_v28 = vsel %vm852_vm2, %v1421_v17, %v849_v26 }
 0x1fe   : > { %v858_v29 = vsel %vm855_vm3, %v857_v27, %v853_v28  ;;  %v1405_v27 = vld [vmem:[#allocation10] ss:$0 sm:$0xff] }
 0x1ff   : > { %864 = vrot.lane.b32.xlu2 %v858_v29, %s1752_s25  ;;  %v1406_v29 = vld [vmem:[#allocation12] ss:$0 sm:$0xff] }
 0x251   : > { %v863_v35 = vpop.permute.xlu2 %862 }
 0x252   : > { %v868_v38 = vmul.f32 %v863_v35, %v818_v63 }
 0x254   : > { %v888_v41 = vsel %vm878_vm4, %v868_v38, 0.0 }
 0x255   : > { %v895_v46 = vmul.f32 %v894_v40, %v888_v41  ;;  %v906_v50 = vmul.f32 %v905_v42, %v888_v41  ;;  %v917_v54 = vmul.f32 %v916_v44, %v888_v41  ;;  %v892_v60 = vmul.f32 %v891_v47, %v888_v41  ;;  %v1407_v47 = vld [vmem:[#allocation15] ss:$0 sm:$0xff] }
 0x256   : > { %v928_v61 = vmul.f32 %v927_v48, %v888_v41  ;;  %v939_v5 = vmul.f32 %v938_v55, %v888_v41  ;;  %v949_v13 = vmul.f32 %v948_v62, %v888_v41 }
 0x257   : > { %v900_v56 = vrot.slane %v895_v46, 1  ;;  %v911_v63 = vrot.slane %v906_v50, 2  ;;  %v922_v7 = vrot.slane %v917_v54, 3 }
 0x258   : > { %v933_v12 = vrot.slane %v928_v61, 4  ;;  %v943_v17 = vrot.slane %v939_v5, 5  ;;  %v954_v21 = vrot.slane %v949_v13, 6 }
 0x259   : > { %v865_v43 = vpop.permute.xlu2 %864 }
 0x25a   : > { %v869_v45 = vmul.f32 %v865_v43, %v820_v4 }
 0x25c   : > { %v889_v49 = vsel %vm881_vm5, %v869_v45, 0.0 }
 0x25d   : > { %v896_v51 = vmul.f32 %v894_v40, %v889_v49  ;;  %v907_v52 = vmul.f32 %v905_v42, %v889_v49  ;;  %v918_v53 = vmul.f32 %v916_v44, %v889_v49  ;;  %v929_v59 = vmul.f32 %v927_v48, %v889_v49 }
 0x25e   : > { %v940_v4 = vmul.f32 %v938_v55, %v889_v49  ;;  %v950_v10 = vmul.f32 %v948_v62, %v889_v49 }
 0x25f   : > { %v901_v57 = vrot.slane %v896_v51, 1  ;;  %v912_v58 = vrot.slane %v907_v52, 2  ;;  %v923_v2 = vrot.slane %v918_v53, 3  ;;  %v934_v9 = vrot.slane %v929_v59, 4 }
 0x260   : > { %v944_v15 = vrot.slane %v940_v4, 5  ;;  %v955_v19 = vrot.slane %v950_v10, 6 }
 0x261   : > { %v902_v1 = vsel %vm899_vm6, %v900_v56, %v901_v57  ;;  %v913_v8 = vsel %vm910_vm7, %v911_v63, %v912_v58  ;;  %v924_v14 = vsel %vm921_vm8, %v922_v7, %v923_v2  ;;  %v935_v18 = vsel %vm932_vm9, %v933_v12, %v934_v9 }
 0x262   : > { %v904_v6 = vadd.f32 %v902_v1, %v892_v60  ;;  %v945_v22 = vsel %vm716_vm0, %v943_v17, %v944_v15  ;;  %v956_v25 = vsel %vm953_vm10, %v954_v21, %v955_v19 }
 0x264   : > { %v915_v11 = vadd.f32 %v913_v8, %v904_v6 }
 0x266   : > { %v926_v16 = vadd.f32 %v924_v14, %v915_v11 }
 0x268   : > { %v937_v20 = vadd.f32 %v935_v18, %v926_v16 }
 0x26a   : > { %v947_v23 = vadd.f32 %v945_v22, %v937_v20 }
 0x26c   : > { %v958_v26 = vadd.f32 %v956_v25, %v947_v23 }
 0x26e   : > { %v963_v28 = vadd.f32 %v1404_v24, %v958_v26 }
 0x270   : > { %v968_v30 = vmul.f32 %v1405_v27, %v963_v28 }
 0x272   : > { %v973_v31 = vadd.f32 %v1406_v29, %v968_v30 }
 0x274   : > { %v1266_v32 = vmul.f32 -1.442695, %v973_v31 }
 0x276   : > { %1422 = vpow2.f32 %v1266_v32 }
 0x27c   : > { %v1423_v33 = vpop.eup %1422 }
 0x27d   : > { %v977_v34 = vadd.f32 1.0, %v1423_v33 }
 0x27f   : > { %1424 = vrcp.f32 %v977_v34  ;;  %v989_v38 = vand.u32 2147483648, %v977_v34  ;;  %v987_v40 = vand.u32 2147483647, %v977_v34  ;;  %vm983_vm11 = vweird.f32 %v977_v34 }
 0x281   : > { %v990_v42 = vor.u32 1.1754944e-38, %v989_v38  ;;  %vm988_vm13 = vcmp.eq.f32.partialorder %v987_v40, 8.507059e+37 }
 0x285   : > { %v1425_v35 = vpop.eup %1424 }
 0x286   : > { %v979_v36 = vmul.f32 %v1425_v35, %v977_v34  ;;  %vm984_vm0 = vweird.f32 %v1425_v35 }
 0x287   : > { %vm985_vm12 = vmor %vm983_vm11, %vm984_vm0 }
 0x288   : > { %v980_v37 = vsub.f32 1.0, %v979_v36 }
 0x28a   : > { %v981_v39 = vmul.f32 %v1425_v35, %v980_v37 }
 0x28c   : > { %v982_v41 = vadd.f32 %v1425_v35, %v981_v39 }
 0x28e   : > { %v986_v43 = vsel %vm985_vm12, %v1425_v35, %v982_v41 }
 0x28f   : > { %v991_v44 = vsel %vm988_vm13, %v990_v42, %v986_v43 }
 0x290   : > { %v993_v45 = vmul.f32 %v991_v44, %v973_v31 }
 0x292   : > { %v994_v46 = vpack.c.bf16 %v993_v45, %v993_v45 }
 0x294   : > { %1275 = vmatmul.msk.bf16.vlgmr.msra.gmra.mxu1 %vm721_vm1, %v994_v46 }
 0x311   : > { %v1027_v48 = vpop.f32.mrf.mxu1 }
 0x312   : > { %v1028_v49 = vadd.f32 %v1407_v47, %v1027_v48 }
 0x314   : > { %v1031_v50 = vadd.f32 %v1028_v49, %v702_v3 }
 0x316   : > { %v1032_v51 = vpack.c.bf16 %v1031_v50, %v1031_v50 }
 0x318   : > { %1034 = vst.msk [vmem:[%s699_s23] sm:$0xf] %vm1033_vm14, %v1032_v51 }
 0x319   : > { %v1029_v52 = vpop.f32.mrf.mxu1 }
 0x31a PF: > { %s28_s27 = sadd.s32 1, %s1738_s27   ;;  %s2002_s25 = smov %s1734_s26 }
 0x31b   : > { %p25_p8 = scmp.ge.s32.totalorder %s28_s27, 4   ;;  %s2003_s26 = smov %s2005_s14 }
 0x31d   :  { %27 = sbr.rel (!%p25_p8) target bundleno = 12 (0xc), region = 145 }
 0x322   :  { %1060 = vsyncpa [#allocation3], 1 }
 0x323   :  { %1062 = vsyncpa [#allocation3 + $0x1], 1 }
 0x324   :  { %1063 = vsyncpa [#allocation5], 1 }
 0x325   :  { %1064 = vsyncpa [#allocation8], 1 }
 0x326   :  { %1065 = vsyncpa [#allocation11], 1 }
 0x327   :  { %1066 = vsyncpa [#allocation14], 1 }

// kernel: cond_conformer_layer.9
= control target key start
LH: loop header
LB: loop body
LE: loop exit
PB: predicated region body
PF: predicated region fallthrough
CT: control target
= control target key end

     0   :  { %s1966_s0 = inlined_call_operand.vmem [shape: bf16[2,8,32], index: 0, kind: input, shape index: {}]   ;;  %s1967_s1 = inlined_call_operand.vmem [shape: f32[1,32], index: 1, kind: input, shape index: {}]   ;;  %s1968_s2 = inlined_call_operand.hbm [shape: f32[1,32], index: 2, kind: input, shape index: {}]   ;;  %s1969_s3 = inlined_call_operand.vmem [shape: bf16[32,32], index: 3, kind: input, shape index: {}]   ;;  %s1970_s4 = inlined_call_operand.hbm [shape: f32[1,32], index: 4, kind: input, shape index: {}]   ;;  %s1971_s5 = inlined_call_operand.vmem [shape: bf16[2,4,8,8], index: 5, kind: input, shape index: {}]   ;;  %s1972_s6 = inlined_call_operand.vmem [shape: bf16[2,4,8,8], index: 6, kind: input, shape index: {}]   ;;  %s1973_s7 = inlined_call_operand.hbm [shape: f32[2,1,8], index: 7, kind: input, shape index: {}]   ;;  %s1974_s8 = inlined_call_operand.vmem [shape: bf16[4,8,32], index: 8, kind: input, shape index: {}]   ;;  %s1975_s9 = inlined_call_operand.hbm [shape: f32[1,32], index: 9, kind: input, shape index: {}]   ;;  %s1976_s10 = inlined_call_operand.vmem [shape: bf16[2,8,32], index: 10, kind: output, shape index: {}]  }
   0x1   :  { %1978 = sst [smem:[#allocation16_spill]] %s1968_s2 }
   0x2   :  { %1979 = sst [smem:[#allocation17_spill]] %s1970_s4 }
   0x3   :  { %15 = vsyncpa [#allocation7], 0 }
   0x4   :  { %16 = vsyncpa [#allocation9], 0  ;;  %s1686_s13 = smov 0   ;;  %s1688_s14 = smov 0  }
   0x5   :  { %s1690_s15 = smov 0   ;;  %s1692_s16 = smov 0  }
   0x6   :  { %s1694_s17 = smov 0   ;;  %s1696_s18 = smov 0  }
   0x7 LB: > { %s1977_s19 = sadd.s32 4294967295, %s1619_s18   ;;  %p231_p0 = scmp.ne.s32.totalorder %s1603_s14, %s1599_s13  ;;  %s1619_s18 = sphi %s1696_s18, %s22_s18   ;;  %s1615_s17 = sphi %s1694_s17, %s1991_s17   ;;  %s1611_s16 = sphi %s1692_s16, %s1990_s16   ;;  %s1607_s15 = sphi %s1690_s15, %s1989_s15   ;;  %s1603_s14 = sphi %s1688_s14, %s1988_s14   ;;  %s1599_s13 = sphi %s1686_s13, %s1987_s13  }
   0x8   : > { %p1718_p1 = scmp.eq.s32.totalorder %s1977_s19, 0  ;;  %p1263_p2 = scmp.ge.s32.totalorder %s1619_s18, 1 }
   0x9   : > { %p312_p3 = scmp.lt.s32.totalorder %s1619_s18, 3  ;;  %s1982_s2 = sld [smem:[#allocation16_spill]] }
   0xa   : > { %p1726_p4 = por %p1718_p1, %p231_p0  ;;  %s1621_s26 = smov [#allocation6]  }
   0xb   : > { %p1733_p5 = pnand %p1263_p2, %p312_p3  ;;  %s329_s27 = sshll.u32 %s1621_s26, 4  ;;  %s330_s27 = int_to_ptr.vmem [resolvable:$true] %s329_s27 }
   0xc   : > { %s1984_s4 = sld [smem:[#allocation17_spill]]  ;;  %s357_s13 = sshll.u32 %s1975_s9, 4  ;;  %s358_s13 = int_to_ptr.hbm [resolvable:$true] %s357_s13 }
   0xd   : > { %p1322_p6 = pneg %p1733_p5  ;;  %s1622_s22 = smov [#allocation8]  }
   0xe   : > { %s344_s23 = sshll.u32 %s1622_s22, 4  ;;  %s1623_s26 = smov [#allocation11]   ;;  %s345_s23 = int_to_ptr.vmem [resolvable:$true] %s344_s23 }
   0xf   : > { %s327_s24 = sshll.u32 %s1982_s2, 4  ;;  %p1323_p7 = pnand %p1322_p6, %p1718_p1  ;;  %s328_s24 = int_to_ptr.hbm [resolvable:$true] %s327_s24 }
  0x10   : > { %s359_s28 = sshll.u32 %s1623_s26, 4  ;;  %s41_s29 = sadd.s32 1, %s1615_s17  ;;  %s360_s28 = int_to_ptr.vmem [resolvable:$true] %s359_s28 }
  0x11   : > { %1325 = dma.hbm_to_vmem [thread:$0]  (!%p1323_p7), %s328_s24, 16, %s330_s27, [#allocation7]  }
  0x12   : > { %s342_s30 = sshll.u32 %s1984_s4, 4  ;;  %p43_p8 = scmp.ge.s32.totalorder %s41_s29, 2  ;;  %s343_s30 = int_to_ptr.hbm [resolvable:$true] %s342_s30 }
  0x13   : > { %1328 = dma.hbm_to_vmem [thread:$0]  (!%p1323_p7), %s343_s30, 16, %s345_s23, [#allocation9]  }
  0x14   : > { %1331 = dma.hbm_to_vmem [thread:$0]  (!%p1323_p7), %s358_s13, 16, %s360_s28, [#allocation9]  }
  0x15   : > { %s218_s11 = sadd.s32 1, %s1607_s15  ;;  %p225_p9 = scmp.ne.s32.totalorder %s1607_s15, %s1603_s14 }
  0x16   : > { %p226_p10 = scmp.eq.s32.totalorder %s1619_s18, 0  ;;  %s1993_s29 = smov (%p43_p8, %s41_s29), 0 }
  0x17   : > { %p1339_p12 = scmp.lt.s32.totalorder %s1619_s18, 2  ;;  %s213_s27 = ssub.s32 %s1615_s17, %s1993_s29 }
  0x18   : > { %p1754_p11 = por %p226_p10, %p225_p9  ;;  %s402_s30 = sand.u32 1, %s1619_s18  }
  0x19   : > { %p216_p13 = scmp.eq.s32.totalorder %s213_s27, 0  ;;  %s404_s12 = sand.u32 1, %s1607_s15  }
  0x1a   : > { %s409_s23 = scalar_lea.hbm %s1973_s7, %s1615_s17  ;;  %s405_s19 = scalar_lea.vmem [#allocation10], %s404_s12 }
  0x1b   : > { %s1768_s26 = scalar_select %p216_p13, %s1607_s15, %s218_s11  }
  0x1c   : > { %s411_s28 = sshll.u32 %s409_s23, 4  ;;  %s413_s2 = sshll.u32 %s405_s19, 4  ;;  %s412_s28 = int_to_ptr.hbm [resolvable:$true] %s411_s28  ;;  %s414_s2 = int_to_ptr.vmem [resolvable:$true] %s413_s2 }
  0x1d   : > { %p1333_p0 = pnand %p1339_p12, %p1754_p11  ;;  %s403_s4 = scalar_lea.sflag [#allocation7], %s402_s30 }
  0x1e   : > { %422 = sbr.rel (%p1733_p5) target bundleno = 1333 (0x535), region = 60 }
  0x1f   : > { %1335 = dma.hbm_to_vmem [thread:$0]  (!%p1333_p0), %s412_s28, 16, %s414_s2, %s403_s4  }
  0x23   : > { %1582 = dma.done.wait (%p1718_p1), [#allocation7], 16  }
  0x24   : > { %1584 = vsyncadd (%p1718_p1), [#allocation7], 4294967280 }
  0x25   : > { %1586 = dma.done.wait (%p1718_p1), [#allocation9], 16  }
  0x26   : > { %1588 = vsyncadd (%p1718_p1), [#allocation9], 4294967280  ;;  %s1986_s19 = sadd.s32 4294967295, %s1619_s18   ;;  %s436_s4 = sand.u32 1, %s1603_s14  }
  0x27   : > { %s434_s2 = sand.u32 1, %s1986_s19   ;;  %s1785_s11 = scalar_lea.vmem [#allocation10], %s436_s4 }
  0x28   : > { %s435_s25 = scalar_lea.sflag [#allocation7], %s434_s2 }
  0x29   : > { %1590 = dma.done.wait (%p1726_p4), %s435_s25, 16  }
  0x2a   : > { %1592 = vsyncadd (%p1726_p4), %s435_s25, 4294967280 }
  0x2b   : > { %1594 = dma.done.wait (%p1718_p1), [#allocation9], 16  }
  0x2c   : > { %1596 = vsyncadd (%p1718_p1), [#allocation9], 4294967280  ;;  %p504_p2 = scmp.lt.s32.totalorder %s1611_s16, 1  ;;  %vm543_vm0 = vcmask 261120   ;;  %v1624_v3 = vmov 32.0   ;;  %v1307_v15 = vld [vmem:[%s1969_s3 + $0x8] sm:$0xff] }
  0x2d   : > { %1409 = vrcp.f32 %v1624_v3  ;;  %611 = vmatpush.bf16.msra.mxu0 %v1307_v15  ;;  %v1306_v16 = vld [vmem:[%s1969_s3] sm:$0xff]  ;;  %v1405_v29 = vld [vmem:[#allocation6] ss:$0 sm:$0xff]  ;;  %vm638_vm5 = vcmask 64512   ;;  %v1406_v35 = vld [vmem:[#allocation8] ss:$0 sm:$0xff] }
  0x2e   : > { %s1995_s16 = smov (!%p504_p2, %s1611_s16), 1  ;;  %v1404_v26 = vld [vmem:[%s1967_s1] ss:$0 sm:$0xff]  ;;  %vm620_vm6 = vcmask 60416   ;;  %s1625_s27 = smov 104   ;;  %vm643_vm7 = vcmask 7168  }
  0x2f   : > { %s1272_s24 = sshll.u32 %s1995_s16, 2  ;;  %s1304_s19 = sshll.u32 %s1995_s16, 4  ;;  %v1407_v54 = vld [vmem:[%s1785_s11] ss:$0 sm:$0xff]  ;;  %v1628_v59 = vmov -1e+30  }
  0x30   : > { %s1805_s21 = scalar_lea.vmem %s1966_s0, %s1272_s24  ;;  %s518_s25 = scalar_lea.vmem %s1971_s5, %s1304_s19  ;;  %644 = vst.msk [vmem:[#allocation4] sm:$0xff] %vm643_vm7, %v1628_v59  ;;  %v1629_v60 = vmov 0   ;;  %v1630_v63 = vmov 0.0   ;;  %vm873_vm8 = vcmask 1043456   ;;  %vm1097_vm9 = vcmask 257024  }
  0x31   : > { %v539_v0 = vld [vmem:[%s1805_s21] sm:$0xf]  ;;  %612 = vmatpush.bf16.msra.mxu0 %v1306_v16  ;;  %s1626_s30 = smov 120   ;;  %s1627_s20 = smov 112   ;;  %v655_v42 = vld [vmem:[%s518_s25 + $0xc] sm:$0xf]  ;;  %1403 = vset.pattern.permute.xlu1 %v1629_v60 }
  0x32   : > { %v540_v1 = vunpack.c.l.bf16 %v539_v0  ;;  %v652_v33 = vld [vmem:[%s518_s25] sm:$0xf]  ;;  %v730_v43 = vsel %vm638_vm5, %v655_v42, 0  ;;  %v653_v44 = vld [vmem:[%s518_s25 + $0x4] sm:$0xf]  ;;  %645 = vst.msk [vmem:[#allocation4 + $0x8] sm:$0xff] %vm643_vm7, %v1628_v59  ;;  %1401 = vset.pattern.permute.xlu0 %v1629_v60  ;;  %1402 = vset.pattern.permute.xlu2 %v1629_v60  ;;  %s1869_s22 = scalar_lea.vmem %s1972_s6, %s1304_s19  ;;  %s533_s11 = scalar_lea.vmem %s1976_s10, %s1272_s24 }
  0x33   : > { %v1410_v4 = vpop.eup %1409  ;;  %v673_v34 = vsel %vm638_vm5, %v652_v33, 0  ;;  %v692_v45 = vsel %vm638_vm5, %v653_v44, 0  ;;  %v654_v47 = vld [vmem:[%s518_s25 + $0x8] sm:$0xf]  ;;  %646 = vst.msk [vmem:[#allocation4 + $0x10] sm:$0xff] %vm643_vm7, %v1628_v59 }
  0x34   : > { %v544_v2 = vsel %vm543_vm0, %v540_v1, 0.0  ;;  %v548_v5 = vmul.f32 32.0, %v1410_v4  ;;  %vm552_vm1 = vweird.f32 %v1410_v4  ;;  %682 = vmatpush.bf16.xpose.msra.mxu1 %v673_v34  ;;  %701 = vmatpush.bf16.xpose.msra.mxu2 %v692_v45  ;;  %v711_v48 = vsel %vm638_vm5, %v654_v47, 0  ;;  %647 = vst.msk [vmem:[#allocation4 + $0x18] sm:$0xff] %vm643_vm7, %v1628_v59  ;;  %v659_v42 = vld [vmem:[%s1869_s22 + $0xc] sm:$0xf] }
  0x35   : > { %545 = vadd.xlane.f32.xlu0 %v544_v2  ;;  %739 = vmatpush.bf16.xpose.msrb.mxu0 %v730_v43  ;;  %648 = vst.msk [vmem:[#allocation5] sm:$0xff] %vm643_vm7, %v1630_v63  ;;  %v932_v43 = vsel %vm873_vm8, %v659_v42, 0 }
  0x36   : > { %v549_v6 = vsub.f32 1.0, %v548_v5  ;;  %720 = vmatpush.bf16.xpose.msra.mxu3 %v711_v48  ;;  %639 = vst.msk [vmem:[#allocation3] sm:$0xff] %vm638_vm5, %v1630_v63 }
  0x37   : > { %640 = vst.msk [vmem:[#allocation3 + $0x8] sm:$0xff] %vm638_vm5, %v1630_v63  ;;  %v745_v2 = vld [vmem:[#allocation4] sm:$0xff] }
  0x38   : > { %v550_v7 = vmul.f32 %v1410_v4, %v549_v6  ;;  %641 = vst.msk [vmem:[#allocation3 + $0x10] sm:$0xff] %vm638_vm5, %v1630_v63 }
  0x39   : > { %642 = vst.msk [vmem:[#allocation3 + $0x18] sm:$0xff] %vm638_vm5, %v1630_v63 }
  0x3a   : > { %v551_v8 = vadd.f32 %v1410_v4, %v550_v7  ;;  %649 = vst.msk [vmem:[#allocation5 + $0x8] sm:$0xff] %vm643_vm7, %v1630_v63 }
  0x3b   : > { %650 = vst.msk [vmem:[#allocation5 + $0x10] sm:$0xff] %vm643_vm7, %v1630_v63 }
  0x3c   : > { %v553_v9 = vsel %vm552_vm1, %v1410_v4, %v551_v8  ;;  %651 = vst.msk [vmem:[#allocation5 + $0x18] sm:$0xff] %vm643_vm7, %v1630_v63 }
  0xa8   : > { %v546_v10 = vpop.xlane.xlu0 %545 }
  0xa9   : > { %v554_v11 = vmul.f32 %v553_v9, %v546_v10 }
  0xab   : > { %v555_v12 = vsub.f32 %v540_v1, %v554_v11 }
  0xad   : > { %v556_v13 = vmul.f32 %v555_v12, %v555_v12 }
  0xaf   : > { %v557_v14 = vsel %vm543_vm0, %v556_v13, 0.0 }
  0xb0   : > { %558 = vadd.xlane.f32.xlu0 %v557_v14  ;;  %v1862_v14 = vld [vmem:[#allocation4 + $0x18] sm:$0xff] }
 0x123   : > { %v559_v17 = vpop.xlane.xlu0 %558 }
 0x124   : > { %v560_v18 = vmul.f32 %v559_v17, %v553_v9 }
 0x126   : > { %v561_v19 = vadd.f32 1e-05, %v560_v18  ;;  %v656_v18 = vld [vmem:[%s1869_s22] sm:$0xf] }
 0x128   : > { %1411 = vrsqrt.f32 %v561_v19  ;;  %vm568_vm3 = vweird.f32 %v561_v19 }
 0x12e   : > { %v1412_v20 = vpop.eup %1411 }
 0x12f   : > { %v563_v21 = vmul.f32 %v1412_v20, %v561_v19  ;;  %vm569_vm2 = vweird.f32 %v1412_v20  ;;  %v875_v19 = vsel %vm873_vm8, %v656_v18, 0 }
 0x130   : > { %vm570_vm4 = vmor %vm568_vm3, %vm569_vm2  ;;  %884 = vmatpush.bf16.msrb.mxu1 %v875_v19 }
 0x131   : > { %v564_v22 = vmul.f32 %v1412_v20, %v563_v21 }
 0x133   : > { %v565_v23 = vmul.f32 0.5, %v564_v22  ;;  %v746_v22 = vld [vmem:[#allocation4 + $0x8] sm:$0xff] }
 0x135   : > { %v566_v24 = vsub.f32 1.5, %v565_v23 }
 0x137   : > { %v567_v25 = vmul.f32 %v1412_v20, %v566_v24 }
 0x139   : > { %v571_v27 = vsel %vm570_vm4, %v1412_v20, %v567_v25 }
 0x13a   : > { %v572_v28 = vmul.f32 %v571_v27, %v555_v12  ;;  %v1881_v27 = vld [vmem:[#allocation4 + $0x10] sm:$0xff] }
 0x13c   : > { %v576_v30 = vmul.f32 %v1404_v26, %v572_v28 }
 0x13e   : > { %v580_v31 = vadd.f32 %v1405_v29, %v576_v30 }
 0x140   : > { %v581_v32 = vpack.c.bf16 %v580_v31, %v580_v31 }
 0x142   : > { %1286 = vmatmul.msk.bf16.vlgmr.msra.gmra.mxu0 %vm543_vm0, %v581_v32 }
 0x143   : > { %941 = vmatpush.bf16.msra.mxu0 %v932_v43  ;;  %v840_v43 = vld [vmem:[#allocation3 + $0x10] sm:$0xff] }
 0x1bf   : > { %v614_v36 = vpop.f32.mrf.mxu0 }
 0x1c0   : > { %v615_v37 = vadd.f32 %v1406_v35, %v614_v36  ;;  %v658_v36 = vld [vmem:[%s1869_s22 + $0x8] sm:$0xf] }
 0x1c2   : > { %v618_v38 = vmul.f32 0.35355338, %v615_v37  ;;  %v913_v37 = vsel %vm873_vm8, %v658_v36, 0 }
 0x1c3   : > { %922 = vmatpush.bf16.msrb.mxu3 %v913_v37 }
 0x1c4   : > { %v619_v39 = vpack.c.bf16 %v618_v38, %v618_v38  ;;  %v657_v38 = vld [vmem:[%s1869_s22 + $0x4] sm:$0xf] }
 0x1c6   : > { %621 = vst.msk [vmem:[#allocation2] sm:$0xf] %vm620_vm6, %v619_v39  ;;  %633 = vrot.lane.b32.xlu2 %v619_v39, %s1625_s27  ;;  %623 = vrot.lane.b32.xlu1 %v619_v39, %s1626_s30 }
 0x1c7   : > { %v616_v40 = vpop.f32.mrf.mxu0 }
 0x1cd   : > { %v661_v41 = vld [vmem:[#allocation2] sm:$0xf] }
 0x1ce   : > { %628 = vrot.lane.b32.xlu1 %v619_v39, %s1627_s20  ;;  %1287 = vmatmul.msk.bf16.vlgmr.msra.gmra.mxu1 %vm638_vm5, %v661_v41  ;;  %v894_v39 = vsel %vm873_vm8, %v657_v38, 0 }
 0x1cf   : > { %903 = vmatpush.bf16.msrb.mxu2 %v894_v39 }
 0x220   : > { %v634_v46 = vpop.permute.xlu2 %633 }
 0x221   : > { %637 = vst.msk [vmem:[#allocation2 + $0xc] sm:$0xf] %vm620_vm6, %v634_v46 }
 0x228   : > { %v664_v49 = vld [vmem:[#allocation2 + $0xc] sm:$0xf] }
 0x229   : > { %1290 = vmatmul.msk.bf16.vlgmr.msrb.gmra.mxu0 %vm638_vm5, %v664_v49 }
 0x238   : > { %v624_v50 = vpop.permute.xlu1 %623 }
 0x239   : > { %627 = vst.msk [vmem:[#allocation2 + $0x4] sm:$0xf] %vm620_vm6, %v624_v50 }
 0x240   : > { %v629_v51 = vpop.permute.xlu1 %628  ;;  %v662_v52 = vld [vmem:[#allocation2 + $0x4] sm:$0xf] }
 0x241   : > { %632 = vst.msk [vmem:[#allocation2 + $0x8] sm:$0xf] %vm620_vm6, %v629_v51  ;;  %1288 = vmatmul.msk.bf16.vlgmr.msra.gmra.mxu2 %vm638_vm5, %v662_v52  ;;  %v809_v51 = vld [vmem:[#allocation5] sm:$0xff] }
 0x248   : > { %v663_v53 = vld [vmem:[#allocation2 + $0x8] sm:$0xf] }
 0x249   : > { %1289 = vmatmul.msk.bf16.vlgmr.msra.gmra.mxu3 %vm638_vm5, %v663_v53 }
 0x24b   : > { %v684_v55 = vpop.f32.mrf.mxu1 }
 0x24c   : > { %v685_v56 = vadd.f32 %v1407_v54, %v684_v55 }
 0x24e   : > { %v749_v57 = vsel %vm638_vm5, %v685_v56, -inf }
 0x24f   : > { %750 = vmax.xlane.f32.xlu1 %v749_v57 }
 0x253   : > { %v686_v58 = vpop.f32.mrf.mxu1 }
 0x2a6   : > { %v741_v61 = vpop.f32.mrf.mxu0 }
 0x2a7   : > { %v1844_v62 = vadd.f32 %v1407_v54, %v741_v61 }
 0x2a9   : > { %v758_v0 = vsel %vm638_vm5, %v1844_v62, -inf }
 0x2aa   : > { %759 = vmax.xlane.f32.xlu0 %v758_v0 }
 0x2ae   : > { %v743_v1 = vpop.f32.mrf.mxu0 }
 0x2c2   : > { %v751_v3 = vpop.xlane.xlu1 %750 }
 0x2c3   : > { %v761_v4 = vmax.f32 %v745_v2, %v751_v3 }
 0x2c4   : > { %v703_v5 = vpop.f32.mrf.mxu2 }
 0x2c5   : > { %v765_v6 = vsub.f32 %v745_v2, %v761_v4  ;;  %955 = vst.msk [vmem:[#allocation4] sm:$0xff] %vm643_vm7, %v761_v4  ;;  %v1857_v7 = vadd.f32 %v1407_v54, %v703_v5  ;;  %779 = vperm.xlu1 %1403, %v761_v4  }
 0x2c7   : > { %v752_v8 = vsel %vm638_vm5, %v1857_v7, -inf  ;;  %v769_v34 = vmul.f32 1.442695, %v765_v6 }
 0x2c8   : > { %753 = vmax.xlane.f32.xlu2 %v752_v8  ;;  %v838_v8 = vld [vmem:[#allocation3] sm:$0xff] }
 0x2cc   : > { %v705_v9 = vpop.f32.mrf.mxu2  ;;  %v722_v10 = vpop.f32.mrf.mxu3 }
 0x2cd   : > { %v723_v11 = vadd.f32 %v1407_v54, %v722_v10 }
 0x2cf   : > { %v755_v12 = vsel %vm638_vm5, %v723_v11, -inf }
 0x2d0   : > { %756 = vmax.xlane.f32.xlu0 %v755_v12 }
 0x2d4   : > { %v724_v13 = vpop.f32.mrf.mxu3 }
 0x31d   : > { %v760_v15 = vpop.xlane.xlu0 %759 }
 0x31e   : > { %v1872_v16 = vmax.f32 %v1862_v14, %v760_v15  ;;  %v811_v15 = vld [vmem:[#allocation5 + $0x10] sm:$0xff] }
 0x320   : > { %v768_v17 = vsub.f32 %v1862_v14, %v1872_v16  ;;  %958 = vst.msk [vmem:[#allocation4 + $0x18] sm:$0xff] %vm643_vm7, %v1872_v16  ;;  %v1009_v14 = vld [vmem:[%s1974_s8] sm:$0xf] }
 0x322   : > { %v775_v63 = vmul.f32 1.442695, %v768_v17 }
 0x337   : > { %v780_v20 = vpop.permute.xlu1 %779 }
 0x338   : > { %v797_v21 = vsub.f32 %v685_v56, %v780_v20 }
 0x33a   : > { %v801_v23 = vmul.f32 1.442695, %v797_v21  ;;  %v1296_v21 = vld [vmem:[%s1974_s8 + $0x4] sm:$0xf] }
 0x33b   : > { %v754_v24 = vpop.xlane.xlu2 %753 }
 0x33c   : > { %1413 = vpow2.f32 %v801_v23  ;;  %v762_v25 = vmax.f32 %v746_v22, %v754_v24  ;;  %v810_v23 = vld [vmem:[#allocation5 + $0x8] sm:$0xff]  ;;  %v1036_v24 = vsel %vm873_vm8, %v1296_v21, 0 }
 0x33d   : > { %1415 = vpow2.f32 %v769_v34  ;;  %1045 = vmatpush.bf16.msra.mxu2 %v1036_v24 }
 0x33e   : > { %v766_v26 = vsub.f32 %v746_v22, %v762_v25  ;;  %956 = vst.msk [vmem:[#allocation4 + $0x8] sm:$0xff] %vm643_vm7, %v762_v25  ;;  %784 = vperm.xlu0 %1401, %v762_v25   ;;  %v1298_v22 = vld [vmem:[%s1974_s8 + $0x8] sm:$0xf] }
 0x33f   : > { %v1058_v25 = vsel %vm873_vm8, %v1298_v22, 0 }
 0x340   : > { %v771_v52 = vmul.f32 1.442695, %v766_v26  ;;  %1067 = vmatpush.bf16.msra.mxu3 %v1058_v25 }
 0x342   : > { %v1414_v28 = vpop.eup %1413 }
 0x343   : > { %v757_v29 = vpop.xlane.xlu0 %756  ;;  %v817_v30 = vsel %vm638_vm5, %v1414_v28, 0.0  ;;  %v866_v31 = vpack.c.bf16 %v1414_v28, %v1414_v28  ;;  %v1416_v35 = vpop.eup %1415 }
 0x344   : > { %v1885_v32 = vmax.f32 %v1881_v27, %v757_v29  ;;  %818 = vadd.xlane.f32.xlu1 %v817_v30  ;;  %v813_v53 = vmul.f32 %v1416_v35, %v809_v51 }
 0x345   : > { %1291 = vmatmul.msk.bf16.vlgmr.msrb.gmra.mxu1 %vm638_vm5, %v866_v31  ;;  %v812_v31 = vld [vmem:[#allocation5 + $0x18] sm:$0xff] }
 0x346   : > { %v767_v33 = vsub.f32 %v1881_v27, %v1885_v32  ;;  %957 = vst.msk [vmem:[#allocation4 + $0x10] sm:$0xff] %vm643_vm7, %v1885_v32  ;;  %794 = vperm.xlu0 %1401, %v1872_v16   ;;  %789 = vperm.xlu2 %1402, %v1885_v32   ;;  %v1014_v16 = vsel %vm873_vm8, %v1009_v14, 0 }
 0x347   : > { %1023 = vmatpush.bf16.msra.mxu1 %v1014_v16 }
 0x35d   : > { %844 = vperm.xlu1 %1403, %v1416_v35  }
 0x3a0   : > { %v790_v40 = vpop.permute.xlu2 %789 }
 0x3a1   : > { %v799_v41 = vsub.f32 %v723_v11, %v790_v40  ;;  %v773_v11 = vmul.f32 1.442695, %v767_v33 }
 0x3a3   : > { %v805_v44 = vmul.f32 1.442695, %v799_v41  ;;  %v839_v41 = vld [vmem:[#allocation3 + $0x8] sm:$0xff] }
 0x3a5   : > { %1417 = vpow2.f32 %v805_v44  ;;  %v841_v44 = vld [vmem:[#allocation3 + $0x18] sm:$0xff] }
 0x3ab   : > { %v1418_v45 = vpop.eup %1417 }
 0x3ac   : > { %v823_v46 = vsel %vm638_vm5, %v1418_v45, 0.0  ;;  %v868_v47 = vpack.c.bf16 %v1418_v45, %v1418_v45 }
 0x3ad   : > { %824 = vadd.xlane.f32.xlu0 %v823_v46 }
 0x3ae   : > { %1293 = vmatmul.msk.bf16.vlgmr.msrb.gmra.mxu3 %vm638_vm5, %v868_v47 }
 0x3b0   : > { %v785_v48 = vpop.permute.xlu0 %784 }
 0x3b1   : > { %v798_v49 = vsub.f32 %v1857_v7, %v785_v48 }
 0x3b3   : > { %v803_v50 = vmul.f32 1.442695, %v798_v49 }
 0x3b5   : > { %1419 = vpow2.f32 %v803_v50 }
 0x3b6   : > { %1421 = vpow2.f32 %v771_v52 }
 0x3b7   : > { %v819_v54 = vpop.xlane.xlu1 %818 }
 0x3b8   : > { %v829_v55 = vadd.f32 %v819_v54, %v813_v53  ;;  %v795_v56 = vpop.permute.xlu0 %794 }
 0x3b9   : > { %v800_v57 = vsub.f32 %v1844_v62, %v795_v56 }
 0x3ba   : > { %834 = vst.msk [vmem:[#allocation5] sm:$0xff] %vm643_vm7, %v829_v55 }
 0x3bb   : > { %v1420_v58 = vpop.eup %1419  ;;  %v807_v59 = vmul.f32 1.442695, %v800_v57 }
 0x3bc   : > { %v820_v60 = vsel %vm638_vm5, %v1420_v58, 0.0  ;;  %v867_v61 = vpack.c.bf16 %v1420_v58, %v1420_v58  ;;  %v1422_v0 = vpop.eup %1421 }
 0x3bd   : > { %1423 = vpow2.f32 %v807_v59  ;;  %821 = vadd.xlane.f32.xlu2 %v820_v60  ;;  %v814_v26 = vmul.f32 %v1422_v0, %v810_v23  ;;  %v1300_v60 = vld [vmem:[%s1974_s8 + $0xc] sm:$0xf] }
 0x3be   : > { %1292 = vmatmul.msk.bf16.vlgmr.msrb.gmra.mxu2 %vm638_vm5, %v867_v61  ;;  %1425 = vpow2.f32 %v775_v63  ;;  %v1080_v61 = vsel %vm873_vm8, %v1300_v60, 0 }
 0x3bf   : > { %1089 = vmatpush.bf16.msrb.mxu0 %v1080_v61 }
 0x3c1   : > { %849 = vperm.xlu0 %1401, %v1422_v0   ;;  %v962_v62 = vld [vmem:[#allocation5] sm:$0xff] }
 0x3c2   : > { %v886_v1 = vpop.f32.mrf.mxu1  ;;  %1427 = vrcp.f32 %v962_v62 }
 0x3c3   : > { %v1424_v2 = vpop.eup %1423  ;;  %1429 = vpow2.f32 %v773_v11 }
 0x3c4   : > { %v869_v3 = vpack.c.bf16 %v1424_v2, %v1424_v2  ;;  %v826_v4 = vsel %vm638_vm5, %v1424_v2, 0.0  ;;  %v1426_v5 = vpop.eup %1425 }
 0x3c5   : > { %827 = vadd.xlane.f32.xlu2 %v826_v4  ;;  %v816_v33 = vmul.f32 %v1426_v5, %v812_v31 }
 0x3c6   : > { %1294 = vmatmul.msk.bf16.vlgmr.msra.gmra.mxu0 %vm638_vm5, %v869_v3 }
 0x3c8   : > { %v1428_v6 = vpop.eup %1427 }
 0x3c9   : > { %859 = vperm.xlu0 %1401, %v1426_v5   ;;  %976 = vperm.xlu1 %1403, %v1428_v6   ;;  %v1430_v13 = vpop.eup %1429 }
 0x3ca   : > { %v888_v7 = vpop.f32.mrf.mxu1  ;;  %v815_v17 = vmul.f32 %v1430_v13, %v811_v15 }
 0x3cf   : > { %v845_v9 = vpop.permute.xlu1 %844 }
 0x3d0   : > { %v862_v10 = vmul.f32 %v845_v9, %v838_v8 }
 0x3d2   : > { %v947_v12 = vadd.f32 %v886_v1, %v862_v10  ;;  %v1002_v10 = vld [vmem:[%s1805_s21] sm:$0xf] }
 0x3d3   : > { %v1003_v11 = vunpack.c.l.bf16 %v1002_v10 }
 0x3d4   : > { %951 = vst.msk [vmem:[#allocation3] sm:$0xff] %vm638_vm5, %v947_v12  ;;  %v1408_v12 = vld [vmem:[#allocation11] ss:$0 sm:$0xff] }
 0x3db   : > { %v970_v38 = vld [vmem:[#allocation3] sm:$0xff] }
 0x3dd   : > { %854 = vperm.xlu2 %1402, %v1430_v13   ;;  %v1008_v13 = vadd.f32 %v1408_v12, %v1003_v11 }
 0x420   : > { %v825_v18 = vpop.xlane.xlu0 %824 }
 0x421   : > { %v831_v19 = vadd.f32 %v825_v18, %v815_v17 }
 0x423   : > { %836 = vst.msk [vmem:[#allocation5 + $0x10] sm:$0xff] %vm643_vm7, %v831_v19 }
 0x42a   : > { %v964_v20 = vld [vmem:[#allocation5 + $0x10] sm:$0xff] }
 0x42b   : > { %1431 = vrcp.f32 %v964_v20 }
 0x430   : > { %v822_v27 = vpop.xlane.xlu2 %821 }
 0x431   : > { %v1432_v28 = vpop.eup %1431  ;;  %v830_v29 = vadd.f32 %v822_v27, %v814_v26  ;;  %v924_v30 = vpop.f32.mrf.mxu3 }
 0x432   : > { %986 = vperm.xlu0 %1401, %v1432_v28  }
 0x433   : > { %835 = vst.msk [vmem:[#allocation5 + $0x8] sm:$0xff] %vm643_vm7, %v830_v29  ;;  %v850_v32 = vpop.permute.xlu0 %849 }
 0x434   : > { %v863_v46 = vmul.f32 %v850_v32, %v839_v41 }
 0x438   : > { %v828_v34 = vpop.xlane.xlu2 %827 }
 0x439   : > { %v832_v35 = vadd.f32 %v828_v34, %v816_v33  ;;  %v926_v36 = vpop.f32.mrf.mxu3 }
 0x43a   : > { %v963_v37 = vld [vmem:[#allocation5 + $0x8] sm:$0xff] }
 0x43b   : > { %837 = vst.msk [vmem:[#allocation5 + $0x18] sm:$0xff] %vm643_vm7, %v832_v35  ;;  %v977_v39 = vpop.permute.xlu1 %976  ;;  %1433 = vrcp.f32 %v963_v37  ;;  %v860_v45 = vpop.permute.xlu0 %859 }
 0x43c   : > { %v994_v40 = vmul.f32 %v977_v39, %v970_v38  ;;  %v865_v51 = vmul.f32 %v860_v45, %v841_v44 }
 0x43e   : > { %v998_v42 = vpack.c.bf16 %v994_v40, %v994_v40 }
 0x440   : > { %v855_v47 = vpop.permute.xlu2 %854  ;;  %1295 = vmatmul.msk.bf16.vlgmr.msra.gmra.mxu1 %vm638_vm5, %v998_v42 }
 0x441   : > { %v1434_v48 = vpop.eup %1433  ;;  %v864_v49 = vmul.f32 %v855_v47, %v840_v43  ;;  %v905_v50 = vpop.f32.mrf.mxu2 }
 0x442   : > { %v948_v52 = vadd.f32 %v905_v50, %v863_v46  ;;  %981 = vperm.xlu2 %1402, %v1434_v48   ;;  %v965_v53 = vld [vmem:[#allocation5 + $0x18] sm:$0xff] }
 0x443   : > { %v949_v54 = vadd.f32 %v924_v30, %v864_v49  ;;  %v943_v55 = vpop.f32.mrf.mxu0  ;;  %1435 = vrcp.f32 %v965_v53 }
 0x444   : > { %952 = vst.msk [vmem:[#allocation3 + $0x8] sm:$0xff] %vm638_vm5, %v948_v52  ;;  %v950_v56 = vadd.f32 %v943_v55, %v865_v51 }
 0x445   : > { %953 = vst.msk [vmem:[#allocation3 + $0x10] sm:$0xff] %vm638_vm5, %v949_v54 }
 0x446   : > { %954 = vst.msk [vmem:[#allocation3 + $0x18] sm:$0xff] %vm638_vm5, %v950_v56 }
 0x449   : > { %v1436_v57 = vpop.eup %1435  ;;  %v907_v58 = vpop.f32.mrf.mxu2 }
 0x44a   : > { %991 = vperm.xlu2 %1402, %v1436_v57  }
 0x44b   : > { %v945_v59 = vpop.f32.mrf.mxu0  ;;  %v971_v0 = vld [vmem:[#allocation3 + $0x8] sm:$0xff] }
 0x44c   : > { %v972_v4 = vld [vmem:[#allocation3 + $0x10] sm:$0xff] }
 0x44d   : > { %v973_v3 = vld [vmem:[#allocation3 + $0x18] sm:$0xff] }
 0x49c   : > { %v982_v63 = vpop.permute.xlu2 %981 }
 0x49d   : > { %v995_v62 = vmul.f32 %v982_v63, %v971_v0 }
 0x49f   : > { %v999_v1 = vpack.c.bf16 %v995_v62, %v995_v62 }
 0x4a1   : > { %1297 = vmatmul.msk.bf16.vlgmr.msra.gmra.mxu2 %vm638_vm5, %v999_v1 }
 0x4a4   : > { %v992_v2 = vpop.permute.xlu2 %991  ;;  %v987_v5 = vpop.permute.xlu0 %986 }
 0x4a5   : > { %v997_v6 = vmul.f32 %v992_v2, %v973_v3  ;;  %v996_v7 = vmul.f32 %v987_v5, %v972_v4 }
 0x4a7   : > { %v1001_v8 = vpack.c.bf16 %v997_v6, %v997_v6  ;;  %v1000_v9 = vpack.c.bf16 %v996_v7, %v996_v7 }
 0x4a9   : > { %1299 = vmatmul.msk.bf16.vlgmr.msra.gmra.mxu3 %vm638_vm5, %v1000_v9  ;;  %1301 = vmatmul.msk.bf16.vlgmr.msrb.gmra.mxu0 %vm638_vm5, %v1001_v8 }
 0x4bd   : > { %v1025_v14 = vpop.f32.mrf.mxu1 }
 0x4be   : > { %v1029_v15 = vadd.f32 %v1025_v14, %v1008_v13 }
 0x4c5   : > { %v1027_v16 = vpop.f32.mrf.mxu1 }
 0x524   : > { %v1047_v17 = vpop.f32.mrf.mxu2 }
 0x525   : > { %v1051_v19 = vadd.f32 %v1047_v17, %v1029_v15 }
 0x526   : > { %v1091_v18 = vpop.f32.mrf.mxu0 }
 0x52c   : > { %v1049_v20 = vpop.f32.mrf.mxu2  ;;  %v1069_v21 = vpop.f32.mrf.mxu3 }
 0x52d   : > { %v1073_v22 = vadd.f32 %v1069_v21, %v1051_v19 }
 0x52e   : > { %v1093_v23 = vpop.f32.mrf.mxu0 }
 0x52f   : > { %v1095_v24 = vadd.f32 %v1091_v18, %v1073_v22 }
 0x531   : > { %v1096_v25 = vpack.c.bf16 %v1095_v24, %v1095_v24 }
 0x533   : > { %1098 = vst.msk [vmem:[%s533_s11] sm:$0xf] %vm1097_vm9, %v1096_v25 }
 0x534   : > { %v1071_v26 = vpop.f32.mrf.mxu3 }
 0x535 PF: > { %s22_s18 = sadd.s32 1, %s1619_s18   ;;  %s1987_s13 = smov %s1603_s14 }
 0x536   : > { %p19_p1 = scmp.ge.s32.totalorder %s22_s18, 4   ;;  %s1988_s14 = smov %s1607_s15 }
 0x537   : > { %s1989_s15 = smov %s1768_s26  ;;  %s1990_s16 = smov %s1615_s17 }
 0x538   : > { %s1991_s17 = smov %s1993_s29  ;;  %21 = sbr.rel (!%p19_p1) target bundleno = 7 (0x7), region = 134 }
 0x53d   :  { %1124 = vsyncpa [#allocation7], 1 }
 0x53e   :  { %1126 = vsyncpa [#allocation7 + $0x1], 1 }
 0x53f   :  { %1127 = vsyncpa [#allocation9], 1 }

// kernel: cond_conformer_layer.11
= control target key start
LH: loop header
LB: loop body
LE: loop exit
PB: predicated region body
PF: predicated region fallthrough
CT: control target
= control target key end

     0   :  { %12 = vsyncpa [#allocation3], 0  ;;  %s1018_s0 = inlined_call_operand.hbm [shape: f32[2,8,24], index: 0, kind: input, shape index: {}]   ;;  %s1019_s1 = inlined_call_operand.vmem [shape: f32[1,24], index: 1, kind: input, shape index: {}]   ;;  %s1020_s2 = inlined_call_operand.vmem [shape: f32[1,24], index: 2, kind: input, shape index: {}]   ;;  %s1021_s3 = inlined_call_operand.hbm [shape: bf16[24,64], index: 3, kind: input, shape index: {}]   ;;  %s1022_s4 = inlined_call_operand.hbm [shape: f32[1,64], index: 4, kind: input, shape index: {}]   ;;  %s1023_s5 = inlined_call_operand.vmem [shape: bf16[2,4,8,8], index: 5, kind: output, shape index: {0}]   ;;  %s1024_s6 = inlined_call_operand.vmem [shape: bf16[2,4,8,8], index: 6, kind: output, shape index: {1}]  }
   0x1   :  { %14 = vsyncpa [#allocation3 + $0x1], 0 }
   0x2   :  { %15 = vsyncpa [#allocation5], 0  ;;  %s890_s21 = smov 0   ;;  %s892_s1 = smov 0  }
   0x3   :  { %s894_s2 = smov 0   ;;  %s896_s22 = smov 0  }
   0x4   :  { %s898_s23 = smov 0   ;;  %s900_s24 = smov 0  }
   0x5 LB: > { %s580_s25 = sadd.s32 4294967295, %s842_s24   ;;  %p582_p0 = scmp.ge.s32.totalorder %s842_s24, 1  ;;  %s842_s24 = sphi %s900_s24, %s21_s24   ;;  %s838_s23 = sphi %s898_s23, %s1033_s23   ;;  %s834_s22 = sphi %s896_s22, %s1032_s22   ;;  %s830_s2 = sphi %s894_s2, %s1031_s2   ;;  %s826_s1 = sphi %s892_s1, %s1030_s1   ;;  %s822_s21 = sphi %s890_s21, %s1029_s21  }
   0x6   : > { %p922_p1 = scmp.eq.s32.totalorder %s580_s25, 0  ;;  %p206_p2 = scmp.lt.s32.totalorder %s842_s24, 3 }
   0x7   : > { %s223_s29 = sshll.u32 %s1021_s3, 4  ;;  %s844_s7 = smov [#allocation4]   ;;  %s224_s29 = int_to_ptr.hbm [resolvable:$true] %s223_s29 }
   0x8   : > { %p930_p3 = pnand %p582_p0, %p206_p2  ;;  %s225_s8 = sshll.u32 %s844_s7, 4  ;;  %s226_s8 = int_to_ptr.vmem [resolvable:$true] %s225_s8 }
   0x9   : > { %s238_s11 = sshll.u32 %s1022_s4, 4  ;;  %s845_s12 = smov 64   ;;  %s239_s11 = int_to_ptr.hbm [resolvable:$true] %s238_s11 }
   0xa   : > { %p622_p4 = pneg %p930_p3  ;;  %s846_s13 = smov 4  }
   0xb   : > { %s847_s14 = smov [#allocation6]   ;;  %s33_s16 = sadd.s32 1, %s838_s23 }
   0xc   : > { %p623_p5 = pnand %p622_p4, %p922_p1  ;;  %s240_s15 = sshll.u32 %s847_s14, 4  ;;  %s241_s15 = int_to_ptr.vmem [resolvable:$true] %s240_s15 }
   0xd   : > { %s42_s17 = sadd.s32 1, %s830_s2  ;;  %p35_p6 = scmp.ge.s32.totalorder %s33_s16, 2 }
   0xe   : > { %625 = dma.hbm_to_vmem [thread:$0]  (!%p623_p5), %s224_s29, 192, %s226_s8, [#allocation5], %s845_s12, %s845_s12, %s846_s13  }
   0xf   : > { %628 = dma.hbm_to_vmem [thread:$0]  (!%p623_p5), %s239_s11, 16, %s241_s15, [#allocation5]  }
  0x10   : > { %p49_p7 = scmp.ne.s32.totalorder %s830_s2, %s826_s1  ;;  %p50_p8 = scmp.eq.s32.totalorder %s842_s24, 0 }
  0x11   : > { %p55_p9 = scmp.ne.s32.totalorder %s826_s1, %s822_s21  ;;  %s1035_s16 = smov (%p35_p6, %s33_s16), 0 }
  0x12   : > { %p950_p10 = por %p50_p8, %p49_p7  ;;  %s37_s20 = ssub.s32 %s838_s23, %s1035_s16 }
  0x13   : > { %p956_p11 = por %p922_p1, %p55_p9  ;;  %p635_p12 = scmp.lt.s32.totalorder %s842_s24, 2 }
  0x14   : > { %p40_p13 = scmp.eq.s32.totalorder %s37_s20, 0  ;;  %s251_s25 = sand.u32 1, %s830_s2  }
  0x15   : > { %s586_s27 = sshll.u32 %s251_s25, 3  ;;  %s587_s21 = sshll.u32 %s838_s23, 3 }
  0x16   : > { %s965_s28 = scalar_select %p40_p13, %s830_s2, %s42_s17  }
  0x17   : > { %s260_s8 = scalar_lea.hbm %s1018_s0, %s587_s21  ;;  %s255_s9 = scalar_lea.vmem [#allocation2], %s586_s27 }
  0x18   : > { %s264_s10 = sshll.u32 %s255_s9, 4  ;;  %s262_s11 = sshll.u32 %s260_s8, 4  ;;  %s265_s10 = int_to_ptr.vmem [resolvable:$true] %s264_s10  ;;  %s263_s11 = int_to_ptr.hbm [resolvable:$true] %s262_s11 }
  0x19   : > { %p630_p0 = pnand %p635_p12, %p950_p10  ;;  %s252_s12 = scalar_lea.sflag [#allocation3], %s251_s25 }
  0x1a   : > { %273 = sbr.rel (%p930_p3) target bundleno = 310 (0x136), region = 40  ;;  %s275_s13 = sand.u32 (!%p930_p3), 1, %s826_s1  }
  0x1b   : > { %632 = dma.hbm_to_vmem [thread:$0]  (!%p630_p0), %s263_s11, 128, %s265_s10, %s252_s12  }
  0x1c   : > { %s589_s14 = sshll.u32 (!%p930_p3), %s275_s13, 3  ;;  %s276_s15 = scalar_lea.sflag (!%p930_p3), [#allocation3], %s275_s13 }
  0x1d   : > { %s279_s17 = scalar_lea.vmem (!%p930_p3), [#allocation2], %s589_s14 }
  0x1f   : > { %813 = dma.done.wait (%p956_p11), %s276_s15, 128  }
  0x20   : > { %815 = vsyncadd (%p956_p11), %s276_s15, 4294967168 }
  0x21   : > { %817 = dma.done.wait (%p922_p1), [#allocation5], 208  }
  0x22   : > { %819 = vsyncadd (%p922_p1), [#allocation5], 4294967088  ;;  %v351_v0 = vld [vmem:[#allocation4 + $0x8] sm:$0xf]  ;;  %vm369_vm0 = vcmask 1043456   ;;  %v611_v4 = vld [vmem:[#allocation4] sm:$0xff] }
  0x23   : > { %v361_v1 = vunpack.c.l.b16 %v351_v0  ;;  %v347_v5 = vld [vmem:[%s279_s17] sm:$0xff]  ;;  %vm365_vm1 = vcmask 195584   ;;  %p330_p2 = scmp.lt.s32.totalorder %s834_s22, 1  ;;  %v697_v7 = vld [vmem:[#allocation6] ss:$0 sm:$0xff]  ;;  %vm387_vm2 = vcmask 60416  }
  0x24   : > { %v348_v6 = vpack.c.bf16 %v347_v5, %v347_v5  ;;  %s848_s20 = smov 80   ;;  %s849_s25 = smov 88  }
  0x25   : > { %v363_v2 = vpack.c.b16 %v361_v1, %v361_v1  ;;  %s1037_s22 = smov (!%p330_p2, %s834_s22), 1  ;;  %s850_s27 = smov 96  }
  0x26   : > { %s609_s30 = sshll.u32 %s1037_s22, 4  ;;  %s851_s21 = smov 104  }
  0x27   : > { %v371_v3 = vsel %vm369_vm0, %v363_v2, 0  ;;  %s337_s19 = scalar_lea.vmem %s1023_s5, %s609_s30  ;;  %s852_s22 = smov 112  }
  0x28   : > { %379 = vmatpush.bf16.msra.mxu0 %v371_v3  ;;  %s853_s29 = smov 120   ;;  %s854_s7 = smov 72  }
  0x29   : > { %s345_s10 = scalar_lea.vmem %s1024_s6, %s609_s30 }
  0x2c   : > { %380 = vmatpush.bf16.msra.mxu0 %v611_v4 }
  0x2f   : > { %600 = vmatmul.msk.bf16.vlgmr.msra.gmra.mxu0 %vm365_vm1, %v348_v6 }
  0xac   : > { %v382_v8 = vpop.f32.mrf.mxu0 }
  0xad   : > { %v383_v9 = vadd.f32 %v697_v7, %v382_v8 }
  0xaf   : > { %v386_v10 = vpack.c.bf16 %v383_v9, %v383_v9 }
  0xb1   : > { %409 = vrot.lane.b32.xlu2 %v386_v10, %s848_s20  ;;  %399 = vrot.lane.b32.xlu1 %v386_v10, %s849_s25  ;;  %388 = vst.msk [vmem:[%s337_s19] sm:$0xf] %vm387_vm2, %v386_v10 }
  0xb2   : > { %390 = vrot.lane.b32.xlu0 %v386_v10, %s850_s27 }
  0xb4   : > { %v384_v11 = vpop.f32.mrf.mxu0 }
  0xb9   : > { %414 = vrot.lane.b32.xlu2 %v386_v10, %s851_s21  ;;  %404 = vrot.lane.b32.xlu1 %v386_v10, %s852_s22 }
  0xba   : > { %394 = vrot.lane.b32.xlu0 %v386_v10, %s853_s29 }
  0xc2   : > { %419 = vrot.lane.b32.xlu0 %v386_v10, %s854_s7 }
 0x10b   : > { %v410_v12 = vpop.permute.xlu2 %409 }
 0x10c   : > { %604 = vst.msk [vmem:[%s345_s10 + $0x8] sm:$0xf] %vm387_vm2, %v410_v12 }
 0x113   : > { %v415_v13 = vpop.permute.xlu2 %414 }
 0x114   : > { %605 = vst.msk [vmem:[%s337_s19 + $0xc] sm:$0xf] %vm387_vm2, %v415_v13 }
 0x123   : > { %v400_v14 = vpop.permute.xlu1 %399 }
 0x124   : > { %602 = vst.msk [vmem:[%s345_s10 + $0x4] sm:$0xf] %vm387_vm2, %v400_v14  ;;  %v391_v15 = vpop.permute.xlu0 %390 }
 0x125   : > { %393 = vst.msk [vmem:[%s345_s10] sm:$0xf] %vm387_vm2, %v391_v15 }
 0x12b   : > { %v405_v16 = vpop.permute.xlu1 %404 }
 0x12c   : > { %603 = vst.msk [vmem:[%s337_s19 + $0x8] sm:$0xf] %vm387_vm2, %v405_v16  ;;  %v395_v17 = vpop.permute.xlu0 %394 }
 0x12d   : > { %601 = vst.msk [vmem:[%s337_s19 + $0x4] sm:$0xf] %vm387_vm2, %v395_v17 }
 0x134   : > { %v420_v18 = vpop.permute.xlu0 %419 }
 0x135   : > { %606 = vst.msk [vmem:[%s345_s10 + $0xc] sm:$0xf] %vm387_vm2, %v420_v18 }
 0x136 PF: > { %s21_s24 = sadd.s32 1, %s842_s24   ;;  %s1029_s21 = smov %s826_s1 }
 0x137   : > { %p18_p1 = scmp.ge.s32.totalorder %s21_s24, 4   ;;  %s1030_s1 = smov %s830_s2 }
 0x138   : > { %s1031_s2 = smov %s965_s28  ;;  %s1032_s22 = smov %s838_s23 }
 0x139   : > { %s1033_s23 = smov %s1035_s16  ;;  %20 = sbr.rel (!%p18_p1) target bundleno = 5 (0x5), region = 106 }
 0x13e   :  { %473 = vsyncpa [#allocation3], 1 }
 0x13f   :  { %475 = vsyncpa [#allocation3 + $0x1], 1 }
 0x140   :  { %476 = vsyncpa [#allocation5], 1 }

// kernel: cond_conformer_layer.12
= control target key start
LH: loop header
LB: loop body
LE: loop exit
PB: predicated region body
PF: predicated region fallthrough
CT: control target
= control target key end

     0   :  { %s2465_s0 = inlined_call_operand.vmem [shape: bf16[2,8,32], index: 0, kind: input, shape index: {}]   ;;  %s2466_s1 = inlined_call_operand.hbm [shape: f32[1,32], index: 1, kind: input, shape index: {}]   ;;  %s2467_s2 = inlined_call_operand.hbm [shape: f32[1,32], index: 2, kind: input, shape index: {}]   ;;  %s2468_s3 = inlined_call_operand.hbm [shape: bf16[32,32], index: 3, kind: input, shape index: {}]   ;;  %s2469_s4 = inlined_call_operand.hbm [shape: f32[1,32], index: 4, kind: input, shape index: {}]   ;;  %s2470_s5 = inlined_call_operand.vmem [shape: bf16[2,4,8,8], index: 5, kind: input, shape index: {}]   ;;  %s2471_s6 = inlined_call_operand.vmem [shape: bf16[2,4,8,8], index: 6, kind: input, shape index: {}]   ;;  %s2472_s7 = inlined_call_operand.hbm [shape: f32[2,1,8], index: 7, kind: input, shape index: {}]   ;;  %s2473_s8 = inlined_call_operand.hbm [shape: bf16[4,8,32], index: 8, kind: input, shape index: {}]   ;;  %s2474_s9 = inlined_call_operand.hbm [shape: f32[1,32], index: 9, kind: input, shape index: {}]   ;;  %s2475_s10 = inlined_call_operand.hbm [shape: bf16[32,64], index: 10, kind: input, shape index: {}]   ;;  %s2476_s11 = inlined_call_operand.hbm [shape: f32[1,64], index: 11, kind: input, shape index: {}]   ;;  %s2477_s12 = inlined_call_operand.vmem [shape: bf16[2,8,32], index: 12, kind: output, shape index: {}]  }
   0x1   :  { %2479 = sst [smem:[#allocation26_spill]] %s2466_s1 }
   0x2   :  { %2480 = sst [smem:[#allocation27_spill]] %s2467_s2 }
   0x3   :  { %2481 = sst [smem:[#allocation28_spill]] %s2468_s3 }
   0x4   :  { %2482 = sst [smem:[#allocation29_spill]] %s2470_s5 }
   0x5   :  { %2483 = sst [smem:[#allocation30_spill]] %s2471_s6 }
   0x6   :  { %2484 = sst [smem:[#allocation31_spill]] %s2477_s12 }
   0x7   :  { %17 = vsyncpa [#allocation7], 0 }
   0x8   :  { %18 = vsyncpa [#allocation9], 0 }
   0x9   :  { %19 = vsyncpa [#allocation12], 0 }
   0xa   :  { %20 = vsyncpa [#allocation17], 0  ;;  %s2161_s21 = smov 0   ;;  %s2163_s22 = smov 0  }
   0xb   :  { %s2165_s23 = smov 0   ;;  %s2167_s24 = smov 0  }
   0xc   :  { %s2169_s25 = smov 0   ;;  %s2171_s26 = smov 0  }
   0xd LB: > { %s2485_s2 = sld [smem:[#allocation27_spill]]  ;;  %s2478_s30 = sadd.s32 4294967295, %s2076_s26   ;;  %s2076_s26 = sphi %s2171_s26, %s26_s26   ;;  %s2072_s25 = sphi %s2169_s25, %s2500_s25   ;;  %s2068_s24 = sphi %s2167_s24, %s2499_s24   ;;  %s2064_s23 = sphi %s2165_s23, %s2498_s23   ;;  %s2060_s22 = sphi %s2163_s22, %s2497_s22   ;;  %s2056_s21 = sphi %s2161_s21, %s2496_s21  }
   0xe   : > { %p1486_p0 = scmp.ge.s32.totalorder %s2076_s26, 1  ;;  %p2198_p1 = scmp.eq.s32.totalorder %s2478_s30, 0 }
   0xf   : > { %p358_p2 = scmp.lt.s32.totalorder %s2076_s26, 3  ;;  %s2078_s15 = smov [#allocation8]  }
  0x10   : > { %s384_s16 = sshll.u32 %s2078_s15, 4  ;;  %s2488_s1 = sld [smem:[#allocation26_spill]]  ;;  %s385_s16 = int_to_ptr.vmem [resolvable:$true] %s384_s16 }
  0x11   : > { %p2203_p3 = pnand %p1486_p0, %p358_p2  ;;  %s2490_s3 = sld [smem:[#allocation28_spill]] }
  0x12   : > { %s2079_s30 = smov [#allocation6]   ;;  %s2080_s17 = smov [#allocation10]  }
  0x13   : > { %s382_s29 = sshll.u32 %s2485_s2, 4  ;;  %p1583_p4 = pneg %p2203_p3  ;;  %s383_s29 = int_to_ptr.hbm [resolvable:$true] %s382_s29 }
  0x14   : > { %s372_s2 = sshll.u32 %s2079_s30, 4  ;;  %s395_s18 = sshll.u32 %s2080_s17, 4  ;;  %s373_s2 = int_to_ptr.vmem [resolvable:$true] %s372_s2  ;;  %s396_s18 = int_to_ptr.vmem [resolvable:$true] %s395_s18 }
  0x15   : > { %p2214_p5 = pnand %p1583_p4, %p2198_p1  ;;  %s408_s6 = sshll.u32 %s2469_s4, 4  ;;  %s409_s6 = int_to_ptr.hbm [resolvable:$true] %s408_s6 }
  0x16   : > { %s370_s19 = sshll.u32 %s2488_s1, 4  ;;  %s2081_s5 = smov 64   ;;  %s371_s19 = int_to_ptr.hbm [resolvable:$true] %s370_s19 }
  0x17   : > { %s393_s15 = sshll.u32 %s2490_s3, 4  ;;  %s2082_s27 = smov 4   ;;  %s394_s15 = int_to_ptr.hbm [resolvable:$true] %s393_s15 }
  0x18   : > { %1589 = dma.hbm_to_vmem [thread:$0]  (!%p2214_p5), %s383_s29, 16, %s385_s16, [#allocation9]  }
  0x19   : > { %1586 = dma.hbm_to_vmem [thread:$0]  (!%p2214_p5), %s371_s19, 16, %s373_s2, [#allocation7]  }
  0x1a   : > { %1592 = dma.hbm_to_vmem [thread:$0]  (!%p2214_p5), %s394_s15, 256, %s396_s18, [#allocation9], %s2081_s5, %s2081_s5, %s2082_s27  }
  0x1b   : > { %s2083_s30 = smov [#allocation11]   ;;  %s445_s2 = sshll.u32 %s2475_s10, 4  ;;  %s446_s2 = int_to_ptr.hbm [resolvable:$true] %s445_s2 }
  0x1c   : > { %s410_s29 = sshll.u32 %s2083_s30, 4  ;;  %s419_s12 = sshll.u32 %s2473_s8, 4  ;;  %s411_s29 = int_to_ptr.vmem [resolvable:$true] %s410_s29  ;;  %s420_s12 = int_to_ptr.hbm [resolvable:$true] %s419_s12 }
  0x1d   : > { %1595 = dma.hbm_to_vmem [thread:$0]  (!%p2214_p5), %s409_s6, 16, %s411_s29, [#allocation12]  }
  0x1e   : > { %s2084_s17 = smov [#allocation16]   ;;  %s2085_s15 = smov [#allocation14]  }
  0x1f   : > { %s447_s3 = sshll.u32 %s2084_s17, 4  ;;  %s421_s18 = sshll.u32 %s2085_s15, 4  ;;  %s448_s3 = int_to_ptr.vmem [resolvable:$true] %s447_s3  ;;  %s422_s18 = int_to_ptr.vmem [resolvable:$true] %s421_s18 }
  0x20   : > { %1604 = dma.hbm_to_vmem [thread:$0]  (!%p2214_p5), %s446_s2, 256, %s448_s3, [#allocation17], %s2081_s5, %s2081_s5, %s2082_s27  }
  0x21   : > { %s434_s28 = sshll.u32 %s2474_s9, 4  ;;  %s460_s3 = sshll.u32 %s2476_s11, 4  ;;  %s435_s28 = int_to_ptr.hbm [resolvable:$true] %s434_s28  ;;  %s461_s3 = int_to_ptr.hbm [resolvable:$true] %s460_s3 }
  0x22   : > { %1598 = dma.hbm_to_vmem [thread:$0]  (!%p2214_p5), %s420_s12, 256, %s422_s18, [#allocation9], %s2081_s5, %s2081_s5, %s2082_s27  }
  0x23   : > { %s2086_s2 = smov [#allocation15]   ;;  %s2087_s1 = smov [#allocation18]  }
  0x24   : > { %s436_s19 = sshll.u32 %s2086_s2, 4  ;;  %s462_s17 = sshll.u32 %s2087_s1, 4  ;;  %s437_s19 = int_to_ptr.vmem [resolvable:$true] %s436_s19  ;;  %s463_s17 = int_to_ptr.vmem [resolvable:$true] %s462_s17 }
  0x25   : > { %1601 = dma.hbm_to_vmem [thread:$0]  (!%p2214_p5), %s435_s28, 16, %s437_s19, [#allocation12]  }
  0x26   : > { %1607 = dma.hbm_to_vmem [thread:$0]  (!%p2214_p5), %s461_s3, 16, %s463_s17, [#allocation17]  }
  0x27   : > { %s45_s5 = sadd.s32 1, %s2072_s25  ;;  %p229_p7 = scmp.ne.s32.totalorder %s2064_s23, %s2060_s22 }
  0x28   : > { %p47_p6 = scmp.ge.s32.totalorder %s45_s5, 2  ;;  %p230_p8 = scmp.eq.s32.totalorder %s2076_s26, 0 }
  0x29   : > { %p235_p9 = scmp.ne.s32.totalorder %s2060_s22, %s2056_s21  ;;  %s222_s27 = sadd.s32 1, %s2064_s23 }
  0x2a   : > { %s2502_s5 = smov (%p47_p6, %s45_s5), 0  ;;  %p231_p11 = por %p230_p8, %p229_p7 }
  0x2b   : > { %p2263_p10 = por %p2198_p1, %p235_p9  ;;  %s217_s15 = ssub.s32 %s2072_s25, %s2502_s5 }
  0x2c   : > { %p220_p12 = scmp.eq.s32.totalorder %s217_s15, 0  ;;  %p1620_p13 = scmp.lt.s32.totalorder %s2076_s26, 2 }
  0x2d   : > { %s505_s20 = sand.u32 1, %s2076_s26   ;;  %s507_s18 = sand.u32 1, %s2064_s23  }
  0x2e   : > { %s2273_s30 = scalar_select %p220_p12, %s2064_s23, %s222_s27  }
  0x2f   : > { %s512_s21 = scalar_lea.hbm %s2472_s7, %s2072_s25  ;;  %s508_s29 = scalar_lea.vmem [#allocation13], %s507_s18 }
  0x30   : > { %s514_s6 = sshll.u32 %s512_s21, 4  ;;  %s516_s3 = sshll.u32 %s508_s29, 4  ;;  %s515_s6 = int_to_ptr.hbm [resolvable:$true] %s514_s6  ;;  %s517_s3 = int_to_ptr.vmem [resolvable:$true] %s516_s3 }
  0x31   : > { %p1609_p0 = pnand %p1620_p13, %p231_p11  ;;  %s506_s2 = scalar_lea.sflag [#allocation7], %s505_s20 }
  0x32   : > { %525 = sbr.rel (%p2203_p3) target bundleno = 1605 (0x645), region = 68 }
  0x33   : > { %1611 = dma.hbm_to_vmem [thread:$0]  (!%p1609_p0), %s515_s6, 16, %s517_s3, %s506_s2  }
  0x37   : > { %2027 = dma.done.wait (%p2198_p1), [#allocation7], 16  }
  0x38   : > { %2029 = vsyncadd (%p2198_p1), [#allocation7], 4294967280 }
  0x39   : > { %2031 = dma.done.wait (%p2198_p1), [#allocation9], 272  }
  0x3a   : > { %2033 = vsyncadd (%p2198_p1), [#allocation9], 4294967024 }
  0x3b   : > { %2035 = dma.done.wait (%p2198_p1), [#allocation12], 16  }
  0x3c   : > { %2037 = vsyncadd (%p2198_p1), [#allocation12], 4294967280  ;;  %s2492_s14 = sadd.s32 4294967295, %s2076_s26   ;;  %s549_s1 = sand.u32 1, %s2060_s22  }
  0x3d   : > { %s547_s19 = sand.u32 1, %s2492_s14   ;;  %s2296_s27 = scalar_lea.vmem [#allocation13], %s549_s1 }
  0x3e   : > { %s548_s17 = scalar_lea.sflag [#allocation7], %s547_s19 }
  0x3f   : > { %2039 = dma.done.wait (%p2263_p10), %s548_s17, 16  }
  0x40   : > { %2041 = vsyncadd (%p2263_p10), %s548_s17, 4294967280 }
  0x41   : > { %2043 = dma.done.wait (%p2198_p1), [#allocation9], 256  }
  0x42   : > { %2045 = vsyncadd (%p2198_p1), [#allocation9], 4294967040 }
  0x43   : > { %2047 = dma.done.wait (%p2198_p1), [#allocation12], 16  }
  0x44   : > { %2049 = vsyncadd (%p2198_p1), [#allocation12], 4294967280 }
  0x45   : > { %2051 = dma.done.wait (%p2198_p1), [#allocation17], 272  }
  0x46   : > { %2053 = vsyncadd (%p2198_p1), [#allocation17], 4294967024  ;;  %p636_p2 = scmp.lt.s32.totalorder %s2068_s24, 1  ;;  %vm675_vm0 = vcmask 261120   ;;  %v2088_v3 = vmov 32.0   ;;  %v1546_v15 = vld [vmem:[#allocation10 + $0x8] sm:$0xff] }
  0x47   : > { %1704 = vrcp.f32 %v2088_v3  ;;  %743 = vmatpush.bf16.msra.mxu0 %v1546_v15  ;;  %v1545_v16 = vld [vmem:[#allocation10] sm:$0xff]  ;;  %v1698_v26 = vld [vmem:[#allocation6] ss:$0 sm:$0xff]  ;;  %v1699_v29 = vld [vmem:[#allocation8] ss:$0 sm:$0xff]  ;;  %s2493_s21 = sld [smem:[#allocation29_spill]] }
  0x48   : > { %s2504_s24 = smov (!%p636_p2, %s2068_s24), 1  ;;  %vm770_vm5 = vcmask 64512   ;;  %v1700_v35 = vld [vmem:[#allocation11] ss:$0 sm:$0xff]  ;;  %vm752_vm6 = vcmask 60416   ;;  %s2089_s29 = smov 104  }
  0x49   : > { %s1505_s12 = sshll.u32 %s2504_s24, 2  ;;  %s1543_s13 = sshll.u32 %s2504_s24, 4  ;;  %v1701_v54 = vld [vmem:[%s2296_s27] ss:$0 sm:$0xff]  ;;  %vm775_vm7 = vcmask 7168   ;;  %v2093_v60 = vmov 0  }
  0x4a   : > { %s2324_s18 = scalar_lea.vmem %s2465_s0, %s1505_s12  ;;  %s2090_s3 = smov 120   ;;  %v2092_v59 = vmov -1e+30   ;;  %1697 = vset.pattern.permute.xlu1 %v2093_v60  ;;  %1695 = vset.pattern.permute.xlu0 %v2093_v60  ;;  %v2094_v63 = vmov 0.0   ;;  %vm1005_vm8 = vcmask 1043456   ;;  %vm1273_vm9 = vcmask 257024  }
  0x4b   : > { %v671_v0 = vld [vmem:[%s2324_s18] sm:$0xf]  ;;  %744 = vmatpush.bf16.msra.mxu0 %v1545_v16  ;;  %s2091_s2 = smov 112   ;;  %776 = vst.msk [vmem:[#allocation4] sm:$0xff] %vm775_vm7, %v2092_v59  ;;  %1696 = vset.pattern.permute.xlu2 %v2093_v60  ;;  %s2494_s1 = sld [smem:[#allocation30_spill]] }
  0x4c   : > { %v672_v1 = vunpack.c.l.bf16 %v671_v0  ;;  %777 = vst.msk [vmem:[#allocation4 + $0x8] sm:$0xff] %vm775_vm7, %v2092_v59  ;;  %s2095_s27 = smov 96  }
  0x4d   : > { %v1705_v4 = vpop.eup %1704  ;;  %s650_s6 = scalar_lea.vmem %s2493_s21, %s1543_s13  ;;  %778 = vst.msk [vmem:[#allocation4 + $0x10] sm:$0xff] %vm775_vm7, %v2092_v59 }
  0x4e   : > { %v676_v2 = vsel %vm675_vm0, %v672_v1, 0.0  ;;  %v680_v5 = vmul.f32 32.0, %v1705_v4  ;;  %vm684_vm1 = vweird.f32 %v1705_v4  ;;  %v784_v33 = vld [vmem:[%s650_s6] sm:$0xf]  ;;  %v787_v42 = vld [vmem:[%s650_s6 + $0xc] sm:$0xf] }
  0x4f   : > { %677 = vadd.xlane.f32.xlu0 %v676_v2  ;;  %v805_v34 = vsel %vm770_vm5, %v784_v33, 0  ;;  %v862_v43 = vsel %vm770_vm5, %v787_v42, 0  ;;  %v785_v44 = vld [vmem:[%s650_s6 + $0x4] sm:$0xf]  ;;  %v786_v47 = vld [vmem:[%s650_s6 + $0x8] sm:$0xf] }
  0x50   : > { %v681_v6 = vsub.f32 1.0, %v680_v5  ;;  %814 = vmatpush.bf16.xpose.msra.mxu1 %v805_v34  ;;  %871 = vmatpush.bf16.xpose.msrb.mxu0 %v862_v43  ;;  %v824_v45 = vsel %vm770_vm5, %v785_v44, 0  ;;  %v843_v48 = vsel %vm770_vm5, %v786_v47, 0  ;;  %779 = vst.msk [vmem:[#allocation4 + $0x18] sm:$0xff] %vm775_vm7, %v2092_v59 }
  0x51   : > { %833 = vmatpush.bf16.xpose.msra.mxu2 %v824_v45  ;;  %852 = vmatpush.bf16.xpose.msra.mxu3 %v843_v48  ;;  %780 = vst.msk [vmem:[#allocation5] sm:$0xff] %vm775_vm7, %v2094_v63  ;;  %s2379_s17 = scalar_lea.vmem %s2494_s1, %s1543_s13 }
  0x52   : > { %v682_v7 = vmul.f32 %v1705_v4, %v681_v6  ;;  %771 = vst.msk [vmem:[#allocation3] sm:$0xff] %vm770_vm5, %v2094_v63  ;;  %v877_v2 = vld [vmem:[#allocation4] sm:$0xff]  ;;  %v791_v42 = vld [vmem:[%s2379_s17 + $0xc] sm:$0xf] }
  0x53   : > { %772 = vst.msk [vmem:[#allocation3 + $0x8] sm:$0xff] %vm770_vm5, %v2094_v63  ;;  %v1064_v43 = vsel %vm1005_vm8, %v791_v42, 0 }
  0x54   : > { %v683_v8 = vadd.f32 %v1705_v4, %v682_v7  ;;  %773 = vst.msk [vmem:[#allocation3 + $0x10] sm:$0xff] %vm770_vm5, %v2094_v63 }
  0x55   : > { %774 = vst.msk [vmem:[#allocation3 + $0x18] sm:$0xff] %vm770_vm5, %v2094_v63 }
  0x56   : > { %v685_v9 = vsel %vm684_vm1, %v1705_v4, %v683_v8  ;;  %781 = vst.msk [vmem:[#allocation5 + $0x8] sm:$0xff] %vm775_vm7, %v2094_v63 }
  0x57   : > { %782 = vst.msk [vmem:[#allocation5 + $0x10] sm:$0xff] %vm775_vm7, %v2094_v63 }
  0x58   : > { %783 = vst.msk [vmem:[#allocation5 + $0x18] sm:$0xff] %vm775_vm7, %v2094_v63 }
  0xc2   : > { %v678_v10 = vpop.xlane.xlu0 %677 }
  0xc3   : > { %v686_v11 = vmul.f32 %v685_v9, %v678_v10 }
  0xc5   : > { %v687_v12 = vsub.f32 %v672_v1, %v686_v11 }
  0xc7   : > { %v688_v13 = vmul.f32 %v687_v12, %v687_v12 }
  0xc9   : > { %v689_v14 = vsel %vm675_vm0, %v688_v13, 0.0 }
  0xca   : > { %690 = vadd.xlane.f32.xlu0 %v689_v14  ;;  %v2372_v14 = vld [vmem:[#allocation4 + $0x18] sm:$0xff] }
 0x13d   : > { %v691_v17 = vpop.xlane.xlu0 %690 }
 0x13e   : > { %v692_v18 = vmul.f32 %v691_v17, %v685_v9 }
 0x140   : > { %v693_v19 = vadd.f32 1e-05, %v692_v18  ;;  %v788_v18 = vld [vmem:[%s2379_s17] sm:$0xf] }
 0x142   : > { %1706 = vrsqrt.f32 %v693_v19  ;;  %vm700_vm3 = vweird.f32 %v693_v19 }
 0x148   : > { %v1707_v20 = vpop.eup %1706 }
 0x149   : > { %v695_v21 = vmul.f32 %v1707_v20, %v693_v19  ;;  %vm701_vm2 = vweird.f32 %v1707_v20  ;;  %v1007_v19 = vsel %vm1005_vm8, %v788_v18, 0 }
 0x14a   : > { %vm702_vm4 = vmor %vm700_vm3, %vm701_vm2  ;;  %1016 = vmatpush.bf16.msrb.mxu1 %v1007_v19 }
 0x14b   : > { %v696_v22 = vmul.f32 %v1707_v20, %v695_v21 }
 0x14d   : > { %v697_v23 = vmul.f32 0.5, %v696_v22  ;;  %v878_v22 = vld [vmem:[#allocation4 + $0x8] sm:$0xff] }
 0x14f   : > { %v698_v24 = vsub.f32 1.5, %v697_v23 }
 0x151   : > { %v699_v25 = vmul.f32 %v1707_v20, %v698_v24 }
 0x153   : > { %v703_v27 = vsel %vm702_vm4, %v1707_v20, %v699_v25 }
 0x154   : > { %v704_v28 = vmul.f32 %v703_v27, %v687_v12  ;;  %v2391_v27 = vld [vmem:[#allocation4 + $0x10] sm:$0xff] }
 0x156   : > { %v708_v30 = vmul.f32 %v1698_v26, %v704_v28 }
 0x158   : > { %v712_v31 = vadd.f32 %v1699_v29, %v708_v30 }
 0x15a   : > { %v713_v32 = vpack.c.bf16 %v712_v31, %v712_v31 }
 0x15c   : > { %1519 = vmatmul.msk.bf16.vlgmr.msra.gmra.mxu0 %vm675_vm0, %v713_v32 }
 0x15d   : > { %1073 = vmatpush.bf16.msra.mxu0 %v1064_v43  ;;  %v972_v43 = vld [vmem:[#allocation3 + $0x10] sm:$0xff] }
 0x1d9   : > { %v746_v36 = vpop.f32.mrf.mxu0 }
 0x1da   : > { %v747_v37 = vadd.f32 %v1700_v35, %v746_v36  ;;  %v790_v36 = vld [vmem:[%s2379_s17 + $0x8] sm:$0xf] }
 0x1dc   : > { %v750_v38 = vmul.f32 0.35355338, %v747_v37  ;;  %v1045_v37 = vsel %vm1005_vm8, %v790_v36, 0 }
 0x1dd   : > { %1054 = vmatpush.bf16.msrb.mxu3 %v1045_v37 }
 0x1de   : > { %v751_v39 = vpack.c.bf16 %v750_v38, %v750_v38  ;;  %v789_v38 = vld [vmem:[%s2379_s17 + $0x4] sm:$0xf] }
 0x1e0   : > { %753 = vst.msk [vmem:[#allocation2] sm:$0xf] %vm752_vm6, %v751_v39  ;;  %765 = vrot.lane.b32.xlu2 %v751_v39, %s2089_s29  ;;  %755 = vrot.lane.b32.xlu1 %v751_v39, %s2090_s3 }
 0x1e1   : > { %v748_v40 = vpop.f32.mrf.mxu0 }
 0x1e7   : > { %v793_v41 = vld [vmem:[#allocation2] sm:$0xf] }
 0x1e8   : > { %760 = vrot.lane.b32.xlu1 %v751_v39, %s2091_s2  ;;  %1520 = vmatmul.msk.bf16.vlgmr.msra.gmra.mxu1 %vm770_vm5, %v793_v41  ;;  %v1026_v39 = vsel %vm1005_vm8, %v789_v38, 0 }
 0x1e9   : > { %1035 = vmatpush.bf16.msrb.mxu2 %v1026_v39 }
 0x23a   : > { %v766_v46 = vpop.permute.xlu2 %765 }
 0x23b   : > { %769 = vst.msk [vmem:[#allocation2 + $0xc] sm:$0xf] %vm752_vm6, %v766_v46 }
 0x242   : > { %v796_v49 = vld [vmem:[#allocation2 + $0xc] sm:$0xf] }
 0x243   : > { %1523 = vmatmul.msk.bf16.vlgmr.msrb.gmra.mxu0 %vm770_vm5, %v796_v49 }
 0x252   : > { %v756_v50 = vpop.permute.xlu1 %755 }
 0x253   : > { %759 = vst.msk [vmem:[#allocation2 + $0x4] sm:$0xf] %vm752_vm6, %v756_v50 }
 0x25a   : > { %v761_v51 = vpop.permute.xlu1 %760  ;;  %v794_v52 = vld [vmem:[#allocation2 + $0x4] sm:$0xf] }
 0x25b   : > { %764 = vst.msk [vmem:[#allocation2 + $0x8] sm:$0xf] %vm752_vm6, %v761_v51  ;;  %1521 = vmatmul.msk.bf16.vlgmr.msra.gmra.mxu2 %vm770_vm5, %v794_v52  ;;  %v941_v51 = vld [vmem:[#allocation5] sm:$0xff] }
 0x262   : > { %v795_v53 = vld [vmem:[#allocation2 + $0x8] sm:$0xf] }
 0x263   : > { %1522 = vmatmul.msk.bf16.vlgmr.msra.gmra.mxu3 %vm770_vm5, %v795_v53 }
 0x265   : > { %v816_v55 = vpop.f32.mrf.mxu1 }
 0x266   : > { %v817_v56 = vadd.f32 %v1701_v54, %v816_v55 }
 0x268   : > { %v881_v57 = vsel %vm770_vm5, %v817_v56, -inf }
 0x269   : > { %882 = vmax.xlane.f32.xlu1 %v881_v57 }
 0x26d   : > { %v818_v58 = vpop.f32.mrf.mxu1 }
 0x2c0   : > { %v873_v61 = vpop.f32.mrf.mxu0 }
 0x2c1   : > { %v2354_v62 = vadd.f32 %v1701_v54, %v873_v61 }
 0x2c3   : > { %v890_v0 = vsel %vm770_vm5, %v2354_v62, -inf }
 0x2c4   : > { %891 = vmax.xlane.f32.xlu0 %v890_v0 }
 0x2c8   : > { %v875_v1 = vpop.f32.mrf.mxu0 }
 0x2dc   : > { %v883_v3 = vpop.xlane.xlu1 %882 }
 0x2dd   : > { %v893_v4 = vmax.f32 %v877_v2, %v883_v3 }
 0x2de   : > { %v835_v5 = vpop.f32.mrf.mxu2 }
 0x2df   : > { %v897_v6 = vsub.f32 %v877_v2, %v893_v4  ;;  %1087 = vst.msk [vmem:[#allocation4] sm:$0xff] %vm775_vm7, %v893_v4  ;;  %v2367_v7 = vadd.f32 %v1701_v54, %v835_v5  ;;  %911 = vperm.xlu1 %1697, %v893_v4  }
 0x2e1   : > { %v884_v8 = vsel %vm770_vm5, %v2367_v7, -inf  ;;  %v901_v34 = vmul.f32 1.442695, %v897_v6 }
 0x2e2   : > { %885 = vmax.xlane.f32.xlu2 %v884_v8  ;;  %v970_v8 = vld [vmem:[#allocation3] sm:$0xff] }
 0x2e6   : > { %v837_v9 = vpop.f32.mrf.mxu2  ;;  %v854_v10 = vpop.f32.mrf.mxu3 }
 0x2e7   : > { %v855_v11 = vadd.f32 %v1701_v54, %v854_v10 }
 0x2e9   : > { %v887_v12 = vsel %vm770_vm5, %v855_v11, -inf }
 0x2ea   : > { %888 = vmax.xlane.f32.xlu0 %v887_v12 }
 0x2ee   : > { %v856_v13 = vpop.f32.mrf.mxu3 }
 0x337   : > { %v892_v15 = vpop.xlane.xlu0 %891 }
 0x338   : > { %v2382_v16 = vmax.f32 %v2372_v14, %v892_v15  ;;  %v943_v15 = vld [vmem:[#allocation5 + $0x10] sm:$0xff] }
 0x33a   : > { %v900_v17 = vsub.f32 %v2372_v14, %v2382_v16  ;;  %1090 = vst.msk [vmem:[#allocation4 + $0x18] sm:$0xff] %vm775_vm7, %v2382_v16  ;;  %v1141_v14 = vld [vmem:[#allocation14] sm:$0xf] }
 0x33c   : > { %v907_v63 = vmul.f32 1.442695, %v900_v17 }
 0x351   : > { %v912_v20 = vpop.permute.xlu1 %911 }
 0x352   : > { %v929_v21 = vsub.f32 %v817_v56, %v912_v20 }
 0x354   : > { %v933_v23 = vmul.f32 1.442695, %v929_v21  ;;  %v1163_v21 = vld [vmem:[#allocation14 + $0x4] sm:$0xf] }
 0x355   : > { %v886_v24 = vpop.xlane.xlu2 %885 }
 0x356   : > { %1708 = vpow2.f32 %v933_v23  ;;  %v894_v25 = vmax.f32 %v878_v22, %v886_v24  ;;  %v942_v23 = vld [vmem:[#allocation5 + $0x8] sm:$0xff]  ;;  %v1168_v24 = vsel %vm1005_vm8, %v1163_v21, 0 }
 0x357   : > { %1710 = vpow2.f32 %v901_v34  ;;  %1177 = vmatpush.bf16.msra.mxu2 %v1168_v24 }
 0x358   : > { %v898_v26 = vsub.f32 %v878_v22, %v894_v25  ;;  %1088 = vst.msk [vmem:[#allocation4 + $0x8] sm:$0xff] %vm775_vm7, %v894_v25  ;;  %916 = vperm.xlu0 %1695, %v894_v25   ;;  %v1185_v22 = vld [vmem:[#allocation14 + $0x8] sm:$0xf] }
 0x359   : > { %v1190_v25 = vsel %vm1005_vm8, %v1185_v22, 0 }
 0x35a   : > { %v903_v52 = vmul.f32 1.442695, %v898_v26  ;;  %1199 = vmatpush.bf16.msra.mxu3 %v1190_v25 }
 0x35c   : > { %v1709_v28 = vpop.eup %1708 }
 0x35d   : > { %v889_v29 = vpop.xlane.xlu0 %888  ;;  %v949_v30 = vsel %vm770_vm5, %v1709_v28, 0.0  ;;  %v998_v31 = vpack.c.bf16 %v1709_v28, %v1709_v28  ;;  %v1711_v35 = vpop.eup %1710 }
 0x35e   : > { %v2395_v32 = vmax.f32 %v2391_v27, %v889_v29  ;;  %950 = vadd.xlane.f32.xlu1 %v949_v30  ;;  %v945_v53 = vmul.f32 %v1711_v35, %v941_v51 }
 0x35f   : > { %1524 = vmatmul.msk.bf16.vlgmr.msrb.gmra.mxu1 %vm770_vm5, %v998_v31  ;;  %v944_v31 = vld [vmem:[#allocation5 + $0x18] sm:$0xff] }
 0x360   : > { %v899_v33 = vsub.f32 %v2391_v27, %v2395_v32  ;;  %1089 = vst.msk [vmem:[#allocation4 + $0x10] sm:$0xff] %vm775_vm7, %v2395_v32  ;;  %926 = vperm.xlu0 %1695, %v2382_v16   ;;  %921 = vperm.xlu2 %1696, %v2395_v32   ;;  %v1146_v16 = vsel %vm1005_vm8, %v1141_v14, 0  ;;  %v1134_v14 = vld [vmem:[%s2324_s18] sm:$0xf]  ;;  %s2495_s18 = sld [smem:[#allocation31_spill]] }
 0x361   : > { %1155 = vmatpush.bf16.msra.mxu1 %v1146_v16  ;;  %v1702_v16 = vld [vmem:[#allocation15] ss:$0 sm:$0xff] }
 0x366   : > { %s665_s13 = scalar_lea.vmem %s2495_s18, %s1505_s12 }
 0x377   : > { %976 = vperm.xlu1 %1697, %v1711_v35  }
 0x3ba   : > { %v922_v40 = vpop.permute.xlu2 %921 }
 0x3bb   : > { %v931_v41 = vsub.f32 %v855_v11, %v922_v40  ;;  %v905_v11 = vmul.f32 1.442695, %v899_v33 }
 0x3bd   : > { %v937_v44 = vmul.f32 1.442695, %v931_v41  ;;  %v971_v41 = vld [vmem:[#allocation3 + $0x8] sm:$0xff] }
 0x3bf   : > { %1712 = vpow2.f32 %v937_v44  ;;  %v973_v44 = vld [vmem:[#allocation3 + $0x18] sm:$0xff] }
 0x3c5   : > { %v1713_v45 = vpop.eup %1712 }
 0x3c6   : > { %v955_v46 = vsel %vm770_vm5, %v1713_v45, 0.0  ;;  %v1000_v47 = vpack.c.bf16 %v1713_v45, %v1713_v45 }
 0x3c7   : > { %956 = vadd.xlane.f32.xlu0 %v955_v46 }
 0x3c8   : > { %1526 = vmatmul.msk.bf16.vlgmr.msrb.gmra.mxu3 %vm770_vm5, %v1000_v47 }
 0x3ca   : > { %v917_v48 = vpop.permute.xlu0 %916 }
 0x3cb   : > { %v930_v49 = vsub.f32 %v2367_v7, %v917_v48 }
 0x3cd   : > { %v935_v50 = vmul.f32 1.442695, %v930_v49 }
 0x3cf   : > { %1714 = vpow2.f32 %v935_v50 }
 0x3d0   : > { %1716 = vpow2.f32 %v903_v52 }
 0x3d1   : > { %v951_v54 = vpop.xlane.xlu1 %950 }
 0x3d2   : > { %v961_v55 = vadd.f32 %v951_v54, %v945_v53  ;;  %v927_v56 = vpop.permute.xlu0 %926 }
 0x3d3   : > { %v932_v57 = vsub.f32 %v2354_v62, %v927_v56 }
 0x3d4   : > { %966 = vst.msk [vmem:[#allocation5] sm:$0xff] %vm775_vm7, %v961_v55 }
 0x3d5   : > { %v1715_v58 = vpop.eup %1714  ;;  %v939_v59 = vmul.f32 1.442695, %v932_v57 }
 0x3d6   : > { %v952_v60 = vsel %vm770_vm5, %v1715_v58, 0.0  ;;  %v999_v61 = vpack.c.bf16 %v1715_v58, %v1715_v58  ;;  %v1717_v0 = vpop.eup %1716 }
 0x3d7   : > { %1718 = vpow2.f32 %v939_v59  ;;  %953 = vadd.xlane.f32.xlu2 %v952_v60  ;;  %v946_v26 = vmul.f32 %v1717_v0, %v942_v23  ;;  %v1207_v60 = vld [vmem:[#allocation14 + $0xc] sm:$0xf] }
 0x3d8   : > { %1525 = vmatmul.msk.bf16.vlgmr.msrb.gmra.mxu2 %vm770_vm5, %v999_v61  ;;  %1720 = vpow2.f32 %v907_v63  ;;  %v1212_v61 = vsel %vm1005_vm8, %v1207_v60, 0 }
 0x3d9   : > { %1221 = vmatpush.bf16.msrb.mxu0 %v1212_v61 }
 0x3db   : > { %981 = vperm.xlu0 %1695, %v1717_v0   ;;  %v1094_v62 = vld [vmem:[#allocation5] sm:$0xff] }
 0x3dc   : > { %v1018_v1 = vpop.f32.mrf.mxu1  ;;  %1722 = vrcp.f32 %v1094_v62 }
 0x3dd   : > { %v1719_v2 = vpop.eup %1718  ;;  %1724 = vpow2.f32 %v905_v11 }
 0x3de   : > { %v1001_v3 = vpack.c.bf16 %v1719_v2, %v1719_v2  ;;  %v958_v4 = vsel %vm770_vm5, %v1719_v2, 0.0  ;;  %v1721_v5 = vpop.eup %1720 }
 0x3df   : > { %959 = vadd.xlane.f32.xlu2 %v958_v4  ;;  %v948_v33 = vmul.f32 %v1721_v5, %v944_v31 }
 0x3e0   : > { %1527 = vmatmul.msk.bf16.vlgmr.msra.gmra.mxu0 %vm770_vm5, %v1001_v3 }
 0x3e2   : > { %v1723_v6 = vpop.eup %1722 }
 0x3e3   : > { %991 = vperm.xlu0 %1695, %v1721_v5   ;;  %1108 = vperm.xlu1 %1697, %v1723_v6   ;;  %v1725_v13 = vpop.eup %1724 }
 0x3e4   : > { %v1020_v7 = vpop.f32.mrf.mxu1  ;;  %v947_v17 = vmul.f32 %v1725_v13, %v943_v15  ;;  %v1135_v15 = vunpack.c.l.bf16 %v1134_v14 }
 0x3e9   : > { %v977_v9 = vpop.permute.xlu1 %976 }
 0x3ea   : > { %v994_v10 = vmul.f32 %v977_v9, %v970_v8  ;;  %v1548_v8 = vld [vmem:[#allocation16 + $0x8] sm:$0xff] }
 0x3eb   : > { %1259 = vmatpush.bf16.msrb.mxu1 %v1548_v8 }
 0x3ec   : > { %v1079_v12 = vadd.f32 %v1018_v1, %v994_v10 }
 0x3ee   : > { %1083 = vst.msk [vmem:[#allocation3] sm:$0xff] %vm770_vm5, %v1079_v12 }
 0x3f5   : > { %v1102_v38 = vld [vmem:[#allocation3] sm:$0xff] }
 0x3f7   : > { %986 = vperm.xlu2 %1696, %v1725_v13   ;;  %v1547_v13 = vld [vmem:[#allocation16] sm:$0xff] }
 0x3f8   : > { %1260 = vmatpush.bf16.msrb.mxu1 %v1547_v13 }
 0x43a   : > { %v957_v18 = vpop.xlane.xlu0 %956 }
 0x43b   : > { %v963_v19 = vadd.f32 %v957_v18, %v947_v17  ;;  %v1140_v18 = vadd.f32 %v1702_v16, %v1135_v15 }
 0x43d   : > { %968 = vst.msk [vmem:[#allocation5 + $0x10] sm:$0xff] %vm775_vm7, %v963_v19 }
 0x444   : > { %v1096_v20 = vld [vmem:[#allocation5 + $0x10] sm:$0xff] }
 0x445   : > { %1726 = vrcp.f32 %v1096_v20 }
 0x44a   : > { %v954_v27 = vpop.xlane.xlu2 %953 }
 0x44b   : > { %v1727_v28 = vpop.eup %1726  ;;  %v962_v29 = vadd.f32 %v954_v27, %v946_v26  ;;  %v1056_v30 = vpop.f32.mrf.mxu3 }
 0x44c   : > { %1118 = vperm.xlu0 %1695, %v1727_v28  }
 0x44d   : > { %967 = vst.msk [vmem:[#allocation5 + $0x8] sm:$0xff] %vm775_vm7, %v962_v29  ;;  %v982_v32 = vpop.permute.xlu0 %981  ;;  %v1703_v29 = vld [vmem:[#allocation18] ss:$0 sm:$0xff] }
 0x44e   : > { %v995_v46 = vmul.f32 %v982_v32, %v971_v41 }
 0x452   : > { %v960_v34 = vpop.xlane.xlu2 %959 }
 0x453   : > { %v964_v35 = vadd.f32 %v960_v34, %v948_v33  ;;  %v1058_v36 = vpop.f32.mrf.mxu3 }
 0x454   : > { %v1095_v37 = vld [vmem:[#allocation5 + $0x8] sm:$0xff] }
 0x455   : > { %969 = vst.msk [vmem:[#allocation5 + $0x18] sm:$0xff] %vm775_vm7, %v964_v35  ;;  %v1109_v39 = vpop.permute.xlu1 %1108  ;;  %1728 = vrcp.f32 %v1095_v37  ;;  %v992_v45 = vpop.permute.xlu0 %991 }
 0x456   : > { %v1126_v40 = vmul.f32 %v1109_v39, %v1102_v38  ;;  %v997_v51 = vmul.f32 %v992_v45, %v973_v44 }
 0x458   : > { %v1130_v42 = vpack.c.bf16 %v1126_v40, %v1126_v40 }
 0x45a   : > { %v987_v47 = vpop.permute.xlu2 %986  ;;  %1528 = vmatmul.msk.bf16.vlgmr.msra.gmra.mxu1 %vm770_vm5, %v1130_v42 }
 0x45b   : > { %v1729_v48 = vpop.eup %1728  ;;  %v996_v49 = vmul.f32 %v987_v47, %v972_v43  ;;  %v1037_v50 = vpop.f32.mrf.mxu2 }
 0x45c   : > { %v1080_v52 = vadd.f32 %v1037_v50, %v995_v46  ;;  %1113 = vperm.xlu2 %1696, %v1729_v48   ;;  %v1097_v53 = vld [vmem:[#allocation5 + $0x18] sm:$0xff] }
 0x45d   : > { %v1081_v54 = vadd.f32 %v1056_v30, %v996_v49  ;;  %v1075_v55 = vpop.f32.mrf.mxu0  ;;  %1730 = vrcp.f32 %v1097_v53 }
 0x45e   : > { %1084 = vst.msk [vmem:[#allocation3 + $0x8] sm:$0xff] %vm770_vm5, %v1080_v52  ;;  %v1082_v56 = vadd.f32 %v1075_v55, %v997_v51 }
 0x45f   : > { %1085 = vst.msk [vmem:[#allocation3 + $0x10] sm:$0xff] %vm770_vm5, %v1081_v54 }
 0x460   : > { %1086 = vst.msk [vmem:[#allocation3 + $0x18] sm:$0xff] %vm770_vm5, %v1082_v56 }
 0x463   : > { %v1731_v57 = vpop.eup %1730  ;;  %v1039_v58 = vpop.f32.mrf.mxu2 }
 0x464   : > { %1123 = vperm.xlu2 %1696, %v1731_v57  }
 0x465   : > { %v1077_v59 = vpop.f32.mrf.mxu0  ;;  %v1103_v0 = vld [vmem:[#allocation3 + $0x8] sm:$0xff] }
 0x466   : > { %v1104_v4 = vld [vmem:[#allocation3 + $0x10] sm:$0xff] }
 0x467   : > { %v1105_v3 = vld [vmem:[#allocation3 + $0x18] sm:$0xff] }
 0x4b6   : > { %v1114_v63 = vpop.permute.xlu2 %1113 }
 0x4b7   : > { %v1127_v62 = vmul.f32 %v1114_v63, %v1103_v0 }
 0x4b9   : > { %v1131_v1 = vpack.c.bf16 %v1127_v62, %v1127_v62 }
 0x4bb   : > { %1529 = vmatmul.msk.bf16.vlgmr.msra.gmra.mxu2 %vm770_vm5, %v1131_v1 }
 0x4be   : > { %v1124_v2 = vpop.permute.xlu2 %1123  ;;  %v1119_v5 = vpop.permute.xlu0 %1118 }
 0x4bf   : > { %v1129_v6 = vmul.f32 %v1124_v2, %v1105_v3  ;;  %v1128_v7 = vmul.f32 %v1119_v5, %v1104_v4 }
 0x4c1   : > { %v1133_v9 = vpack.c.bf16 %v1129_v6, %v1129_v6  ;;  %v1132_v10 = vpack.c.bf16 %v1128_v7, %v1128_v7 }
 0x4c3   : > { %1530 = vmatmul.msk.bf16.vlgmr.msra.gmra.mxu3 %vm770_vm5, %v1132_v10  ;;  %1531 = vmatmul.msk.bf16.vlgmr.msrb.gmra.mxu0 %vm770_vm5, %v1133_v9 }
 0x4d7   : > { %v1157_v11 = vpop.f32.mrf.mxu1 }
 0x4d8   : > { %v1161_v20 = vadd.f32 %v1157_v11, %v1140_v18 }
 0x4df   : > { %v1159_v12 = vpop.f32.mrf.mxu1 }
 0x53e   : > { %v1179_v17 = vpop.f32.mrf.mxu2 }
 0x53f   : > { %v1183_v21 = vadd.f32 %v1179_v17, %v1161_v20 }
 0x540   : > { %v1223_v19 = vpop.f32.mrf.mxu0 }
 0x546   : > { %v1181_v22 = vpop.f32.mrf.mxu2  ;;  %v1201_v23 = vpop.f32.mrf.mxu3 }
 0x547   : > { %v1205_v24 = vadd.f32 %v1201_v23, %v1183_v21 }
 0x548   : > { %v1225_v25 = vpop.f32.mrf.mxu0 }
 0x549   : > { %v1227_v26 = vadd.f32 %v1223_v19, %v1205_v24 }
 0x54b   : > { %v1228_v27 = vpack.c.bf16 %v1227_v26, %v1227_v26 }
 0x54d   : > { %1540 = vmatmul.msk.bf16.vlgmr.msrb.gmra.mxu1 %vm675_vm0, %v1228_v27 }
 0x54e   : > { %v1203_v28 = vpop.f32.mrf.mxu3 }
 0x5ca   : > { %v1262_v30 = vpop.f32.mrf.mxu1 }
 0x5cb   : > { %v1263_v31 = vadd.f32 %v1703_v29, %v1262_v30 }
 0x5cd   : > { %1268 = vrot.lane.b32.xlu0 %v1263_v31, %s2095_s27  ;;  %v1266_v33 = vmul.f32 %v1263_v31, %v1135_v15 }
 0x5d2   : > { %v1264_v32 = vpop.f32.mrf.mxu1 }
 0x63f   : > { %v1269_v34 = vpop.permute.xlu0 %1268 }
 0x640   : > { %v1271_v35 = vadd.f32 %v1269_v34, %v1266_v33 }
 0x642   : > { %v1272_v36 = vpack.c.bf16 %v1271_v35, %v1271_v35 }
 0x644   : > { %1274 = vst.msk [vmem:[%s665_s13] sm:$0xf] %vm1273_vm9, %v1272_v36 }
 0x645 PF: > { %s26_s26 = sadd.s32 1, %s2076_s26   ;;  %s2496_s21 = smov %s2060_s22 }
 0x646   : > { %p23_p1 = scmp.ge.s32.totalorder %s26_s26, 4   ;;  %s2497_s22 = smov %s2064_s23 }
 0x647   : > { %s2498_s23 = smov %s2273_s30  ;;  %s2499_s24 = smov %s2072_s25 }
 0x648   : > { %s2500_s25 = smov %s2502_s5  ;;  %25 = sbr.rel (!%p23_p1) target bundleno = 13 (0xd), region = 162 }
 0x64d   :  { %1300 = vsyncpa [#allocation7], 1 }
 0x64e   :  { %1302 = vsyncpa [#allocation7 + $0x1], 1 }
 0x64f   :  { %1303 = vsyncpa [#allocation9], 1 }
 0x650   :  { %1304 = vsyncpa [#allocation12], 1 }
 0x651   :  { %1305 = vsyncpa [#allocation17], 1 }

// kernel: cond_conformer_layer.13
= control target key start
LH: loop header
LB: loop body
LE: loop exit
PB: predicated region body
PF: predicated region fallthrough
CT: control target
= control target key end

     0   :  { %vm40_vm0 = vcmask 261120   ;;  %s534_s0 = inlined_call_operand.vmem [shape: bf16[16,32], index: 0, kind: input, shape index: {}]   ;;  %s535_s1 = inlined_call_operand.vmem [shape: f32[1,32], index: 1, kind: input, shape index: {}]   ;;  %s536_s2 = inlined_call_operand.vmem [shape: f32[1,32], index: 2, kind: input, shape index: {}]   ;;  %s537_s3 = inlined_call_operand.vmem [shape: bf16[32,64], index: 3, kind: input, shape index: {}]   ;;  %s538_s4 = inlined_call_operand.vmem [shape: f32[1,64], index: 4, kind: input, shape index: {}]   ;;  %s539_s5 = inlined_call_operand.vmem [shape: bf16[64,32], index: 5, kind: input, shape index: {}]   ;;  %s540_s6 = inlined_call_operand.vmem [shape: f32[1,32], index: 6, kind: input, shape index: {}]   ;;  %s541_s7 = inlined_call_operand.vmem [shape: f32[1,32], index: 7, kind: input, shape index: {}]   ;;  %s542_s8 = inlined_call_operand.vmem [shape: f32[1,32], index: 8, kind: input, shape index: {}]   ;;  %s543_s9 = inlined_call_operand.hbm [shape: f32[16,32], index: 9, kind: output, shape index: {}]  }
   0x1   :  { %v350_v0 = vld [vmem:[%s534_s0] sm:$0xff]  }
   0x2   :  { %v464_v1 = vunpack.c.l.bf16 %v350_v0 }
   0x3   :  { %14 = vsyncpa [#allocation3], 0  ;;  %v468_v3 = vunpack.c.h.bf16 %v350_v0  ;;  %v407_v5 = vmov 32.0   ;;  %v344_v22 = vld [vmem:[%s537_s3 + $0x8] sm:$0xff]  ;;  %v343_v24 = vld [vmem:[%s537_s3] sm:$0xff]  ;;  %s303_s10 = sshll.u32 %s543_s9, 4  ;;  %s304_s10 = int_to_ptr.hbm [resolvable:$true] %s303_s10 }
   0x4   :  { %v41_v2 = vsel %vm40_vm0, %v464_v1, 0.0  ;;  %363 = vrcp.f32 %v407_v5  ;;  %132 = vmatpush.bf16.msra.mxu0 %v344_v22  ;;  %v357_v43 = vld [vmem:[%s535_s1] ss:$0 sm:$0xff]  ;;  %v348_v53 = vld [vmem:[%s539_s5 + $0x18] sm:$0xff]  ;;  %v347_v55 = vld [vmem:[%s539_s5 + $0x10] sm:$0xff]  ;;  %s410_s0 = smov 8  }
   0x5   :  { %42 = vadd.xlane.f32.xlu0 %v41_v2  ;;  %v44_v4 = vsel %vm40_vm0, %v468_v3, 0.0  ;;  %v358_v48 = vld [vmem:[%s536_s2] ss:$0 sm:$0xff]  ;;  %225 = vmatpush.bf16.msra.mxu1 %v348_v53  ;;  %v346_v58 = vld [vmem:[%s539_s5 + $0x8] sm:$0xff] }
   0x6   :  { %v359_v54 = vld [vmem:[%s538_s4] ss:$0 sm:$0xff] }
   0x7   :  { %v345_v60 = vld [vmem:[%s539_s5] sm:$0xff] }
   0x8   :  { %133 = vmatpush.bf16.msra.mxu0 %v343_v24 }
   0x9   :  { %226 = vmatpush.bf16.msra.mxu1 %v347_v55 }
   0xa   :  { %v364_v6 = vpop.eup %363 }
   0xb   :  { %v48_v7 = vmul.f32 32.0, %v364_v6  ;;  %vm52_vm1 = vweird.f32 %v364_v6 }
   0xd   :  { %45 = vadd.xlane.f32.xlu0 %v44_v4  ;;  %v49_v8 = vsub.f32 1.0, %v48_v7  ;;  %227 = vmatpush.bf16.msra.mxu1 %v346_v58 }
   0xf   :  { %v50_v9 = vmul.f32 %v364_v6, %v49_v8 }
  0x11   :  { %v51_v10 = vadd.f32 %v364_v6, %v50_v9  ;;  %228 = vmatpush.bf16.msra.mxu1 %v345_v60 }
  0x13   :  { %v472_v11 = vsel %vm52_vm1, %v364_v6, %v51_v10  ;;  %vm217_vm1 = vcmask 523264  }
  0x78   :  { %v43_v12 = vpop.xlane.xlu0 %42 }
  0x79   :  { %v54_v13 = vmul.f32 %v472_v11, %v43_v12 }
  0x7b   :  { %v56_v14 = vsub.f32 %v464_v1, %v54_v13 }
  0x7d   :  { %v58_v15 = vmul.f32 %v56_v14, %v56_v14 }
  0x7f   :  { %v60_v16 = vsel %vm40_vm0, %v58_v15, 0.0 }
  0x80   :  { %61 = vadd.xlane.f32.xlu1 %v60_v16  ;;  %v46_v17 = vpop.xlane.xlu0 %45 }
  0x81   :  { %v55_v18 = vmul.f32 %v472_v11, %v46_v17 }
  0x83   :  { %v57_v19 = vsub.f32 %v468_v3, %v55_v18 }
  0x85   :  { %v59_v20 = vmul.f32 %v57_v19, %v57_v19 }
  0x87   :  { %v63_v21 = vsel %vm40_vm0, %v59_v20, 0.0 }
  0x88   :  { %64 = vadd.xlane.f32.xlu1 %v63_v21 }
  0xf3   :  { %v62_v23 = vpop.xlane.xlu1 %61 }
  0xf4   :  { %v66_v25 = vmul.f32 %v62_v23, %v472_v11 }
  0xf6   :  { %v68_v26 = vadd.f32 1e-05, %v66_v25 }
  0xf8   :  { %365 = vrsqrt.f32 %v68_v26  ;;  %vm76_vm3 = vweird.f32 %v68_v26 }
  0xfb   :  { %v65_v27 = vpop.xlane.xlu1 %64 }
  0xfc   :  { %v67_v28 = vmul.f32 %v65_v27, %v472_v11 }
  0xfe   :  { %v366_v29 = vpop.eup %365  ;;  %v69_v30 = vadd.f32 1e-05, %v67_v28 }
  0xff   :  { %v71_v31 = vmul.f32 %v366_v29, %v68_v26  ;;  %vm77_vm2 = vweird.f32 %v366_v29 }
 0x100   :  { %367 = vrsqrt.f32 %v69_v30  ;;  %vm78_vm4 = vmor %vm76_vm3, %vm77_vm2  ;;  %vm86_vm6 = vweird.f32 %v69_v30 }
 0x101   :  { %v72_v32 = vmul.f32 %v366_v29, %v71_v31 }
 0x103   :  { %v73_v33 = vmul.f32 0.5, %v72_v32 }
 0x105   :  { %v74_v34 = vsub.f32 1.5, %v73_v33 }
 0x106   :  { %v368_v35 = vpop.eup %367 }
 0x107   :  { %v75_v36 = vmul.f32 %v366_v29, %v74_v34  ;;  %v81_v37 = vmul.f32 %v368_v35, %v69_v30  ;;  %vm87_vm5 = vweird.f32 %v368_v35  ;;  %v360_v30 = vld [vmem:[%s540_s6] ss:$0 sm:$0xff] }
 0x108   :  { %vm88_vm7 = vmor %vm86_vm6, %vm87_vm5 }
 0x109   :  { %v82_v38 = vmul.f32 %v368_v35, %v81_v37  ;;  %v79_v39 = vsel %vm78_vm4, %v366_v29, %v75_v36 }
 0x10a   :  { %v90_v42 = vmul.f32 %v79_v39, %v56_v14 }
 0x10b   :  { %v83_v40 = vmul.f32 0.5, %v82_v38 }
 0x10c   :  { %v95_v47 = vmul.f32 %v357_v43, %v90_v42 }
 0x10d   :  { %v84_v41 = vsub.f32 1.5, %v83_v40 }
 0x10e   :  { %v100_v50 = vadd.f32 %v358_v48, %v95_v47 }
 0x10f   :  { %v85_v44 = vmul.f32 %v368_v35, %v84_v41 }
 0x111   :  { %v89_v45 = vsel %vm88_vm7, %v368_v35, %v85_v44 }
 0x112   :  { %v91_v46 = vmul.f32 %v89_v45, %v57_v19 }
 0x114   :  { %v96_v49 = vmul.f32 %v357_v43, %v91_v46 }
 0x116   :  { %v101_v51 = vadd.f32 %v358_v48, %v96_v49 }
 0x118   :  { %v102_v52 = vpack.c.bf16 %v101_v51, %v100_v50 }
 0x11a   :  { %323 = vmatmul.msk.bf16.vlgmr.msra.gmra.mxu0 %vm40_vm0, %v102_v52 }
 0x197   :  { %v135_v56 = vpop.f32.mrf.mxu0 }
 0x198   :  { %v136_v57 = vadd.f32 %v359_v54, %v135_v56 }
 0x19a   :  { %v324_v59 = vmul.f32 -1.442695, %v136_v57 }
 0x19c   :  { %369 = vpow2.f32 %v324_v59 }
 0x19f   :  { %v137_v61 = vpop.f32.mrf.mxu0 }
 0x1a0   :  { %v138_v62 = vadd.f32 %v359_v54, %v137_v61 }
 0x1a2   :  { %v370_v63 = vpop.eup %369  ;;  %v325_v0 = vmul.f32 -1.442695, %v138_v62 }
 0x1a3   :  { %v146_v2 = vadd.f32 1.0, %v370_v63  ;;  %v361_v63 = vld [vmem:[%s541_s7] ss:$0 sm:$0xff]  ;;  %s408_s7 = smov [#allocation2]  }
 0x1a4   :  { %371 = vpow2.f32 %v325_v0  ;;  %s301_s28 = sshll.u32 %s408_s7, 4  ;;  %s302_s28 = int_to_ptr.vmem [resolvable:$true] %s301_s28 }
 0x1a5   :  { %373 = vrcp.f32 %v146_v2  ;;  %v159_v14 = vand.u32 2147483648, %v146_v2  ;;  %vm153_vm9 = vweird.f32 %v146_v2  ;;  %v157_v15 = vand.u32 2147483647, %v146_v2 }
 0x1a7   :  { %v160_v21 = vor.u32 1.1754944e-38, %v159_v14  ;;  %vm158_vm12 = vcmp.eq.f32.partialorder %v157_v15, 8.507059e+37 }
 0x1aa   :  { %v372_v4 = vpop.eup %371 }
 0x1ab   :  { %v374_v5 = vpop.eup %373  ;;  %v147_v6 = vadd.f32 1.0, %v372_v4  ;;  %v362_v4 = vld [vmem:[%s542_s8] ss:$0 sm:$0xff]  ;;  %s409_s8 = smov 128  }
 0x1ac   :  { %v149_v7 = vmul.f32 %v374_v5, %v146_v2  ;;  %vm154_vm8 = vweird.f32 %v374_v5 }
 0x1ad   :  { %375 = vrcp.f32 %v147_v6  ;;  %vm155_vm10 = vmor %vm153_vm9, %vm154_vm8  ;;  %v174_v17 = vand.u32 2147483648, %v147_v6  ;;  %v172_v20 = vand.u32 2147483647, %v147_v6  ;;  %vm168_vm13 = vweird.f32 %v147_v6 }
 0x1ae   :  { %v150_v8 = vsub.f32 1.0, %v149_v7 }
 0x1af   :  { %v175_v24 = vor.u32 1.1754944e-38, %v174_v17  ;;  %vm173_vm15 = vcmp.eq.f32.partialorder %v172_v20, 8.507059e+37 }
 0x1b0   :  { %v151_v9 = vmul.f32 %v374_v5, %v150_v8 }
 0x1b2   :  { %v152_v12 = vadd.f32 %v374_v5, %v151_v9 }
 0x1b3   :  { %v376_v10 = vpop.eup %375 }
 0x1b4   :  { %v164_v13 = vmul.f32 %v376_v10, %v147_v6  ;;  %v156_v18 = vsel %vm155_vm10, %v374_v5, %v152_v12  ;;  %vm169_vm11 = vweird.f32 %v376_v10 }
 0x1b5   :  { %v161_v23 = vsel %vm158_vm12, %v160_v21, %v156_v18  ;;  %vm170_vm14 = vmor %vm168_vm13, %vm169_vm11 }
 0x1b6   :  { %v165_v16 = vsub.f32 1.0, %v164_v13  ;;  %v178_v27 = vmul.f32 %v161_v23, %v136_v57 }
 0x1b8   :  { %v166_v19 = vmul.f32 %v376_v10, %v165_v16 }
 0x1ba   :  { %v167_v22 = vadd.f32 %v376_v10, %v166_v19 }
 0x1bc   :  { %v171_v25 = vsel %vm170_vm14, %v376_v10, %v167_v22 }
 0x1bd   :  { %v176_v26 = vsel %vm173_vm15, %v175_v24, %v171_v25 }
 0x1be   :  { %v179_v28 = vmul.f32 %v176_v26, %v138_v62 }
 0x1c0   :  { %v180_v29 = vpack.c.bf16 %v179_v28, %v178_v27 }
 0x1c2   :  { %342 = vmatmul.msk.bf16.vlgmr.msra.gmra.mxu1 %vm217_vm1, %v180_v29 }
 0x23f   :  { %v230_v31 = vpop.f32.mrf.mxu1 }
 0x240   :  { %v231_v32 = vadd.f32 %v360_v30, %v230_v31 }
 0x242   :  { %v235_v33 = vmul.f32 0.5, %v231_v32 }
 0x244   :  { %v237_v34 = vadd.f32 %v464_v1, %v235_v33 }
 0x246   :  { %v241_v35 = vsel %vm40_vm0, %v237_v34, 0.0 }
 0x247   :  { %v232_v36 = vpop.f32.mrf.mxu1  ;;  %242 = vadd.xlane.f32.xlu2 %v241_v35 }
 0x248   :  { %v233_v37 = vadd.f32 %v360_v30, %v232_v36 }
 0x24a   :  { %v236_v38 = vmul.f32 0.5, %v233_v37 }
 0x24c   :  { %v238_v39 = vadd.f32 %v468_v3, %v236_v38 }
 0x24e   :  { %v244_v40 = vsel %vm40_vm0, %v238_v39, 0.0 }
 0x24f   :  { %245 = vadd.xlane.f32.xlu2 %v244_v40 }
 0x2ba   :  { %v243_v41 = vpop.xlane.xlu2 %242 }
 0x2bb   :  { %v247_v42 = vmul.f32 %v243_v41, %v472_v11 }
 0x2bd   :  { %v249_v43 = vsub.f32 %v237_v34, %v247_v42 }
 0x2bf   :  { %v251_v44 = vmul.f32 %v249_v43, %v249_v43 }
 0x2c1   :  { %v253_v45 = vsel %vm40_vm0, %v251_v44, 0.0 }
 0x2c2   :  { %254 = vadd.xlane.f32.xlu0 %v253_v45  ;;  %v246_v1 = vpop.xlane.xlu2 %245 }
 0x2c3   :  { %v248_v46 = vmul.f32 %v246_v1, %v472_v11 }
 0x2c5   :  { %v250_v47 = vsub.f32 %v238_v39, %v248_v46 }
 0x2c7   :  { %v252_v48 = vmul.f32 %v250_v47, %v250_v47 }
 0x2c9   :  { %v256_v49 = vsel %vm40_vm0, %v252_v48, 0.0 }
 0x2ca   :  { %257 = vadd.xlane.f32.xlu1 %v256_v49 }
 0x335   :  { %v255_v3 = vpop.xlane.xlu0 %254 }
 0x336   :  { %v259_v50 = vmul.f32 %v255_v3, %v472_v11 }
 0x338   :  { %v261_v51 = vadd.f32 1e-05, %v259_v50 }
 0x33a   :  { %377 = vrsqrt.f32 %v261_v51  ;;  %vm269_vm3 = vweird.f32 %v261_v51 }
 0x33d   :  { %v258_v52 = vpop.xlane.xlu1 %257 }
 0x33e   :  { %v260_v53 = vmul.f32 %v258_v52, %v472_v11 }
 0x340   :  { %v378_v54 = vpop.eup %377  ;;  %v262_v55 = vadd.f32 1e-05, %v260_v53 }
 0x341   :  { %v264_v56 = vmul.f32 %v378_v54, %v261_v51  ;;  %vm270_vm2 = vweird.f32 %v378_v54 }
 0x342   :  { %379 = vrsqrt.f32 %v262_v55  ;;  %vm271_vm4 = vmor %vm269_vm3, %vm270_vm2  ;;  %vm279_vm6 = vweird.f32 %v262_v55 }
 0x343   :  { %v265_v57 = vmul.f32 %v378_v54, %v264_v56 }
 0x345   :  { %v266_v58 = vmul.f32 0.5, %v265_v57 }
 0x347   :  { %v267_v59 = vsub.f32 1.5, %v266_v58 }
 0x348   :  { %v380_v60 = vpop.eup %379 }
 0x349   :  { %v268_v61 = vmul.f32 %v378_v54, %v267_v59  ;;  %v274_v62 = vmul.f32 %v380_v60, %v262_v55  ;;  %vm280_vm5 = vweird.f32 %v380_v60 }
 0x34a   :  { %vm281_vm7 = vmor %vm279_vm6, %vm280_vm5 }
 0x34b   :  { %v272_v0 = vsel %vm271_vm4, %v378_v54, %v268_v61  ;;  %v275_v2 = vmul.f32 %v380_v60, %v274_v62 }
 0x34c   :  { %v283_v11 = vmul.f32 %v272_v0, %v249_v43 }
 0x34d   :  { %v276_v5 = vmul.f32 0.5, %v275_v2 }
 0x34e   :  { %v288_v6 = vmul.f32 %v361_v63, %v283_v11 }
 0x34f   :  { %v277_v7 = vsub.f32 1.5, %v276_v5 }
 0x350   :  { %v293_v8 = vadd.f32 %v362_v4, %v288_v6 }
 0x351   :  { %v278_v9 = vmul.f32 %v380_v60, %v277_v7 }
 0x352   :  { %295 = vst.msk [vmem:[#allocation2] sm:$0xff] %vm40_vm0, %v293_v8 }
 0x353   :  { %v282_v10 = vsel %vm281_vm7, %v380_v60, %v278_v9 }
 0x354   :  { %v284_v12 = vmul.f32 %v282_v10, %v250_v47 }
 0x356   :  { %v289_v13 = vmul.f32 %v361_v63, %v284_v12 }
 0x358   :  { %v294_v14 = vadd.f32 %v362_v4, %v289_v13 }
 0x35a   :  { %296 = vst.msk [vmem:[#allocation2 + $0x8] sm:$0xff] %vm40_vm0, %v294_v14 }
 0x35b   :  { %309 = dma.vmem_to_hbm [thread:$0]  %s302_s28, 256, %s304_s10, [#allocation3], %s409_s8, %s409_s8, %s410_s0  }
 0x35c   :  { %405 = dma.done.wait [#allocation3], 256  }
 0x35d   :  { %406 = vsyncadd [#allocation3], 4294967040 }
 0x35e   :  { %314 = vsyncpa [#allocation3], 1 }

</bundles_post_ra>
